<compile_context>
chip_gen: v7x
topology: tpu7x:2x2x1
jax: 0.10.0
libtpu: 0.0.40
codegen_flags: <defaults>
</compile_context>

<pallas_src>
import jax
import jax.numpy as jnp
from jax import lax
from jax.experimental import pallas as pl
from jax.experimental.pallas import tpu as pltpu

KSIZE = 7
PAD = 3
N_ACC = 4           # independent accumulator chains (VPU ILP; no f32 FMA on v5e/v6e)
UNROLL_C_MAX = 32   # fully unroll the channel reduce for small C
STRIP_H = 32        # conv H-strip size: keeps accumulators + operands in vregs


def spatial_attn_kernel(x_ref, w_ref, b_ref, o_ref, red_ref, pad_ref):
    # x_ref  : (C, H*W)                  VMEM, lane-dense channel-major input (one image)
    # w_ref  : (98,)                     SMEM flat conv weight [c*49 + kh*7 + kw]
    # b_ref  : (1,)                      SMEM conv bias
    # o_ref  : (1, H, W)                 VMEM output block
    # red_ref: (2, H*W)                  VMEM scratch: lane-dense reduced planes (avg, max)
    # pad_ref: (2, H+2*PAD, W+2*PAD)     VMEM scratch: zero-padded planes for the conv
    C, HW = x_ref.shape
    _, H, W = o_ref.shape
    Hp = H + 2 * PAD
    Wp = W + 2 * PAD

    # ---- 1. Fused, single-pass, lane-dense channel mean & max ----------------
    if C <= UNROLL_C_MAX:
        row = x_ref[0]
        s, m = row, row
        for c in range(1, C):
            row = x_ref[c]
            s = s + row
            m = jnp.maximum(m, row)
    else:
        def body(c, carry):
            cs, cm = carry
            row = x_ref[c]                      # dynamic first-axis row load
            return cs + row, jnp.maximum(cm, row)
        row0 = x_ref[0]
        s, m = lax.fori_loop(1, C, body, (row0, row0))
    red_ref[0] = s * jnp.float32(1.0 / C)       # == torch.mean(x, dim=1)
    red_ref[1] = m                               # == torch.max(x, dim=1).values

    # ---- 2. Zero only the thin pad borders (every step: megacore-safe) -------
    pad_ref[:, 0:PAD, :] = jnp.zeros((2, PAD, Wp), jnp.float32)
    pad_ref[:, PAD + H:Hp, :] = jnp.zeros((2, PAD, Wp), jnp.float32)
    pad_ref[:, :, 0:PAD] = jnp.zeros((2, Hp, PAD), jnp.float32)
    pad_ref[:, :, PAD + W:Wp] = jnp.zeros((2, Hp, PAD), jnp.float32)

    # ---- 3. Relayout ONLY the 2 reduced planes: (H*W,) rows -> (H, W) interior
    for h in range(H):
        pad_ref[:, PAD + h, PAD:PAD + W] = red_ref[:, h * W:(h + 1) * W]

    # ---- 4. 7x7 conv (2 -> 1 ch) + sigmoid on the VPU, H-strip tiled ---------
    bias = b_ref[0]
    for h0 in range(0, H, STRIP_H):
        sh = min(STRIP_H, H - h0)
        accs = [jnp.zeros((sh, W), jnp.float32) for _ in range(N_ACC)]
        t = 0
        for c in range(2):
            for kh in range(KSIZE):
                # One band load per (c, kh); the 7 kw shifts are XLU value slices.
                band = pad_ref[c, h0 + kh:h0 + kh + sh, :]          # (sh, Wp)
                for kw in range(KSIZE):
                    wgt = w_ref[c * (KSIZE * KSIZE) + kh * KSIZE + kw]
                    accs[t % N_ACC] = accs[t % N_ACC] + wgt * band[:, kw:kw + W]
                    t += 1
        conv = (accs[0] + accs[1]) + (accs[2] + accs[3]) + bias
        sig = 1.0 / (1.0 + jnp.exp(-conv))
        o_ref[0, h0:h0 + sh, :] = sig.astype(o_ref.dtype)


def _vmem_limit_bytes():
    # Generation-aware VMEM budget with headroom for compiler-internal scratch:
    # v7x (64 MiB/TC) -> ~56 MiB, v5e/v6e (128 MiB) -> ~112 MiB.
    try:
        cap = int(pltpu.get_tpu_info().vmem_capacity_bytes)
    except Exception:
        cap = 64 * 1024 * 1024
    return max(cap * 7 // 8, 32 * 1024 * 1024)


def spatial_attention(x, w, b):
    """x: (N, C, H, W) f32; w: (2, 7, 7) conv weight (out-channel squeezed); b: (1,)."""
    N, C, H, W = x.shape
    HW = H * W
    x_flat = x.reshape(N, C, HW)                  # free reshape: contiguous NCHW
    w_flat = w.reshape(-1).astype(jnp.float32)    # (98,) flat SMEM weight
    b = b.astype(jnp.float32)
    return pl.pallas_call(
        spatial_attn_kernel,
        out_shape=jax.ShapeDtypeStruct((N, 1, H, W), x.dtype),
        grid_spec=pltpu.PrefetchScalarGridSpec(
            num_scalar_prefetch=0,
            grid=(N,),
            in_specs=[
                pl.BlockSpec((None, C, HW), lambda n: (n, 0, 0)),
                pl.BlockSpec(memory_space=pltpu.MemorySpace.SMEM),
                pl.BlockSpec(memory_space=pltpu.MemorySpace.SMEM),
            ],
            out_specs=pl.BlockSpec((None, 1, H, W), lambda n: (n, 0, 0, 0)),
            scratch_shapes=[
                pltpu.VMEM((2, HW), jnp.float32),
                pltpu.VMEM((2, H + 2 * PAD, W + 2 * PAD), jnp.float32),
            ],
        ),
        compiler_params=pltpu.CompilerParams(
            dimension_semantics=("parallel",),
            vmem_limit_bytes=_vmem_limit_bytes(),
        ),
    )(x_flat, w_flat, b)


def reference(x, w, b):
    # Pure-JAX reference of the PyTorch forward, for verification.
    avg = jnp.mean(x, axis=1, keepdims=True)
    mx = jnp.max(x, axis=1, keepdims=True)
    cat = jnp.concatenate([avg, mx], axis=1)               # (N, 2, H, W)
    out = jax.lax.conv_general_dilated(
        cat, w[None, :, :, :],                             # (1, 2, 7, 7)
        window_strides=(1, 1), padding=((PAD, PAD), (PAD, PAD)),
        dimension_numbers=("NCHW", "OIHW", "NCHW"),
    ) + b[0]
    return jax.nn.sigmoid(out)


if __name__ == "__main__":
    key = jax.random.PRNGKey(0)
    kx, kw, kb = jax.random.split(key, 3)

    N, C, H, W = 2, 4, 16, 16
    x = jax.random.normal(kx, (N, C, H, W), dtype=jnp.float32)

    # Deterministic conv params (PyTorch-style uniform bound: 1/sqrt(fan_in)).
    fan_in = 2 * KSIZE * KSIZE
    bound = 1.0 / (fan_in ** 0.5)
    w = jax.random.uniform(kw, (2, KSIZE, KSIZE), jnp.float32, -bound, bound)
    b = jax.random.uniform(kb, (1,), jnp.float32, -bound, bound)

    out = spatial_attention(x, w, b)
    out = jax.block_until_ready(out)

    ref = reference(x, w, b)
    assert out.shape == (N, 1, H, W)
    assert jnp.allclose(out, ref, atol=1e-5, rtol=1e-5)

    print("KERNEL_OK")
</pallas_src>

<mosaic_0001>
module attributes {stable_mosaic.version = 11 : i64} {
  func.func @spatial_attn_kernel(%arg0: i32, %arg1: memref<1x4x256xf32, #tpu.memory_space<vmem>>, %arg2: memref<98xf32, #tpu.memory_space<smem>>, %arg3: memref<1xf32, #tpu.memory_space<smem>>, %arg4: memref<1x1x16x16xf32, #tpu.memory_space<vmem>>, %arg5: memref<2x256xf32, #tpu.memory_space<vmem>>, %arg6: memref<2x22x22xf32, #tpu.memory_space<vmem>>) attributes {dimension_semantics = [#tpu.dimension_semantics<parallel>], iteration_bounds = array<i64: 2>, scalar_prefetch = 0 : i64, scratch_operands = 2 : i64, tpu.core_type = #tpu.core_type<tc>, window_params = [{transform_indices = @transform_0, window_bounds = array<i64: 1, 4, 256>}, {transform_indices = @transform_1, window_bounds = array<i64: 98>}, {transform_indices = @transform_2, window_bounds = array<i64: 1>}, {transform_indices = @transform_3, window_bounds = array<i64: 1, 1, 16, 16>}]} {
    %c0 = arith.constant 0 : index
    %c0_0 = arith.constant 0 : index
    %c0_1 = arith.constant 0 : index
    %0 = vector.load %arg1[%c0, %c0_0, %c0_1] : memref<1x4x256xf32, #tpu.memory_space<vmem>>, vector<1x1x256xf32>
    %1 = vector.shape_cast %0 : vector<1x1x256xf32> to vector<256xf32>
    %c0_2 = arith.constant 0 : index
    %c1 = arith.constant 1 : index
    %c0_3 = arith.constant 0 : index
    %2 = vector.load %arg1[%c0_2, %c1, %c0_3] : memref<1x4x256xf32, #tpu.memory_space<vmem>>, vector<1x1x256xf32>
    %3 = vector.shape_cast %2 : vector<1x1x256xf32> to vector<256xf32>
    %4 = arith.addf %1, %3 : vector<256xf32>
    %5 = arith.maximumf %1, %3 : vector<256xf32>
    %c0_4 = arith.constant 0 : index
    %c2 = arith.constant 2 : index
    %c0_5 = arith.constant 0 : index
    %6 = vector.load %arg1[%c0_4, %c2, %c0_5] : memref<1x4x256xf32, #tpu.memory_space<vmem>>, vector<1x1x256xf32>
    %7 = vector.shape_cast %6 : vector<1x1x256xf32> to vector<256xf32>
    %8 = arith.addf %4, %7 : vector<256xf32>
    %9 = arith.maximumf %5, %7 : vector<256xf32>
    %c0_6 = arith.constant 0 : index
    %c3 = arith.constant 3 : index
    %c0_7 = arith.constant 0 : index
    %10 = vector.load %arg1[%c0_6, %c3, %c0_7] : memref<1x4x256xf32, #tpu.memory_space<vmem>>, vector<1x1x256xf32>
    %11 = vector.shape_cast %10 : vector<1x1x256xf32> to vector<256xf32>
    %12 = arith.addf %8, %11 : vector<256xf32>
    %13 = arith.maximumf %9, %11 : vector<256xf32>
    %cst = arith.constant 2.500000e-01 : f32
    %14 = vector.broadcast %cst : f32 to vector<256xf32>
    %15 = arith.mulf %12, %14 : vector<256xf32>
    %c0_8 = arith.constant 0 : index
    %c0_9 = arith.constant 0 : index
    %16 = vector.load %arg5[%c0_8, %c0_9] : memref<2x256xf32, #tpu.memory_space<vmem>>, vector<1x256xf32>
    %17 = vector.shape_cast %16 : vector<1x256xf32> to vector<256xf32>
    %18 = vector.shape_cast %15 : vector<256xf32> to vector<1x256xf32>
    tpu.vector_store %arg5[%c0_8, %c0_9], %18 {strides = array<i32>} : memref<2x256xf32, #tpu.memory_space<vmem>>, vector<1x256xf32>,
    %c1_10 = arith.constant 1 : index
    %c0_11 = arith.constant 0 : index
    %19 = vector.load %arg5[%c1_10, %c0_11] : memref<2x256xf32, #tpu.memory_space<vmem>>, vector<1x256xf32>
    %20 = vector.shape_cast %19 : vector<1x256xf32> to vector<256xf32>
    %21 = vector.shape_cast %13 : vector<256xf32> to vector<1x256xf32>
    tpu.vector_store %arg5[%c1_10, %c0_11], %21 {strides = array<i32>} : memref<2x256xf32, #tpu.memory_space<vmem>>, vector<1x256xf32>,
    %cst_12 = arith.constant 0.000000e+00 : f32
    %22 = vector.broadcast %cst_12 : f32 to vector<2x3x22xf32>
    %c0_13 = arith.constant 0 : index
    %c0_14 = arith.constant 0 : index
    %c0_15 = arith.constant 0 : index
    %23 = vector.load %arg6[%c0_13, %c0_14, %c0_15] : memref<2x22x22xf32, #tpu.memory_space<vmem>>, vector<2x3x22xf32>
    tpu.vector_store %arg6[%c0_13, %c0_14, %c0_15], %22 {strides = array<i32>} : memref<2x22x22xf32, #tpu.memory_space<vmem>>, vector<2x3x22xf32>,
    %cst_16 = arith.constant 0.000000e+00 : f32
    %24 = vector.broadcast %cst_16 : f32 to vector<2x3x22xf32>
    %c0_17 = arith.constant 0 : index
    %c19 = arith.constant 19 : index
    %c0_18 = arith.constant 0 : index
    %25 = vector.load %arg6[%c0_17, %c19, %c0_18] : memref<2x22x22xf32, #tpu.memory_space<vmem>>, vector<2x3x22xf32>
    tpu.vector_store %arg6[%c0_17, %c19, %c0_18], %24 {strides = array<i32>} : memref<2x22x22xf32, #tpu.memory_space<vmem>>, vector<2x3x22xf32>,
    %cst_19 = arith.constant 0.000000e+00 : f32
    %26 = vector.broadcast %cst_19 : f32 to vector<2x22x3xf32>
    %c0_20 = arith.constant 0 : index
    %c0_21 = arith.constant 0 : index
    %c0_22 = arith.constant 0 : index
    %27 = vector.load %arg6[%c0_20, %c0_21, %c0_22] : memref<2x22x22xf32, #tpu.memory_space<vmem>>, vector<2x22x3xf32>
    tpu.vector_store %arg6[%c0_20, %c0_21, %c0_22], %26 {strides = array<i32>} : memref<2x22x22xf32, #tpu.memory_space<vmem>>, vector<2x22x3xf32>,
    %cst_23 = arith.constant 0.000000e+00 : f32
    %28 = vector.broadcast %cst_23 : f32 to vector<2x22x3xf32>
    %c0_24 = arith.constant 0 : index
    %c0_25 = arith.constant 0 : index
    %c19_26 = arith.constant 19 : index
    %29 = vector.load %arg6[%c0_24, %c0_25, %c19_26] : memref<2x22x22xf32, #tpu.memory_space<vmem>>, vector<2x22x3xf32>
    tpu.vector_store %arg6[%c0_24, %c0_25, %c19_26], %28 {strides = array<i32>} : memref<2x22x22xf32, #tpu.memory_space<vmem>>, vector<2x22x3xf32>,
    %c0_27 = arith.constant 0 : index
    %c0_28 = arith.constant 0 : index
    %30 = vector.load %arg5[%c0_27, %c0_28] : memref<2x256xf32, #tpu.memory_space<vmem>>, vector<2x16xf32>
    %c0_29 = arith.constant 0 : index
    %c3_30 = arith.constant 3 : index
    %c3_31 = arith.constant 3 : index
    %31 = vector.load %arg6[%c0_29, %c3_30, %c3_31] : memref<2x22x22xf32, #tpu.memory_space<vmem>>, vector<2x1x16xf32>
    %32 = vector.shape_cast %31 : vector<2x1x16xf32> to vector<2x16xf32>
    %33 = vector.shape_cast %30 : vector<2x16xf32> to vector<2x1x16xf32>
    tpu.vector_store %arg6[%c0_29, %c3_30, %c3_31], %33 {strides = array<i32>} : memref<2x22x22xf32, #tpu.memory_space<vmem>>, vector<2x1x16xf32>,
    %c0_32 = arith.constant 0 : index
    %c16 = arith.constant 16 : index
    %34 = vector.load %arg5[%c0_32, %c16] : memref<2x256xf32, #tpu.memory_space<vmem>>, vector<2x16xf32>
    %c0_33 = arith.constant 0 : index
    %c4 = arith.constant 4 : index
    %c3_34 = arith.constant 3 : index
    %35 = vector.load %arg6[%c0_33, %c4, %c3_34] : memref<2x22x22xf32, #tpu.memory_space<vmem>>, vector<2x1x16xf32>
    %36 = vector.shape_cast %35 : vector<2x1x16xf32> to vector<2x16xf32>
    %37 = vector.shape_cast %34 : vector<2x16xf32> to vector<2x1x16xf32>
    tpu.vector_store %arg6[%c0_33, %c4, %c3_34], %37 {strides = array<i32>} : memref<2x22x22xf32, #tpu.memory_space<vmem>>, vector<2x1x16xf32>,
    %c0_35 = arith.constant 0 : index
    %c32 = arith.constant 32 : index
    %38 = vector.load %arg5[%c0_35, %c32] : memref<2x256xf32, #tpu.memory_space<vmem>>, vector<2x16xf32>
    %c0_36 = arith.constant 0 : index
    %c5 = arith.constant 5 : index
    %c3_37 = arith.constant 3 : index
    %39 = vector.load %arg6[%c0_36, %c5, %c3_37] : memref<2x22x22xf32, #tpu.memory_space<vmem>>, vector<2x1x16xf32>
    %40 = vector.shape_cast %39 : vector<2x1x16xf32> to vector<2x16xf32>
    %41 = vector.shape_cast %38 : vector<2x16xf32> to vector<2x1x16xf32>
    tpu.vector_store %arg6[%c0_36, %c5, %c3_37], %41 {strides = array<i32>} : memref<2x22x22xf32, #tpu.memory_space<vmem>>, vector<2x1x16xf32>,
    %c0_38 = arith.constant 0 : index
    %c48 = arith.constant 48 : index
    %42 = vector.load %arg5[%c0_38, %c48] : memref<2x256xf32, #tpu.memory_space<vmem>>, vector<2x16xf32>
    %c0_39 = arith.constant 0 : index
    %c6 = arith.constant 6 : index
    %c3_40 = arith.constant 3 : index
    %43 = vector.load %arg6[%c0_39, %c6, %c3_40] : memref<2x22x22xf32, #tpu.memory_space<vmem>>, vector<2x1x16xf32>
    %44 = vector.shape_cast %43 : vector<2x1x16xf32> to vector<2x16xf32>
    %45 = vector.shape_cast %42 : vector<2x16xf32> to vector<2x1x16xf32>
    tpu.vector_store %arg6[%c0_39, %c6, %c3_40], %45 {strides = array<i32>} : memref<2x22x22xf32, #tpu.memory_space<vmem>>, vector<2x1x16xf32>,
    %c0_41 = arith.constant 0 : index
    %c64 = arith.constant 64 : index
    %46 = vector.load %arg5[%c0_41, %c64] : memref<2x256xf32, #tpu.memory_space<vmem>>, vector<2x16xf32>
    %c0_42 = arith.constant 0 : index
    %c7 = arith.constant 7 : index
    %c3_43 = arith.constant 3 : index
    %47 = vector.load %arg6[%c0_42, %c7, %c3_43] : memref<2x22x22xf32, #tpu.memory_space<vmem>>, vector<2x1x16xf32>
    %48 = vector.shape_cast %47 : vector<2x1x16xf32> to vector<2x16xf32>
    %49 = vector.shape_cast %46 : vector<2x16xf32> to vector<2x1x16xf32>
    tpu.vector_store %arg6[%c0_42, %c7, %c3_43], %49 {strides = array<i32>} : memref<2x22x22xf32, #tpu.memory_space<vmem>>, vector<2x1x16xf32>,
    %c0_44 = arith.constant 0 : index
    %c80 = arith.constant 80 : index
    %50 = vector.load %arg5[%c0_44, %c80] : memref<2x256xf32, #tpu.memory_space<vmem>>, vector<2x16xf32>
    %c0_45 = arith.constant 0 : index
    %c8 = arith.constant 8 : index
    %c3_46 = arith.constant 3 : index
    %51 = vector.load %arg6[%c0_45, %c8, %c3_46] : memref<2x22x22xf32, #tpu.memory_space<vmem>>, vector<2x1x16xf32>
    %52 = vector.shape_cast %51 : vector<2x1x16xf32> to vector<2x16xf32>
    %53 = vector.shape_cast %50 : vector<2x16xf32> to vector<2x1x16xf32>
    tpu.vector_store %arg6[%c0_45, %c8, %c3_46], %53 {strides = array<i32>} : memref<2x22x22xf32, #tpu.memory_space<vmem>>, vector<2x1x16xf32>,
    %c0_47 = arith.constant 0 : index
    %c96 = arith.constant 96 : index
    %54 = vector.load %arg5[%c0_47, %c96] : memref<2x256xf32, #tpu.memory_space<vmem>>, vector<2x16xf32>
    %c0_48 = arith.constant 0 : index
    %c9 = arith.constant 9 : index
    %c3_49 = arith.constant 3 : index
    %55 = vector.load %arg6[%c0_48, %c9, %c3_49] : memref<2x22x22xf32, #tpu.memory_space<vmem>>, vector<2x1x16xf32>
    %56 = vector.shape_cast %55 : vector<2x1x16xf32> to vector<2x16xf32>
    %57 = vector.shape_cast %54 : vector<2x16xf32> to vector<2x1x16xf32>
    tpu.vector_store %arg6[%c0_48, %c9, %c3_49], %57 {strides = array<i32>} : memref<2x22x22xf32, #tpu.memory_space<vmem>>, vector<2x1x16xf32>,
    %c0_50 = arith.constant 0 : index
    %c112 = arith.constant 112 : index
    %58 = vector.load %arg5[%c0_50, %c112] : memref<2x256xf32, #tpu.memory_space<vmem>>, vector<2x16xf32>
    %c0_51 = arith.constant 0 : index
    %c10 = arith.constant 10 : index
    %c3_52 = arith.constant 3 : index
    %59 = vector.load %arg6[%c0_51, %c10, %c3_52] : memref<2x22x22xf32, #tpu.memory_space<vmem>>, vector<2x1x16xf32>
    %60 = vector.shape_cast %59 : vector<2x1x16xf32> to vector<2x16xf32>
    %61 = vector.shape_cast %58 : vector<2x16xf32> to vector<2x1x16xf32>
    tpu.vector_store %arg6[%c0_51, %c10, %c3_52], %61 {strides = array<i32>} : memref<2x22x22xf32, #tpu.memory_space<vmem>>, vector<2x1x16xf32>,
    %c0_53 = arith.constant 0 : index
    %c128 = arith.constant 128 : index
    %62 = vector.load %arg5[%c0_53, %c128] : memref<2x256xf32, #tpu.memory_space<vmem>>, vector<2x16xf32>
    %c0_54 = arith.constant 0 : index
    %c11 = arith.constant 11 : index
    %c3_55 = arith.constant 3 : index
    %63 = vector.load %arg6[%c0_54, %c11, %c3_55] : memref<2x22x22xf32, #tpu.memory_space<vmem>>, vector<2x1x16xf32>
    %64 = vector.shape_cast %63 : vector<2x1x16xf32> to vector<2x16xf32>
    %65 = vector.shape_cast %62 : vector<2x16xf32> to vector<2x1x16xf32>
    tpu.vector_store %arg6[%c0_54, %c11, %c3_55], %65 {strides = array<i32>} : memref<2x22x22xf32, #tpu.memory_space<vmem>>, vector<2x1x16xf32>,
    %c0_56 = arith.constant 0 : index
    %c144 = arith.constant 144 : index
    %66 = vector.load %arg5[%c0_56, %c144] : memref<2x256xf32, #tpu.memory_space<vmem>>, vector<2x16xf32>
    %c0_57 = arith.constant 0 : index
    %c12 = arith.constant 12 : index
    %c3_58 = arith.constant 3 : index
    %67 = vector.load %arg6[%c0_57, %c12, %c3_58] : memref<2x22x22xf32, #tpu.memory_space<vmem>>, vector<2x1x16xf32>
    %68 = vector.shape_cast %67 : vector<2x1x16xf32> to vector<2x16xf32>
    %69 = vector.shape_cast %66 : vector<2x16xf32> to vector<2x1x16xf32>
    tpu.vector_store %arg6[%c0_57, %c12, %c3_58], %69 {strides = array<i32>} : memref<2x22x22xf32, #tpu.memory_space<vmem>>, vector<2x1x16xf32>,
    %c0_59 = arith.constant 0 : index
    %c160 = arith.constant 160 : index
    %70 = vector.load %arg5[%c0_59, %c160] : memref<2x256xf32, #tpu.memory_space<vmem>>, vector<2x16xf32>
    %c0_60 = arith.constant 0 : index
    %c13 = arith.constant 13 : index
    %c3_61 = arith.constant 3 : index
    %71 = vector.load %arg6[%c0_60, %c13, %c3_61] : memref<2x22x22xf32, #tpu.memory_space<vmem>>, vector<2x1x16xf32>
    %72 = vector.shape_cast %71 : vector<2x1x16xf32> to vector<2x16xf32>
    %73 = vector.shape_cast %70 : vector<2x16xf32> to vector<2x1x16xf32>
    tpu.vector_store %arg6[%c0_60, %c13, %c3_61], %73 {strides = array<i32>} : memref<2x22x22xf32, #tpu.memory_space<vmem>>, vector<2x1x16xf32>,
    %c0_62 = arith.constant 0 : index
    %c176 = arith.constant 176 : index
    %74 = vector.load %arg5[%c0_62, %c176] : memref<2x256xf32, #tpu.memory_space<vmem>>, vector<2x16xf32>
    %c0_63 = arith.constant 0 : index
    %c14 = arith.constant 14 : index
    %c3_64 = arith.constant 3 : index
    %75 = vector.load %arg6[%c0_63, %c14, %c3_64] : memref<2x22x22xf32, #tpu.memory_space<vmem>>, vector<2x1x16xf32>
    %76 = vector.shape_cast %75 : vector<2x1x16xf32> to vector<2x16xf32>
    %77 = vector.shape_cast %74 : vector<2x16xf32> to vector<2x1x16xf32>
    tpu.vector_store %arg6[%c0_63, %c14, %c3_64], %77 {strides = array<i32>} : memref<2x22x22xf32, #tpu.memory_space<vmem>>, vector<2x1x16xf32>,
    %c0_65 = arith.constant 0 : index
    %c192 = arith.constant 192 : index
    %78 = vector.load %arg5[%c0_65, %c192] : memref<2x256xf32, #tpu.memory_space<vmem>>, vector<2x16xf32>
    %c0_66 = arith.constant 0 : index
    %c15 = arith.constant 15 : index
    %c3_67 = arith.constant 3 : index
    %79 = vector.load %arg6[%c0_66, %c15, %c3_67] : memref<2x22x22xf32, #tpu.memory_space<vmem>>, vector<2x1x16xf32>
    %80 = vector.shape_cast %79 : vector<2x1x16xf32> to vector<2x16xf32>
    %81 = vector.shape_cast %78 : vector<2x16xf32> to vector<2x1x16xf32>
    tpu.vector_store %arg6[%c0_66, %c15, %c3_67], %81 {strides = array<i32>} : memref<2x22x22xf32, #tpu.memory_space<vmem>>, vector<2x1x16xf32>,
    %c0_68 = arith.constant 0 : index
    %c208 = arith.constant 208 : index
    %82 = vector.load %arg5[%c0_68, %c208] : memref<2x256xf32, #tpu.memory_space<vmem>>, vector<2x16xf32>
    %c0_69 = arith.constant 0 : index
    %c16_70 = arith.constant 16 : index
    %c3_71 = arith.constant 3 : index
    %83 = vector.load %arg6[%c0_69, %c16_70, %c3_71] : memref<2x22x22xf32, #tpu.memory_space<vmem>>, vector<2x1x16xf32>
    %84 = vector.shape_cast %83 : vector<2x1x16xf32> to vector<2x16xf32>
    %85 = vector.shape_cast %82 : vector<2x16xf32> to vector<2x1x16xf32>
    tpu.vector_store %arg6[%c0_69, %c16_70, %c3_71], %85 {strides = array<i32>} : memref<2x22x22xf32, #tpu.memory_space<vmem>>, vector<2x1x16xf32>,
    %c0_72 = arith.constant 0 : index
    %c224 = arith.constant 224 : index
    %86 = vector.load %arg5[%c0_72, %c224] : memref<2x256xf32, #tpu.memory_space<vmem>>, vector<2x16xf32>
    %c0_73 = arith.constant 0 : index
    %c17 = arith.constant 17 : index
    %c3_74 = arith.constant 3 : index
    %87 = vector.load %arg6[%c0_73, %c17, %c3_74] : memref<2x22x22xf32, #tpu.memory_space<vmem>>, vector<2x1x16xf32>
    %88 = vector.shape_cast %87 : vector<2x1x16xf32> to vector<2x16xf32>
    %89 = vector.shape_cast %86 : vector<2x16xf32> to vector<2x1x16xf32>
    tpu.vector_store %arg6[%c0_73, %c17, %c3_74], %89 {strides = array<i32>} : memref<2x22x22xf32, #tpu.memory_space<vmem>>, vector<2x1x16xf32>,
    %c0_75 = arith.constant 0 : index
    %c240 = arith.constant 240 : index
    %90 = vector.load %arg5[%c0_75, %c240] : memref<2x256xf32, #tpu.memory_space<vmem>>, vector<2x16xf32>
    %c0_76 = arith.constant 0 : index
    %c18 = arith.constant 18 : index
    %c3_77 = arith.constant 3 : index
    %91 = vector.load %arg6[%c0_76, %c18, %c3_77] : memref<2x22x22xf32, #tpu.memory_space<vmem>>, vector<2x1x16xf32>
    %92 = vector.shape_cast %91 : vector<2x1x16xf32> to vector<2x16xf32>
    %93 = vector.shape_cast %90 : vector<2x16xf32> to vector<2x1x16xf32>
    tpu.vector_store %arg6[%c0_76, %c18, %c3_77], %93 {strides = array<i32>} : memref<2x22x22xf32, #tpu.memory_space<vmem>>, vector<2x1x16xf32>,
    %c0_78 = arith.constant 0 : index
    %94 = memref.load %arg3[%c0_78] : memref<1xf32, #tpu.memory_space<smem>>
    %cst_79 = arith.constant 0.000000e+00 : f32
    %95 = vector.broadcast %cst_79 : f32 to vector<16x16xf32>
    %cst_80 = arith.constant 0.000000e+00 : f32
    %96 = vector.broadcast %cst_80 : f32 to vector<16x16xf32>
    %cst_81 = arith.constant 0.000000e+00 : f32
    %97 = vector.broadcast %cst_81 : f32 to vector<16x16xf32>
    %cst_82 = arith.constant 0.000000e+00 : f32
    %98 = vector.broadcast %cst_82 : f32 to vector<16x16xf32>
    %c0_83 = arith.constant 0 : index
    %c0_84 = arith.constant 0 : index
    %c0_85 = arith.constant 0 : index
    %99 = vector.load %arg6[%c0_83, %c0_84, %c0_85] : memref<2x22x22xf32, #tpu.memory_space<vmem>>, vector<1x16x22xf32>
    %100 = vector.shape_cast %99 : vector<1x16x22xf32> to vector<16x22xf32>
    %c0_86 = arith.constant 0 : index
    %101 = memref.load %arg2[%c0_86] : memref<98xf32, #tpu.memory_space<smem>>
    %102 = vector.extract_strided_slice %100 {offsets = [0, 0], sizes = [16, 16], strides = [1, 1]} : vector<16x22xf32> to vector<16x16xf32>
    %103 = vector.broadcast %101 : f32 to vector<16x16xf32>
    %104 = arith.mulf %103, %102 : vector<16x16xf32>
    %105 = arith.addf %95, %104 : vector<16x16xf32>
    %c1_87 = arith.constant 1 : index
    %106 = memref.load %arg2[%c1_87] : memref<98xf32, #tpu.memory_space<smem>>
    %107 = vector.extract_strided_slice %100 {offsets = [0, 1], sizes = [16, 16], strides = [1, 1]} : vector<16x22xf32> to vector<16x16xf32>
    %108 = vector.broadcast %106 : f32 to vector<16x16xf32>
    %109 = arith.mulf %108, %107 : vector<16x16xf32>
    %110 = arith.addf %96, %109 : vector<16x16xf32>
    %c2_88 = arith.constant 2 : index
    %111 = memref.load %arg2[%c2_88] : memref<98xf32, #tpu.memory_space<smem>>
    %112 = vector.extract_strided_slice %100 {offsets = [0, 2], sizes = [16, 16], strides = [1, 1]} : vector<16x22xf32> to vector<16x16xf32>
    %113 = vector.broadcast %111 : f32 to vector<16x16xf32>
    %114 = arith.mulf %113, %112 : vector<16x16xf32>
    %115 = arith.addf %97, %114 : vector<16x16xf32>
    %c3_89 = arith.constant 3 : index
    %116 = memref.load %arg2[%c3_89] : memref<98xf32, #tpu.memory_space<smem>>
    %117 = vector.extract_strided_slice %100 {offsets = [0, 3], sizes = [16, 16], strides = [1, 1]} : vector<16x22xf32> to vector<16x16xf32>
    %118 = vector.broadcast %116 : f32 to vector<16x16xf32>
    %119 = arith.mulf %118, %117 : vector<16x16xf32>
    %120 = arith.addf %98, %119 : vector<16x16xf32>
    %c4_90 = arith.constant 4 : index
    %121 = memref.load %arg2[%c4_90] : memref<98xf32, #tpu.memory_space<smem>>
    %122 = vector.extract_strided_slice %100 {offsets = [0, 4], sizes = [16, 16], strides = [1, 1]} : vector<16x22xf32> to vector<16x16xf32>
    %123 = vector.broadcast %121 : f32 to vector<16x16xf32>
    %124 = arith.mulf %123, %122 : vector<16x16xf32>
    %125 = arith.addf %105, %124 : vector<16x16xf32>
    %c5_91 = arith.constant 5 : index
    %126 = memref.load %arg2[%c5_91] : memref<98xf32, #tpu.memory_space<smem>>
    %127 = vector.extract_strided_slice %100 {offsets = [0, 5], sizes = [16, 16], strides = [1, 1]} : vector<16x22xf32> to vector<16x16xf32>
    %128 = vector.broadcast %126 : f32 to vector<16x16xf32>
    %129 = arith.mulf %128, %127 : vector<16x16xf32>
    %130 = arith.addf %110, %129 : vector<16x16xf32>
    %c6_92 = arith.constant 6 : index
    %131 = memref.load %arg2[%c6_92] : memref<98xf32, #tpu.memory_space<smem>>
    %132 = vector.extract_strided_slice %100 {offsets = [0, 6], sizes = [16, 16], strides = [1, 1]} : vector<16x22xf32> to vector<16x16xf32>
    %133 = vector.broadcast %131 : f32 to vector<16x16xf32>
    %134 = arith.mulf %133, %132 : vector<16x16xf32>
    %135 = arith.addf %115, %134 : vector<16x16xf32>
    %c0_93 = arith.constant 0 : index
    %c1_94 = arith.constant 1 : index
    %c0_95 = arith.constant 0 : index
    %136 = vector.load %arg6[%c0_93, %c1_94, %c0_95] : memref<2x22x22xf32, #tpu.memory_space<vmem>>, vector<1x16x22xf32>
    %137 = vector.shape_cast %136 : vector<1x16x22xf32> to vector<16x22xf32>
    %c7_96 = arith.constant 7 : index
    %138 = memref.load %arg2[%c7_96] : memref<98xf32, #tpu.memory_space<smem>>
    %139 = vector.extract_strided_slice %137 {offsets = [0, 0], sizes = [16, 16], strides = [1, 1]} : vector<16x22xf32> to vector<16x16xf32>
    %140 = vector.broadcast %138 : f32 to vector<16x16xf32>
    %141 = arith.mulf %140, %139 : vector<16x16xf32>
    %142 = arith.addf %120, %141 : vector<16x16xf32>
    %c8_97 = arith.constant 8 : index
    %143 = memref.load %arg2[%c8_97] : memref<98xf32, #tpu.memory_space<smem>>
    %144 = vector.extract_strided_slice %137 {offsets = [0, 1], sizes = [16, 16], strides = [1, 1]} : vector<16x22xf32> to vector<16x16xf32>
    %145 = vector.broadcast %143 : f32 to vector<16x16xf32>
    %146 = arith.mulf %145, %144 : vector<16x16xf32>
    %147 = arith.addf %125, %146 : vector<16x16xf32>
    %c9_98 = arith.constant 9 : index
    %148 = memref.load %arg2[%c9_98] : memref<98xf32, #tpu.memory_space<smem>>
    %149 = vector.extract_strided_slice %137 {offsets = [0, 2], sizes = [16, 16], strides = [1, 1]} : vector<16x22xf32> to vector<16x16xf32>
    %150 = vector.broadcast %148 : f32 to vector<16x16xf32>
    %151 = arith.mulf %150, %149 : vector<16x16xf32>
    %152 = arith.addf %130, %151 : vector<16x16xf32>
    %c10_99 = arith.constant 10 : index
    %153 = memref.load %arg2[%c10_99] : memref<98xf32, #tpu.memory_space<smem>>
    %154 = vector.extract_strided_slice %137 {offsets = [0, 3], sizes = [16, 16], strides = [1, 1]} : vector<16x22xf32> to vector<16x16xf32>
    %155 = vector.broadcast %153 : f32 to vector<16x16xf32>
    %156 = arith.mulf %155, %154 : vector<16x16xf32>
    %157 = arith.addf %135, %156 : vector<16x16xf32>
    %c11_100 = arith.constant 11 : index
    %158 = memref.load %arg2[%c11_100] : memref<98xf32, #tpu.memory_space<smem>>
    %159 = vector.extract_strided_slice %137 {offsets = [0, 4], sizes = [16, 16], strides = [1, 1]} : vector<16x22xf32> to vector<16x16xf32>
    %160 = vector.broadcast %158 : f32 to vector<16x16xf32>
    %161 = arith.mulf %160, %159 : vector<16x16xf32>
    %162 = arith.addf %142, %161 : vector<16x16xf32>
    %c12_101 = arith.constant 12 : index
    %163 = memref.load %arg2[%c12_101] : memref<98xf32, #tpu.memory_space<smem>>
    %164 = vector.extract_strided_slice %137 {offsets = [0, 5], sizes = [16, 16], strides = [1, 1]} : vector<16x22xf32> to vector<16x16xf32>
    %165 = vector.broadcast %163 : f32 to vector<16x16xf32>
    %166 = arith.mulf %165, %164 : vector<16x16xf32>
    %167 = arith.addf %147, %166 : vector<16x16xf32>
    %c13_102 = arith.constant 13 : index
    %168 = memref.load %arg2[%c13_102] : memref<98xf32, #tpu.memory_space<smem>>
    %169 = vector.extract_strided_slice %137 {offsets = [0, 6], sizes = [16, 16], strides = [1, 1]} : vector<16x22xf32> to vector<16x16xf32>
    %170 = vector.broadcast %168 : f32 to vector<16x16xf32>
    %171 = arith.mulf %170, %169 : vector<16x16xf32>
    %172 = arith.addf %152, %171 : vector<16x16xf32>
    %c0_103 = arith.constant 0 : index
    %c2_104 = arith.constant 2 : index
    %c0_105 = arith.constant 0 : index
    %173 = vector.load %arg6[%c0_103, %c2_104, %c0_105] : memref<2x22x22xf32, #tpu.memory_space<vmem>>, vector<1x16x22xf32>
    %174 = vector.shape_cast %173 : vector<1x16x22xf32> to vector<16x22xf32>
    %c14_106 = arith.constant 14 : index
    %175 = memref.load %arg2[%c14_106] : memref<98xf32, #tpu.memory_space<smem>>
    %176 = vector.extract_strided_slice %174 {offsets = [0, 0], sizes = [16, 16], strides = [1, 1]} : vector<16x22xf32> to vector<16x16xf32>
    %177 = vector.broadcast %175 : f32 to vector<16x16xf32>
    %178 = arith.mulf %177, %176 : vector<16x16xf32>
    %179 = arith.addf %157, %178 : vector<16x16xf32>
    %c15_107 = arith.constant 15 : index
    %180 = memref.load %arg2[%c15_107] : memref<98xf32, #tpu.memory_space<smem>>
    %181 = vector.extract_strided_slice %174 {offsets = [0, 1], sizes = [16, 16], strides = [1, 1]} : vector<16x22xf32> to vector<16x16xf32>
    %182 = vector.broadcast %180 : f32 to vector<16x16xf32>
    %183 = arith.mulf %182, %181 : vector<16x16xf32>
    %184 = arith.addf %162, %183 : vector<16x16xf32>
    %c16_108 = arith.constant 16 : index
    %185 = memref.load %arg2[%c16_108] : memref<98xf32, #tpu.memory_space<smem>>
    %186 = vector.extract_strided_slice %174 {offsets = [0, 2], sizes = [16, 16], strides = [1, 1]} : vector<16x22xf32> to vector<16x16xf32>
    %187 = vector.broadcast %185 : f32 to vector<16x16xf32>
    %188 = arith.mulf %187, %186 : vector<16x16xf32>
    %189 = arith.addf %167, %188 : vector<16x16xf32>
    %c17_109 = arith.constant 17 : index
    %190 = memref.load %arg2[%c17_109] : memref<98xf32, #tpu.memory_space<smem>>
    %191 = vector.extract_strided_slice %174 {offsets = [0, 3], sizes = [16, 16], strides = [1, 1]} : vector<16x22xf32> to vector<16x16xf32>
    %192 = vector.broadcast %190 : f32 to vector<16x16xf32>
    %193 = arith.mulf %192, %191 : vector<16x16xf32>
    %194 = arith.addf %172, %193 : vector<16x16xf32>
    %c18_110 = arith.constant 18 : index
    %195 = memref.load %arg2[%c18_110] : memref<98xf32, #tpu.memory_space<smem>>
    %196 = vector.extract_strided_slice %174 {offsets = [0, 4], sizes = [16, 16], strides = [1, 1]} : vector<16x22xf32> to vector<16x16xf32>
    %197 = vector.broadcast %195 : f32 to vector<16x16xf32>
    %198 = arith.mulf %197, %196 : vector<16x16xf32>
    %199 = arith.addf %179, %198 : vector<16x16xf32>
    %c19_111 = arith.constant 19 : index
    %200 = memref.load %arg2[%c19_111] : memref<98xf32, #tpu.memory_space<smem>>
    %201 = vector.extract_strided_slice %174 {offsets = [0, 5], sizes = [16, 16], strides = [1, 1]} : vector<16x22xf32> to vector<16x16xf32>
    %202 = vector.broadcast %200 : f32 to vector<16x16xf32>
    %203 = arith.mulf %202, %201 : vector<16x16xf32>
    %204 = arith.addf %184, %203 : vector<16x16xf32>
    %c20 = arith.constant 20 : index
    %205 = memref.load %arg2[%c20] : memref<98xf32, #tpu.memory_space<smem>>
    %206 = vector.extract_strided_slice %174 {offsets = [0, 6], sizes = [16, 16], strides = [1, 1]} : vector<16x22xf32> to vector<16x16xf32>
    %207 = vector.broadcast %205 : f32 to vector<16x16xf32>
    %208 = arith.mulf %207, %206 : vector<16x16xf32>
    %209 = arith.addf %189, %208 : vector<16x16xf32>
    %c0_112 = arith.constant 0 : index
    %c3_113 = arith.constant 3 : index
    %c0_114 = arith.constant 0 : index
    %210 = vector.load %arg6[%c0_112, %c3_113, %c0_114] : memref<2x22x22xf32, #tpu.memory_space<vmem>>, vector<1x16x22xf32>
    %211 = vector.shape_cast %210 : vector<1x16x22xf32> to vector<16x22xf32>
    %c21 = arith.constant 21 : index
    %212 = memref.load %arg2[%c21] : memref<98xf32, #tpu.memory_space<smem>>
    %213 = vector.extract_strided_slice %211 {offsets = [0, 0], sizes = [16, 16], strides = [1, 1]} : vector<16x22xf32> to vector<16x16xf32>
    %214 = vector.broadcast %212 : f32 to vector<16x16xf32>
    %215 = arith.mulf %214, %213 : vector<16x16xf32>
    %216 = arith.addf %194, %215 : vector<16x16xf32>
    %c22 = arith.constant 22 : index
    %217 = memref.load %arg2[%c22] : memref<98xf32, #tpu.memory_space<smem>>
    %218 = vector.extract_strided_slice %211 {offsets = [0, 1], sizes = [16, 16], strides = [1, 1]} : vector<16x22xf32> to vector<16x16xf32>
    %219 = vector.broadcast %217 : f32 to vector<16x16xf32>
    %220 = arith.mulf %219, %218 : vector<16x16xf32>
    %221 = arith.addf %199, %220 : vector<16x16xf32>
    %c23 = arith.constant 23 : index
    %222 = memref.load %arg2[%c23] : memref<98xf32, #tpu.memory_space<smem>>
    %223 = vector.extract_strided_slice %211 {offsets = [0, 2], sizes = [16, 16], strides = [1, 1]} : vector<16x22xf32> to vector<16x16xf32>
    %224 = vector.broadcast %222 : f32 to vector<16x16xf32>
    %225 = arith.mulf %224, %223 : vector<16x16xf32>
    %226 = arith.addf %204, %225 : vector<16x16xf32>
    %c24 = arith.constant 24 : index
    %227 = memref.load %arg2[%c24] : memref<98xf32, #tpu.memory_space<smem>>
    %228 = vector.extract_strided_slice %211 {offsets = [0, 3], sizes = [16, 16], strides = [1, 1]} : vector<16x22xf32> to vector<16x16xf32>
    %229 = vector.broadcast %227 : f32 to vector<16x16xf32>
    %230 = arith.mulf %229, %228 : vector<16x16xf32>
    %231 = arith.addf %209, %230 : vector<16x16xf32>
    %c25 = arith.constant 25 : index
    %232 = memref.load %arg2[%c25] : memref<98xf32, #tpu.memory_space<smem>>
    %233 = vector.extract_strided_slice %211 {offsets = [0, 4], sizes = [16, 16], strides = [1, 1]} : vector<16x22xf32> to vector<16x16xf32>
    %234 = vector.broadcast %232 : f32 to vector<16x16xf32>
    %235 = arith.mulf %234, %233 : vector<16x16xf32>
    %236 = arith.addf %216, %235 : vector<16x16xf32>
    %c26 = arith.constant 26 : index
    %237 = memref.load %arg2[%c26] : memref<98xf32, #tpu.memory_space<smem>>
    %238 = vector.extract_strided_slice %211 {offsets = [0, 5], sizes = [16, 16], strides = [1, 1]} : vector<16x22xf32> to vector<16x16xf32>
    %239 = vector.broadcast %237 : f32 to vector<16x16xf32>
    %240 = arith.mulf %239, %238 : vector<16x16xf32>
    %241 = arith.addf %221, %240 : vector<16x16xf32>
    %c27 = arith.constant 27 : index
    %242 = memref.load %arg2[%c27] : memref<98xf32, #tpu.memory_space<smem>>
    %243 = vector.extract_strided_slice %211 {offsets = [0, 6], sizes = [16, 16], strides = [1, 1]} : vector<16x22xf32> to vector<16x16xf32>
    %244 = vector.broadcast %242 : f32 to vector<16x16xf32>
    %245 = arith.mulf %244, %243 : vector<16x16xf32>
    %246 = arith.addf %226, %245 : vector<16x16xf32>
    %c0_115 = arith.constant 0 : index
    %c4_116 = arith.constant 4 : index
    %c0_117 = arith.constant 0 : index
    %247 = vector.load %arg6[%c0_115, %c4_116, %c0_117] : memref<2x22x22xf32, #tpu.memory_space<vmem>>, vector<1x16x22xf32>
    %248 = vector.shape_cast %247 : vector<1x16x22xf32> to vector<16x22xf32>
    %c28 = arith.constant 28 : index
    %249 = memref.load %arg2[%c28] : memref<98xf32, #tpu.memory_space<smem>>
    %250 = vector.extract_strided_slice %248 {offsets = [0, 0], sizes = [16, 16], strides = [1, 1]} : vector<16x22xf32> to vector<16x16xf32>
    %251 = vector.broadcast %249 : f32 to vector<16x16xf32>
    %252 = arith.mulf %251, %250 : vector<16x16xf32>
    %253 = arith.addf %231, %252 : vector<16x16xf32>
    %c29 = arith.constant 29 : index
    %254 = memref.load %arg2[%c29] : memref<98xf32, #tpu.memory_space<smem>>
    %255 = vector.extract_strided_slice %248 {offsets = [0, 1], sizes = [16, 16], strides = [1, 1]} : vector<16x22xf32> to vector<16x16xf32>
    %256 = vector.broadcast %254 : f32 to vector<16x16xf32>
    %257 = arith.mulf %256, %255 : vector<16x16xf32>
    %258 = arith.addf %236, %257 : vector<16x16xf32>
    %c30 = arith.constant 30 : index
    %259 = memref.load %arg2[%c30] : memref<98xf32, #tpu.memory_space<smem>>
    %260 = vector.extract_strided_slice %248 {offsets = [0, 2], sizes = [16, 16], strides = [1, 1]} : vector<16x22xf32> to vector<16x16xf32>
    %261 = vector.broadcast %259 : f32 to vector<16x16xf32>
    %262 = arith.mulf %261, %260 : vector<16x16xf32>
    %263 = arith.addf %241, %262 : vector<16x16xf32>
    %c31 = arith.constant 31 : index
    %264 = memref.load %arg2[%c31] : memref<98xf32, #tpu.memory_space<smem>>
    %265 = vector.extract_strided_slice %248 {offsets = [0, 3], sizes = [16, 16], strides = [1, 1]} : vector<16x22xf32> to vector<16x16xf32>
    %266 = vector.broadcast %264 : f32 to vector<16x16xf32>
    %267 = arith.mulf %266, %265 : vector<16x16xf32>
    %268 = arith.addf %246, %267 : vector<16x16xf32>
    %c32_118 = arith.constant 32 : index
    %269 = memref.load %arg2[%c32_118] : memref<98xf32, #tpu.memory_space<smem>>
    %270 = vector.extract_strided_slice %248 {offsets = [0, 4], sizes = [16, 16], strides = [1, 1]} : vector<16x22xf32> to vector<16x16xf32>
    %271 = vector.broadcast %269 : f32 to vector<16x16xf32>
    %272 = arith.mulf %271, %270 : vector<16x16xf32>
    %273 = arith.addf %253, %272 : vector<16x16xf32>
    %c33 = arith.constant 33 : index
    %274 = memref.load %arg2[%c33] : memref<98xf32, #tpu.memory_space<smem>>
    %275 = vector.extract_strided_slice %248 {offsets = [0, 5], sizes = [16, 16], strides = [1, 1]} : vector<16x22xf32> to vector<16x16xf32>
    %276 = vector.broadcast %274 : f32 to vector<16x16xf32>
    %277 = arith.mulf %276, %275 : vector<16x16xf32>
    %278 = arith.addf %258, %277 : vector<16x16xf32>
    %c34 = arith.constant 34 : index
    %279 = memref.load %arg2[%c34] : memref<98xf32, #tpu.memory_space<smem>>
    %280 = vector.extract_strided_slice %248 {offsets = [0, 6], sizes = [16, 16], strides = [1, 1]} : vector<16x22xf32> to vector<16x16xf32>
    %281 = vector.broadcast %279 : f32 to vector<16x16xf32>
    %282 = arith.mulf %281, %280 : vector<16x16xf32>
    %283 = arith.addf %263, %282 : vector<16x16xf32>
    %c0_119 = arith.constant 0 : index
    %c5_120 = arith.constant 5 : index
    %c0_121 = arith.constant 0 : index
    %284 = vector.load %arg6[%c0_119, %c5_120, %c0_121] : memref<2x22x22xf32, #tpu.memory_space<vmem>>, vector<1x16x22xf32>
    %285 = vector.shape_cast %284 : vector<1x16x22xf32> to vector<16x22xf32>
    %c35 = arith.constant 35 : index
    %286 = memref.load %arg2[%c35] : memref<98xf32, #tpu.memory_space<smem>>
    %287 = vector.extract_strided_slice %285 {offsets = [0, 0], sizes = [16, 16], strides = [1, 1]} : vector<16x22xf32> to vector<16x16xf32>
    %288 = vector.broadcast %286 : f32 to vector<16x16xf32>
    %289 = arith.mulf %288, %287 : vector<16x16xf32>
    %290 = arith.addf %268, %289 : vector<16x16xf32>
    %c36 = arith.constant 36 : index
    %291 = memref.load %arg2[%c36] : memref<98xf32, #tpu.memory_space<smem>>
    %292 = vector.extract_strided_slice %285 {offsets = [0, 1], sizes = [16, 16], strides = [1, 1]} : vector<16x22xf32> to vector<16x16xf32>
    %293 = vector.broadcast %291 : f32 to vector<16x16xf32>
    %294 = arith.mulf %293, %292 : vector<16x16xf32>
    %295 = arith.addf %273, %294 : vector<16x16xf32>
    %c37 = arith.constant 37 : index
    %296 = memref.load %arg2[%c37] : memref<98xf32, #tpu.memory_space<smem>>
    %297 = vector.extract_strided_slice %285 {offsets = [0, 2], sizes = [16, 16], strides = [1, 1]} : vector<16x22xf32> to vector<16x16xf32>
    %298 = vector.broadcast %296 : f32 to vector<16x16xf32>
    %299 = arith.mulf %298, %297 : vector<16x16xf32>
    %300 = arith.addf %278, %299 : vector<16x16xf32>
    %c38 = arith.constant 38 : index
    %301 = memref.load %arg2[%c38] : memref<98xf32, #tpu.memory_space<smem>>
    %302 = vector.extract_strided_slice %285 {offsets = [0, 3], sizes = [16, 16], strides = [1, 1]} : vector<16x22xf32> to vector<16x16xf32>
    %303 = vector.broadcast %301 : f32 to vector<16x16xf32>
    %304 = arith.mulf %303, %302 : vector<16x16xf32>
    %305 = arith.addf %283, %304 : vector<16x16xf32>
    %c39 = arith.constant 39 : index
    %306 = memref.load %arg2[%c39] : memref<98xf32, #tpu.memory_space<smem>>
    %307 = vector.extract_strided_slice %285 {offsets = [0, 4], sizes = [16, 16], strides = [1, 1]} : vector<16x22xf32> to vector<16x16xf32>
    %308 = vector.broadcast %306 : f32 to vector<16x16xf32>
    %309 = arith.mulf %308, %307 : vector<16x16xf32>
    %310 = arith.addf %290, %309 : vector<16x16xf32>
    %c40 = arith.constant 40 : index
    %311 = memref.load %arg2[%c40] : memref<98xf32, #tpu.memory_space<smem>>
    %312 = vector.extract_strided_slice %285 {offsets = [0, 5], sizes = [16, 16], strides = [1, 1]} : vector<16x22xf32> to vector<16x16xf32>
    %313 = vector.broadcast %311 : f32 to vector<16x16xf32>
    %314 = arith.mulf %313, %312 : vector<16x16xf32>
    %315 = arith.addf %295, %314 : vector<16x16xf32>
    %c41 = arith.constant 41 : index
    %316 = memref.load %arg2[%c41] : memref<98xf32, #tpu.memory_space<smem>>
    %317 = vector.extract_strided_slice %285 {offsets = [0, 6], sizes = [16, 16], strides = [1, 1]} : vector<16x22xf32> to vector<16x16xf32>
    %318 = vector.broadcast %316 : f32 to vector<16x16xf32>
    %319 = arith.mulf %318, %317 : vector<16x16xf32>
    %320 = arith.addf %300, %319 : vector<16x16xf32>
    %c0_122 = arith.constant 0 : index
    %c6_123 = arith.constant 6 : index
    %c0_124 = arith.constant 0 : index
    %321 = vector.load %arg6[%c0_122, %c6_123, %c0_124] : memref<2x22x22xf32, #tpu.memory_space<vmem>>, vector<1x16x22xf32>
    %322 = vector.shape_cast %321 : vector<1x16x22xf32> to vector<16x22xf32>
    %c42 = arith.constant 42 : index
    %323 = memref.load %arg2[%c42] : memref<98xf32, #tpu.memory_space<smem>>
    %324 = vector.extract_strided_slice %322 {offsets = [0, 0], sizes = [16, 16], strides = [1, 1]} : vector<16x22xf32> to vector<16x16xf32>
    %325 = vector.broadcast %323 : f32 to vector<16x16xf32>
    %326 = arith.mulf %325, %324 : vector<16x16xf32>
    %327 = arith.addf %305, %326 : vector<16x16xf32>
    %c43 = arith.constant 43 : index
    %328 = memref.load %arg2[%c43] : memref<98xf32, #tpu.memory_space<smem>>
    %329 = vector.extract_strided_slice %322 {offsets = [0, 1], sizes = [16, 16], strides = [1, 1]} : vector<16x22xf32> to vector<16x16xf32>
    %330 = vector.broadcast %328 : f32 to vector<16x16xf32>
    %331 = arith.mulf %330, %329 : vector<16x16xf32>
    %332 = arith.addf %310, %331 : vector<16x16xf32>
    %c44 = arith.constant 44 : index
    %333 = memref.load %arg2[%c44] : memref<98xf32, #tpu.memory_space<smem>>
    %334 = vector.extract_strided_slice %322 {offsets = [0, 2], sizes = [16, 16], strides = [1, 1]} : vector<16x22xf32> to vector<16x16xf32>
    %335 = vector.broadcast %333 : f32 to vector<16x16xf32>
    %336 = arith.mulf %335, %334 : vector<16x16xf32>
    %337 = arith.addf %315, %336 : vector<16x16xf32>
    %c45 = arith.constant 45 : index
    %338 = memref.load %arg2[%c45] : memref<98xf32, #tpu.memory_space<smem>>
    %339 = vector.extract_strided_slice %322 {offsets = [0, 3], sizes = [16, 16], strides = [1, 1]} : vector<16x22xf32> to vector<16x16xf32>
    %340 = vector.broadcast %338 : f32 to vector<16x16xf32>
    %341 = arith.mulf %340, %339 : vector<16x16xf32>
    %342 = arith.addf %320, %341 : vector<16x16xf32>
    %c46 = arith.constant 46 : index
    %343 = memref.load %arg2[%c46] : memref<98xf32, #tpu.memory_space<smem>>
    %344 = vector.extract_strided_slice %322 {offsets = [0, 4], sizes = [16, 16], strides = [1, 1]} : vector<16x22xf32> to vector<16x16xf32>
    %345 = vector.broadcast %343 : f32 to vector<16x16xf32>
    %346 = arith.mulf %345, %344 : vector<16x16xf32>
    %347 = arith.addf %327, %346 : vector<16x16xf32>
    %c47 = arith.constant 47 : index
    %348 = memref.load %arg2[%c47] : memref<98xf32, #tpu.memory_space<smem>>
    %349 = vector.extract_strided_slice %322 {offsets = [0, 5], sizes = [16, 16], strides = [1, 1]} : vector<16x22xf32> to vector<16x16xf32>
    %350 = vector.broadcast %348 : f32 to vector<16x16xf32>
    %351 = arith.mulf %350, %349 : vector<16x16xf32>
    %352 = arith.addf %332, %351 : vector<16x16xf32>
    %c48_125 = arith.constant 48 : index
    %353 = memref.load %arg2[%c48_125] : memref<98xf32, #tpu.memory_space<smem>>
    %354 = vector.extract_strided_slice %322 {offsets = [0, 6], sizes = [16, 16], strides = [1, 1]} : vector<16x22xf32> to vector<16x16xf32>
    %355 = vector.broadcast %353 : f32 to vector<16x16xf32>
    %356 = arith.mulf %355, %354 : vector<16x16xf32>
    %357 = arith.addf %337, %356 : vector<16x16xf32>
    %c1_126 = arith.constant 1 : index
    %c0_127 = arith.constant 0 : index
    %c0_128 = arith.constant 0 : index
    %358 = vector.load %arg6[%c1_126, %c0_127, %c0_128] : memref<2x22x22xf32, #tpu.memory_space<vmem>>, vector<1x16x22xf32>
    %359 = vector.shape_cast %358 : vector<1x16x22xf32> to vector<16x22xf32>
    %c49 = arith.constant 49 : index
    %360 = memref.load %arg2[%c49] : memref<98xf32, #tpu.memory_space<smem>>
    %361 = vector.extract_strided_slice %359 {offsets = [0, 0], sizes = [16, 16], strides = [1, 1]} : vector<16x22xf32> to vector<16x16xf32>
    %362 = vector.broadcast %360 : f32 to vector<16x16xf32>
    %363 = arith.mulf %362, %361 : vector<16x16xf32>
    %364 = arith.addf %342, %363 : vector<16x16xf32>
    %c50 = arith.constant 50 : index
    %365 = memref.load %arg2[%c50] : memref<98xf32, #tpu.memory_space<smem>>
    %366 = vector.extract_strided_slice %359 {offsets = [0, 1], sizes = [16, 16], strides = [1, 1]} : vector<16x22xf32> to vector<16x16xf32>
    %367 = vector.broadcast %365 : f32 to vector<16x16xf32>
    %368 = arith.mulf %367, %366 : vector<16x16xf32>
    %369 = arith.addf %347, %368 : vector<16x16xf32>
    %c51 = arith.constant 51 : index
    %370 = memref.load %arg2[%c51] : memref<98xf32, #tpu.memory_space<smem>>
    %371 = vector.extract_strided_slice %359 {offsets = [0, 2], sizes = [16, 16], strides = [1, 1]} : vector<16x22xf32> to vector<16x16xf32>
    %372 = vector.broadcast %370 : f32 to vector<16x16xf32>
    %373 = arith.mulf %372, %371 : vector<16x16xf32>
    %374 = arith.addf %352, %373 : vector<16x16xf32>
    %c52 = arith.constant 52 : index
    %375 = memref.load %arg2[%c52] : memref<98xf32, #tpu.memory_space<smem>>
    %376 = vector.extract_strided_slice %359 {offsets = [0, 3], sizes = [16, 16], strides = [1, 1]} : vector<16x22xf32> to vector<16x16xf32>
    %377 = vector.broadcast %375 : f32 to vector<16x16xf32>
    %378 = arith.mulf %377, %376 : vector<16x16xf32>
    %379 = arith.addf %357, %378 : vector<16x16xf32>
    %c53 = arith.constant 53 : index
    %380 = memref.load %arg2[%c53] : memref<98xf32, #tpu.memory_space<smem>>
    %381 = vector.extract_strided_slice %359 {offsets = [0, 4], sizes = [16, 16], strides = [1, 1]} : vector<16x22xf32> to vector<16x16xf32>
    %382 = vector.broadcast %380 : f32 to vector<16x16xf32>
    %383 = arith.mulf %382, %381 : vector<16x16xf32>
    %384 = arith.addf %364, %383 : vector<16x16xf32>
    %c54 = arith.constant 54 : index
    %385 = memref.load %arg2[%c54] : memref<98xf32, #tpu.memory_space<smem>>
    %386 = vector.extract_strided_slice %359 {offsets = [0, 5], sizes = [16, 16], strides = [1, 1]} : vector<16x22xf32> to vector<16x16xf32>
    %387 = vector.broadcast %385 : f32 to vector<16x16xf32>
    %388 = arith.mulf %387, %386 : vector<16x16xf32>
    %389 = arith.addf %369, %388 : vector<16x16xf32>
    %c55 = arith.constant 55 : index
    %390 = memref.load %arg2[%c55] : memref<98xf32, #tpu.memory_space<smem>>
    %391 = vector.extract_strided_slice %359 {offsets = [0, 6], sizes = [16, 16], strides = [1, 1]} : vector<16x22xf32> to vector<16x16xf32>
    %392 = vector.broadcast %390 : f32 to vector<16x16xf32>
    %393 = arith.mulf %392, %391 : vector<16x16xf32>
    %394 = arith.addf %374, %393 : vector<16x16xf32>
    %c1_129 = arith.constant 1 : index
    %c1_130 = arith.constant 1 : index
    %c0_131 = arith.constant 0 : index
    %395 = vector.load %arg6[%c1_129, %c1_130, %c0_131] : memref<2x22x22xf32, #tpu.memory_space<vmem>>, vector<1x16x22xf32>
    %396 = vector.shape_cast %395 : vector<1x16x22xf32> to vector<16x22xf32>
    %c56 = arith.constant 56 : index
    %397 = memref.load %arg2[%c56] : memref<98xf32, #tpu.memory_space<smem>>
    %398 = vector.extract_strided_slice %396 {offsets = [0, 0], sizes = [16, 16], strides = [1, 1]} : vector<16x22xf32> to vector<16x16xf32>
    %399 = vector.broadcast %397 : f32 to vector<16x16xf32>
    %400 = arith.mulf %399, %398 : vector<16x16xf32>
    %401 = arith.addf %379, %400 : vector<16x16xf32>
    %c57 = arith.constant 57 : index
    %402 = memref.load %arg2[%c57] : memref<98xf32, #tpu.memory_space<smem>>
    %403 = vector.extract_strided_slice %396 {offsets = [0, 1], sizes = [16, 16], strides = [1, 1]} : vector<16x22xf32> to vector<16x16xf32>
    %404 = vector.broadcast %402 : f32 to vector<16x16xf32>
    %405 = arith.mulf %404, %403 : vector<16x16xf32>
    %406 = arith.addf %384, %405 : vector<16x16xf32>
    %c58 = arith.constant 58 : index
    %407 = memref.load %arg2[%c58] : memref<98xf32, #tpu.memory_space<smem>>
    %408 = vector.extract_strided_slice %396 {offsets = [0, 2], sizes = [16, 16], strides = [1, 1]} : vector<16x22xf32> to vector<16x16xf32>
    %409 = vector.broadcast %407 : f32 to vector<16x16xf32>
    %410 = arith.mulf %409, %408 : vector<16x16xf32>
    %411 = arith.addf %389, %410 : vector<16x16xf32>
    %c59 = arith.constant 59 : index
    %412 = memref.load %arg2[%c59] : memref<98xf32, #tpu.memory_space<smem>>
    %413 = vector.extract_strided_slice %396 {offsets = [0, 3], sizes = [16, 16], strides = [1, 1]} : vector<16x22xf32> to vector<16x16xf32>
    %414 = vector.broadcast %412 : f32 to vector<16x16xf32>
    %415 = arith.mulf %414, %413 : vector<16x16xf32>
    %416 = arith.addf %394, %415 : vector<16x16xf32>
    %c60 = arith.constant 60 : index
    %417 = memref.load %arg2[%c60] : memref<98xf32, #tpu.memory_space<smem>>
    %418 = vector.extract_strided_slice %396 {offsets = [0, 4], sizes = [16, 16], strides = [1, 1]} : vector<16x22xf32> to vector<16x16xf32>
    %419 = vector.broadcast %417 : f32 to vector<16x16xf32>
    %420 = arith.mulf %419, %418 : vector<16x16xf32>
    %421 = arith.addf %401, %420 : vector<16x16xf32>
    %c61 = arith.constant 61 : index
    %422 = memref.load %arg2[%c61] : memref<98xf32, #tpu.memory_space<smem>>
    %423 = vector.extract_strided_slice %396 {offsets = [0, 5], sizes = [16, 16], strides = [1, 1]} : vector<16x22xf32> to vector<16x16xf32>
    %424 = vector.broadcast %422 : f32 to vector<16x16xf32>
    %425 = arith.mulf %424, %423 : vector<16x16xf32>
    %426 = arith.addf %406, %425 : vector<16x16xf32>
    %c62 = arith.constant 62 : index
    %427 = memref.load %arg2[%c62] : memref<98xf32, #tpu.memory_space<smem>>
    %428 = vector.extract_strided_slice %396 {offsets = [0, 6], sizes = [16, 16], strides = [1, 1]} : vector<16x22xf32> to vector<16x16xf32>
    %429 = vector.broadcast %427 : f32 to vector<16x16xf32>
    %430 = arith.mulf %429, %428 : vector<16x16xf32>
    %431 = arith.addf %411, %430 : vector<16x16xf32>
    %c1_132 = arith.constant 1 : index
    %c2_133 = arith.constant 2 : index
    %c0_134 = arith.constant 0 : index
    %432 = vector.load %arg6[%c1_132, %c2_133, %c0_134] : memref<2x22x22xf32, #tpu.memory_space<vmem>>, vector<1x16x22xf32>
    %433 = vector.shape_cast %432 : vector<1x16x22xf32> to vector<16x22xf32>
    %c63 = arith.constant 63 : index
    %434 = memref.load %arg2[%c63] : memref<98xf32, #tpu.memory_space<smem>>
    %435 = vector.extract_strided_slice %433 {offsets = [0, 0], sizes = [16, 16], strides = [1, 1]} : vector<16x22xf32> to vector<16x16xf32>
    %436 = vector.broadcast %434 : f32 to vector<16x16xf32>
    %437 = arith.mulf %436, %435 : vector<16x16xf32>
    %438 = arith.addf %416, %437 : vector<16x16xf32>
    %c64_135 = arith.constant 64 : index
    %439 = memref.load %arg2[%c64_135] : memref<98xf32, #tpu.memory_space<smem>>
    %440 = vector.extract_strided_slice %433 {offsets = [0, 1], sizes = [16, 16], strides = [1, 1]} : vector<16x22xf32> to vector<16x16xf32>
    %441 = vector.broadcast %439 : f32 to vector<16x16xf32>
    %442 = arith.mulf %441, %440 : vector<16x16xf32>
    %443 = arith.addf %421, %442 : vector<16x16xf32>
    %c65 = arith.constant 65 : index
    %444 = memref.load %arg2[%c65] : memref<98xf32, #tpu.memory_space<smem>>
    %445 = vector.extract_strided_slice %433 {offsets = [0, 2], sizes = [16, 16], strides = [1, 1]} : vector<16x22xf32> to vector<16x16xf32>
    %446 = vector.broadcast %444 : f32 to vector<16x16xf32>
    %447 = arith.mulf %446, %445 : vector<16x16xf32>
    %448 = arith.addf %426, %447 : vector<16x16xf32>
    %c66 = arith.constant 66 : index
    %449 = memref.load %arg2[%c66] : memref<98xf32, #tpu.memory_space<smem>>
    %450 = vector.extract_strided_slice %433 {offsets = [0, 3], sizes = [16, 16], strides = [1, 1]} : vector<16x22xf32> to vector<16x16xf32>
    %451 = vector.broadcast %449 : f32 to vector<16x16xf32>
    %452 = arith.mulf %451, %450 : vector<16x16xf32>
    %453 = arith.addf %431, %452 : vector<16x16xf32>
    %c67 = arith.constant 67 : index
    %454 = memref.load %arg2[%c67] : memref<98xf32, #tpu.memory_space<smem>>
    %455 = vector.extract_strided_slice %433 {offsets = [0, 4], sizes = [16, 16], strides = [1, 1]} : vector<16x22xf32> to vector<16x16xf32>
    %456 = vector.broadcast %454 : f32 to vector<16x16xf32>
    %457 = arith.mulf %456, %455 : vector<16x16xf32>
    %458 = arith.addf %438, %457 : vector<16x16xf32>
    %c68 = arith.constant 68 : index
    %459 = memref.load %arg2[%c68] : memref<98xf32, #tpu.memory_space<smem>>
    %460 = vector.extract_strided_slice %433 {offsets = [0, 5], sizes = [16, 16], strides = [1, 1]} : vector<16x22xf32> to vector<16x16xf32>
    %461 = vector.broadcast %459 : f32 to vector<16x16xf32>
    %462 = arith.mulf %461, %460 : vector<16x16xf32>
    %463 = arith.addf %443, %462 : vector<16x16xf32>
    %c69 = arith.constant 69 : index
    %464 = memref.load %arg2[%c69] : memref<98xf32, #tpu.memory_space<smem>>
    %465 = vector.extract_strided_slice %433 {offsets = [0, 6], sizes = [16, 16], strides = [1, 1]} : vector<16x22xf32> to vector<16x16xf32>
    %466 = vector.broadcast %464 : f32 to vector<16x16xf32>
    %467 = arith.mulf %466, %465 : vector<16x16xf32>
    %468 = arith.addf %448, %467 : vector<16x16xf32>
    %c1_136 = arith.constant 1 : index
    %c3_137 = arith.constant 3 : index
    %c0_138 = arith.constant 0 : index
    %469 = vector.load %arg6[%c1_136, %c3_137, %c0_138] : memref<2x22x22xf32, #tpu.memory_space<vmem>>, vector<1x16x22xf32>
    %470 = vector.shape_cast %469 : vector<1x16x22xf32> to vector<16x22xf32>
    %c70 = arith.constant 70 : index
    %471 = memref.load %arg2[%c70] : memref<98xf32, #tpu.memory_space<smem>>
    %472 = vector.extract_strided_slice %470 {offsets = [0, 0], sizes = [16, 16], strides = [1, 1]} : vector<16x22xf32> to vector<16x16xf32>
    %473 = vector.broadcast %471 : f32 to vector<16x16xf32>
    %474 = arith.mulf %473, %472 : vector<16x16xf32>
    %475 = arith.addf %453, %474 : vector<16x16xf32>
    %c71 = arith.constant 71 : index
    %476 = memref.load %arg2[%c71] : memref<98xf32, #tpu.memory_space<smem>>
    %477 = vector.extract_strided_slice %470 {offsets = [0, 1], sizes = [16, 16], strides = [1, 1]} : vector<16x22xf32> to vector<16x16xf32>
    %478 = vector.broadcast %476 : f32 to vector<16x16xf32>
    %479 = arith.mulf %478, %477 : vector<16x16xf32>
    %480 = arith.addf %458, %479 : vector<16x16xf32>
    %c72 = arith.constant 72 : index
    %481 = memref.load %arg2[%c72] : memref<98xf32, #tpu.memory_space<smem>>
    %482 = vector.extract_strided_slice %470 {offsets = [0, 2], sizes = [16, 16], strides = [1, 1]} : vector<16x22xf32> to vector<16x16xf32>
    %483 = vector.broadcast %481 : f32 to vector<16x16xf32>
    %484 = arith.mulf %483, %482 : vector<16x16xf32>
    %485 = arith.addf %463, %484 : vector<16x16xf32>
    %c73 = arith.constant 73 : index
    %486 = memref.load %arg2[%c73] : memref<98xf32, #tpu.memory_space<smem>>
    %487 = vector.extract_strided_slice %470 {offsets = [0, 3], sizes = [16, 16], strides = [1, 1]} : vector<16x22xf32> to vector<16x16xf32>
    %488 = vector.broadcast %486 : f32 to vector<16x16xf32>
    %489 = arith.mulf %488, %487 : vector<16x16xf32>
    %490 = arith.addf %468, %489 : vector<16x16xf32>
    %c74 = arith.constant 74 : index
    %491 = memref.load %arg2[%c74] : memref<98xf32, #tpu.memory_space<smem>>
    %492 = vector.extract_strided_slice %470 {offsets = [0, 4], sizes = [16, 16], strides = [1, 1]} : vector<16x22xf32> to vector<16x16xf32>
    %493 = vector.broadcast %491 : f32 to vector<16x16xf32>
    %494 = arith.mulf %493, %492 : vector<16x16xf32>
    %495 = arith.addf %475, %494 : vector<16x16xf32>
    %c75 = arith.constant 75 : index
    %496 = memref.load %arg2[%c75] : memref<98xf32, #tpu.memory_space<smem>>
    %497 = vector.extract_strided_slice %470 {offsets = [0, 5], sizes = [16, 16], strides = [1, 1]} : vector<16x22xf32> to vector<16x16xf32>
    %498 = vector.broadcast %496 : f32 to vector<16x16xf32>
    %499 = arith.mulf %498, %497 : vector<16x16xf32>
    %500 = arith.addf %480, %499 : vector<16x16xf32>
    %c76 = arith.constant 76 : index
    %501 = memref.load %arg2[%c76] : memref<98xf32, #tpu.memory_space<smem>>
    %502 = vector.extract_strided_slice %470 {offsets = [0, 6], sizes = [16, 16], strides = [1, 1]} : vector<16x22xf32> to vector<16x16xf32>
    %503 = vector.broadcast %501 : f32 to vector<16x16xf32>
    %504 = arith.mulf %503, %502 : vector<16x16xf32>
    %505 = arith.addf %485, %504 : vector<16x16xf32>
    %c1_139 = arith.constant 1 : index
    %c4_140 = arith.constant 4 : index
    %c0_141 = arith.constant 0 : index
    %506 = vector.load %arg6[%c1_139, %c4_140, %c0_141] : memref<2x22x22xf32, #tpu.memory_space<vmem>>, vector<1x16x22xf32>
    %507 = vector.shape_cast %506 : vector<1x16x22xf32> to vector<16x22xf32>
    %c77 = arith.constant 77 : index
    %508 = memref.load %arg2[%c77] : memref<98xf32, #tpu.memory_space<smem>>
    %509 = vector.extract_strided_slice %507 {offsets = [0, 0], sizes = [16, 16], strides = [1, 1]} : vector<16x22xf32> to vector<16x16xf32>
    %510 = vector.broadcast %508 : f32 to vector<16x16xf32>
    %511 = arith.mulf %510, %509 : vector<16x16xf32>
    %512 = arith.addf %490, %511 : vector<16x16xf32>
    %c78 = arith.constant 78 : index
    %513 = memref.load %arg2[%c78] : memref<98xf32, #tpu.memory_space<smem>>
    %514 = vector.extract_strided_slice %507 {offsets = [0, 1], sizes = [16, 16], strides = [1, 1]} : vector<16x22xf32> to vector<16x16xf32>
    %515 = vector.broadcast %513 : f32 to vector<16x16xf32>
    %516 = arith.mulf %515, %514 : vector<16x16xf32>
    %517 = arith.addf %495, %516 : vector<16x16xf32>
    %c79 = arith.constant 79 : index
    %518 = memref.load %arg2[%c79] : memref<98xf32, #tpu.memory_space<smem>>
    %519 = vector.extract_strided_slice %507 {offsets = [0, 2], sizes = [16, 16], strides = [1, 1]} : vector<16x22xf32> to vector<16x16xf32>
    %520 = vector.broadcast %518 : f32 to vector<16x16xf32>
    %521 = arith.mulf %520, %519 : vector<16x16xf32>
    %522 = arith.addf %500, %521 : vector<16x16xf32>
    %c80_142 = arith.constant 80 : index
    %523 = memref.load %arg2[%c80_142] : memref<98xf32, #tpu.memory_space<smem>>
    %524 = vector.extract_strided_slice %507 {offsets = [0, 3], sizes = [16, 16], strides = [1, 1]} : vector<16x22xf32> to vector<16x16xf32>
    %525 = vector.broadcast %523 : f32 to vector<16x16xf32>
    %526 = arith.mulf %525, %524 : vector<16x16xf32>
    %527 = arith.addf %505, %526 : vector<16x16xf32>
    %c81 = arith.constant 81 : index
    %528 = memref.load %arg2[%c81] : memref<98xf32, #tpu.memory_space<smem>>
    %529 = vector.extract_strided_slice %507 {offsets = [0, 4], sizes = [16, 16], strides = [1, 1]} : vector<16x22xf32> to vector<16x16xf32>
    %530 = vector.broadcast %528 : f32 to vector<16x16xf32>
    %531 = arith.mulf %530, %529 : vector<16x16xf32>
    %532 = arith.addf %512, %531 : vector<16x16xf32>
    %c82 = arith.constant 82 : index
    %533 = memref.load %arg2[%c82] : memref<98xf32, #tpu.memory_space<smem>>
    %534 = vector.extract_strided_slice %507 {offsets = [0, 5], sizes = [16, 16], strides = [1, 1]} : vector<16x22xf32> to vector<16x16xf32>
    %535 = vector.broadcast %533 : f32 to vector<16x16xf32>
    %536 = arith.mulf %535, %534 : vector<16x16xf32>
    %537 = arith.addf %517, %536 : vector<16x16xf32>
    %c83 = arith.constant 83 : index
    %538 = memref.load %arg2[%c83] : memref<98xf32, #tpu.memory_space<smem>>
    %539 = vector.extract_strided_slice %507 {offsets = [0, 6], sizes = [16, 16], strides = [1, 1]} : vector<16x22xf32> to vector<16x16xf32>
    %540 = vector.broadcast %538 : f32 to vector<16x16xf32>
    %541 = arith.mulf %540, %539 : vector<16x16xf32>
    %542 = arith.addf %522, %541 : vector<16x16xf32>
    %c1_143 = arith.constant 1 : index
    %c5_144 = arith.constant 5 : index
    %c0_145 = arith.constant 0 : index
    %543 = vector.load %arg6[%c1_143, %c5_144, %c0_145] : memref<2x22x22xf32, #tpu.memory_space<vmem>>, vector<1x16x22xf32>
    %544 = vector.shape_cast %543 : vector<1x16x22xf32> to vector<16x22xf32>
    %c84 = arith.constant 84 : index
    %545 = memref.load %arg2[%c84] : memref<98xf32, #tpu.memory_space<smem>>
    %546 = vector.extract_strided_slice %544 {offsets = [0, 0], sizes = [16, 16], strides = [1, 1]} : vector<16x22xf32> to vector<16x16xf32>
    %547 = vector.broadcast %545 : f32 to vector<16x16xf32>
    %548 = arith.mulf %547, %546 : vector<16x16xf32>
    %549 = arith.addf %527, %548 : vector<16x16xf32>
    %c85 = arith.constant 85 : index
    %550 = memref.load %arg2[%c85] : memref<98xf32, #tpu.memory_space<smem>>
    %551 = vector.extract_strided_slice %544 {offsets = [0, 1], sizes = [16, 16], strides = [1, 1]} : vector<16x22xf32> to vector<16x16xf32>
    %552 = vector.broadcast %550 : f32 to vector<16x16xf32>
    %553 = arith.mulf %552, %551 : vector<16x16xf32>
    %554 = arith.addf %532, %553 : vector<16x16xf32>
    %c86 = arith.constant 86 : index
    %555 = memref.load %arg2[%c86] : memref<98xf32, #tpu.memory_space<smem>>
    %556 = vector.extract_strided_slice %544 {offsets = [0, 2], sizes = [16, 16], strides = [1, 1]} : vector<16x22xf32> to vector<16x16xf32>
    %557 = vector.broadcast %555 : f32 to vector<16x16xf32>
    %558 = arith.mulf %557, %556 : vector<16x16xf32>
    %559 = arith.addf %537, %558 : vector<16x16xf32>
    %c87 = arith.constant 87 : index
    %560 = memref.load %arg2[%c87] : memref<98xf32, #tpu.memory_space<smem>>
    %561 = vector.extract_strided_slice %544 {offsets = [0, 3], sizes = [16, 16], strides = [1, 1]} : vector<16x22xf32> to vector<16x16xf32>
    %562 = vector.broadcast %560 : f32 to vector<16x16xf32>
    %563 = arith.mulf %562, %561 : vector<16x16xf32>
    %564 = arith.addf %542, %563 : vector<16x16xf32>
    %c88 = arith.constant 88 : index
    %565 = memref.load %arg2[%c88] : memref<98xf32, #tpu.memory_space<smem>>
    %566 = vector.extract_strided_slice %544 {offsets = [0, 4], sizes = [16, 16], strides = [1, 1]} : vector<16x22xf32> to vector<16x16xf32>
    %567 = vector.broadcast %565 : f32 to vector<16x16xf32>
    %568 = arith.mulf %567, %566 : vector<16x16xf32>
    %569 = arith.addf %549, %568 : vector<16x16xf32>
    %c89 = arith.constant 89 : index
    %570 = memref.load %arg2[%c89] : memref<98xf32, #tpu.memory_space<smem>>
    %571 = vector.extract_strided_slice %544 {offsets = [0, 5], sizes = [16, 16], strides = [1, 1]} : vector<16x22xf32> to vector<16x16xf32>
    %572 = vector.broadcast %570 : f32 to vector<16x16xf32>
    %573 = arith.mulf %572, %571 : vector<16x16xf32>
    %574 = arith.addf %554, %573 : vector<16x16xf32>
    %c90 = arith.constant 90 : index
    %575 = memref.load %arg2[%c90] : memref<98xf32, #tpu.memory_space<smem>>
    %576 = vector.extract_strided_slice %544 {offsets = [0, 6], sizes = [16, 16], strides = [1, 1]} : vector<16x22xf32> to vector<16x16xf32>
    %577 = vector.broadcast %575 : f32 to vector<16x16xf32>
    %578 = arith.mulf %577, %576 : vector<16x16xf32>
    %579 = arith.addf %559, %578 : vector<16x16xf32>
    %c1_146 = arith.constant 1 : index
    %c6_147 = arith.constant 6 : index
    %c0_148 = arith.constant 0 : index
    %580 = vector.load %arg6[%c1_146, %c6_147, %c0_148] : memref<2x22x22xf32, #tpu.memory_space<vmem>>, vector<1x16x22xf32>
    %581 = vector.shape_cast %580 : vector<1x16x22xf32> to vector<16x22xf32>
    %c91 = arith.constant 91 : index
    %582 = memref.load %arg2[%c91] : memref<98xf32, #tpu.memory_space<smem>>
    %583 = vector.extract_strided_slice %581 {offsets = [0, 0], sizes = [16, 16], strides = [1, 1]} : vector<16x22xf32> to vector<16x16xf32>
    %584 = vector.broadcast %582 : f32 to vector<16x16xf32>
    %585 = arith.mulf %584, %583 : vector<16x16xf32>
    %586 = arith.addf %564, %585 : vector<16x16xf32>
    %c92 = arith.constant 92 : index
    %587 = memref.load %arg2[%c92] : memref<98xf32, #tpu.memory_space<smem>>
    %588 = vector.extract_strided_slice %581 {offsets = [0, 1], sizes = [16, 16], strides = [1, 1]} : vector<16x22xf32> to vector<16x16xf32>
    %589 = vector.broadcast %587 : f32 to vector<16x16xf32>
    %590 = arith.mulf %589, %588 : vector<16x16xf32>
    %591 = arith.addf %569, %590 : vector<16x16xf32>
    %c93 = arith.constant 93 : index
    %592 = memref.load %arg2[%c93] : memref<98xf32, #tpu.memory_space<smem>>
    %593 = vector.extract_strided_slice %581 {offsets = [0, 2], sizes = [16, 16], strides = [1, 1]} : vector<16x22xf32> to vector<16x16xf32>
    %594 = vector.broadcast %592 : f32 to vector<16x16xf32>
    %595 = arith.mulf %594, %593 : vector<16x16xf32>
    %596 = arith.addf %574, %595 : vector<16x16xf32>
    %c94 = arith.constant 94 : index
    %597 = memref.load %arg2[%c94] : memref<98xf32, #tpu.memory_space<smem>>
    %598 = vector.extract_strided_slice %581 {offsets = [0, 3], sizes = [16, 16], strides = [1, 1]} : vector<16x22xf32> to vector<16x16xf32>
    %599 = vector.broadcast %597 : f32 to vector<16x16xf32>
    %600 = arith.mulf %599, %598 : vector<16x16xf32>
    %601 = arith.addf %579, %600 : vector<16x16xf32>
    %c95 = arith.constant 95 : index
    %602 = memref.load %arg2[%c95] : memref<98xf32, #tpu.memory_space<smem>>
    %603 = vector.extract_strided_slice %581 {offsets = [0, 4], sizes = [16, 16], strides = [1, 1]} : vector<16x22xf32> to vector<16x16xf32>
    %604 = vector.broadcast %602 : f32 to vector<16x16xf32>
    %605 = arith.mulf %604, %603 : vector<16x16xf32>
    %606 = arith.addf %586, %605 : vector<16x16xf32>
    %c96_149 = arith.constant 96 : index
    %607 = memref.load %arg2[%c96_149] : memref<98xf32, #tpu.memory_space<smem>>
    %608 = vector.extract_strided_slice %581 {offsets = [0, 5], sizes = [16, 16], strides = [1, 1]} : vector<16x22xf32> to vector<16x16xf32>
    %609 = vector.broadcast %607 : f32 to vector<16x16xf32>
    %610 = arith.mulf %609, %608 : vector<16x16xf32>
    %611 = arith.addf %591, %610 : vector<16x16xf32>
    %c97 = arith.constant 97 : index
    %612 = memref.load %arg2[%c97] : memref<98xf32, #tpu.memory_space<smem>>
    %613 = vector.extract_strided_slice %581 {offsets = [0, 6], sizes = [16, 16], strides = [1, 1]} : vector<16x22xf32> to vector<16x16xf32>
    %614 = vector.broadcast %612 : f32 to vector<16x16xf32>
    %615 = arith.mulf %614, %613 : vector<16x16xf32>
    %616 = arith.addf %596, %615 : vector<16x16xf32>
    %617 = arith.addf %611, %616 : vector<16x16xf32>
    %618 = arith.addf %601, %606 : vector<16x16xf32>
    %619 = arith.addf %617, %618 : vector<16x16xf32>
    %620 = vector.broadcast %94 : f32 to vector<16x16xf32>
    %621 = arith.addf %619, %620 : vector<16x16xf32>
    %cst_150 = arith.constant 0.000000e+00 : f32
    %622 = vector.broadcast %cst_150 : f32 to vector<16x16xf32>
    %623 = arith.subf %622, %621 : vector<16x16xf32>
    %624 = math.exp %623 : vector<16x16xf32>
    %cst_151 = arith.constant 1.000000e+00 : f32
    %625 = vector.broadcast %cst_151 : f32 to vector<16x16xf32>
    %626 = arith.addf %625, %624 : vector<16x16xf32>
    %cst_152 = arith.constant 1.000000e+00 : f32
    %627 = vector.broadcast %cst_152 : f32 to vector<16x16xf32>
    %628 = arith.divf %627, %626 : vector<16x16xf32>
    %c0_153 = arith.constant 0 : index
    %c0_154 = arith.constant 0 : index
    %c0_155 = arith.constant 0 : index
    %c0_156 = arith.constant 0 : index
    %629 = vector.load %arg4[%c0_153, %c0_154, %c0_155, %c0_156] : memref<1x1x16x16xf32, #tpu.memory_space<vmem>>, vector<1x1x16x16xf32>
    %630 = vector.shape_cast %629 : vector<1x1x16x16xf32> to vector<16x16xf32>
    %631 = vector.shape_cast %628 : vector<16x16xf32> to vector<1x1x16x16xf32>
    tpu.vector_store %arg4[%c0_153, %c0_154, %c0_155, %c0_156], %631 {strides = array<i32>} : memref<1x1x16x16xf32, #tpu.memory_space<vmem>>, vector<1x1x16x16xf32>,
    return
  }
  func.func @transform_0(%arg0: i32) -> (i32, i32, i32) {
    %c0_i32 = arith.constant 0 : i32
    %c0_i32_0 = arith.constant 0 : i32
    %c0_i32_1 = arith.constant 0 : i32
    return %arg0, %c0_i32, %c0_i32_0 : i32, i32, i32
  }
  func.func @transform_1(%arg0: i32) -> i32 {
    %c0_i32 = arith.constant 0 : i32
    %c0_i32_0 = arith.constant 0 : i32
    return %c0_i32 : i32
  }
  func.func @transform_2(%arg0: i32) -> i32 {
    %c0_i32 = arith.constant 0 : i32
    %c0_i32_0 = arith.constant 0 : i32
    return %c0_i32 : i32
  }
  func.func @transform_3(%arg0: i32) -> (i32, i32, i32, i32) {
    %c0_i32 = arith.constant 0 : i32
    %c0_i32_0 = arith.constant 0 : i32
    %c0_i32_1 = arith.constant 0 : i32
    %c0_i32_2 = arith.constant 0 : i32
    return %arg0, %c0_i32, %c0_i32_0, %c0_i32_1 : i32, i32, i32, i32
  }
}

</mosaic_0001>

<bundles_post_ra>
// kernel: tpu_custom_call.1
= control target key start
LH: loop header
LB: loop body
LE: loop exit
PB: predicated region body
PF: predicated region fallthrough
CT: control target
= control target key end

     0   :  { %s3908_s0 = inlined_call_operand.hbm [shape: f32[2,4,256], index: 0, kind: input, shape index: {}]   ;;  %s3909_s1 = inlined_call_operand.vmem [shape: f32[98], index: 1, kind: input, shape index: {}]   ;;  %s3910_s2 = inlined_call_operand.<no memory space> [shape: f32[1], index: 2, kind: input, shape index: {}]   ;;  %s3911_s3 = inlined_call_operand.hbm [shape: f32[2,1,16,16], index: 3, kind: output, shape index: {}]  }
   0x1   :  { %3952 = sst [smem:[#allocation21_spill]] %s3908_s0 }
   0x2   :  { %3953 = sst [smem:[#allocation22_spill]] %s3909_s1 }
   0x3   :  { %3954 = sst [smem:[#allocation23_spill]] %s3911_s3 }
   0x4   :  { %8 = sst [smem:[#allocation4]] %s3910_s2 }
   0x5   :  { %9 = vsyncpa [#allocation6], 0 }
   0x6   :  { %11 = vsyncpa [#allocation6 + $0x1], 0 }
   0x7   :  { %12 = vsyncpa [#allocation8], 0 }
   0x8   :  { %13 = vsyncpa [#allocation7], 0 }
   0x9   :  { %15 = vsyncpa [#allocation7 + $0x1], 0  ;;  %s2467_s14 = smov 0   ;;  %s2469_s15 = smov 0  }
   0xa   :  { %s2471_s16 = smov 0   ;;  %s2473_s17 = smov 0  }
   0xb LB: > { %3955 = sst [smem:[#allocation14_spill]] %s2408_s14  ;;  %s2488_s2 = sadd.s32 4294967295, %s2420_s17   ;;  %s2420_s17 = sphi %s2473_s17, %s4002_s17   ;;  %s2416_s16 = sphi %s2471_s16, %s4005_s16   ;;  %s2412_s15 = sphi %s2469_s15, %s4004_s15   ;;  %s2408_s14 = sphi %s2467_s14, %s4003_s14  }
   0xc   : > { %3956 = sst [smem:[#allocation15_spill]] %s2412_s15  ;;  %s2082_s18 = sadd.s32 4294967294, %s2420_s17  }
   0xd   : > { %3957 = sst [smem:[#allocation16_spill]] %s2416_s16  ;;  %p41_p0 = scmp.ne.s32.totalorder %s2412_s15, %s2408_s14 }
   0xe   : > { %3958 = sst [smem:[#allocation17_spill]] %s2420_s17  ;;  %p3912_p1 = scmp.eq.s32.totalorder %s2488_s2, 0 }
   0xf   : > { %p113_p3 = scmp.eq.s32.totalorder %s2082_s18, 1  ;;  %p2083_p5 = scmp.ge.s32.totalorder %s2420_s17, 1 }
  0x10   : > { %p2497_p4 = por %p3912_p1, %p41_p0  ;;  %p120_p7 = scmp.lt.s32.totalorder %s2420_s17, 3 }
  0x11   : > { %p2502_p6 = por %p113_p3, %p41_p0  ;;  %s3962_s1 = sld [smem:[#allocation22_spill]] }
  0x12   : > { %s3959_s19 = scalar_select %p2497_p4, 1, 0 }
  0x13   : > { %s3960_s20 = scalar_select %p2502_p6, 1, 0 }
  0x14   : > { %p2510_p8 = pnand %p2083_p5, %p120_p7  ;;  %s2518_s25 = sadd.s32 1, %s2420_s17  }
  0x15   : > { %3961 = sst [smem:[#allocation18_spill]] %s3960_s20  ;;  %s25_s27 = ssub.s32 %s2420_s17, %s2518_s25 }
  0x16   : > { %p2224_p10 = pneg %p2510_p8  ;;  %3964 = sst [smem:[#allocation19_spill]] %s2518_s25 }
  0x17   : > { %s133_s23 = sshll.u32 %s3962_s1, 4  ;;  %p2528_p12 = scmp.eq.s32.totalorder %s25_s27, 0  ;;  %s134_s23 = int_to_ptr.vmem [resolvable:$true] %s133_s23 }
  0x18   : > { %p2522_p11 = pnand %p2224_p10, %p3912_p1  ;;  %s28_s29 = sadd.s32 1, %s2416_s16 }
  0x19   : > { %p35_p13 = scmp.ne.s32.totalorder %s2416_s16, %s2412_s15  ;;  %s2305_s30 = scalar_lea.vmem %s134_s23, 16 }
  0x1a   : > { %p2306_p0 = scmp.ne.s32.totalorder %s134_s23, %s2305_s30  ;;  %p2307_p3 = pneg %p2522_p11 }
  0x1b   : > { %p2313_p9 = scmp.lt.s32.totalorder %s134_s23, %s134_s23  ;;  %p2314_p2 = scmp.lt.s32.totalorder %s2305_s30, %s2305_s30 }
  0x1c   : > { %p2308_p5 = pnand %p2307_p3, %p2306_p0 }
  0x1d   : > { %p2315_p10 = por %p2314_p2, %p2313_p9 }
  0x1e   : > { %p2309_p7 = pneg %p2308_p5 }
  0x20   : > { %p2316_p1 = pnand %p2315_p10, %p2309_p7 }
  0x22   : > { %2319 = shalt.err (!%p2316_p1)
}
  0x23   : > { %s2422_s4 = smov [#allocation9]   ;;  %p36_p2 = scmp.eq.s32.totalorder %s2420_s17, 0 }
  0x24   : > { %2227 = dma.vmem_to_smem (!%p2522_p11), %s134_s23, 16, %s2422_s4, [#allocation8]  }
  0x25   : > { %s2542_s5 = scalar_select %p2528_p12, %s2416_s16, %s28_s29  }
  0x26   : > { %p3968_p1 = scmp.eq.s32.totalorder %s2488_s2, 1  ;;  %p2237_p0 = scmp.lt.s32.totalorder %s2420_s17, 2 }
  0x27   : > { %3967 = sst [smem:[#allocation20_spill]] %s2542_s5  ;;  %s147_s7 = sand.u32 1, %s2416_s16  }
  0x28   : > { %p2550_p9 = por %p3968_p1, %p35_p13  ;;  %p37_p3 = por %p36_p2, %p35_p13 }
  0x29   : > { %s2086_s8 = sshll.u32 %s147_s7, 3  ;;  %s2214_s9 = sshll.u32 %s2420_s17, 7 }
  0x2a   : > { %s3969_s6 = scalar_select %p2550_p9, 1, 0 }
  0x2b   : > { %s3970_s0 = sld [smem:[#allocation21_spill]]  ;;  %s151_s13 = scalar_lea.vmem [#allocation5], %s2086_s8 }
  0x2c   : > { %s159_s18 = sshll.u32 %s151_s13, 4  ;;  %p2565_p11 = pnand %p2237_p0, %p37_p3  ;;  %s2569_s18 = int_to_ptr.vmem [resolvable:$true] %s159_s18 }
  0x2d   : > { %s148_s22 = scalar_lea.sflag [#allocation6], %s147_s7 }
  0x2e   : > { %p2322_p13 = pneg %p2565_p11 }
  0x31   : > { %s2563_s12 = scalar_lea.hbm %s3970_s0, %s2214_s9  ;;  %s2325_s28 = scalar_lea.hbm %s3970_s0, 256 }
  0x32   : > { %s2320_s23 = scalar_lea.hbm %s2563_s12, 128  ;;  %p2326_p10 = scmp.lt.u32.totalorder %s2563_s12, %s3970_s0 }
  0x33   : > { %p2321_p12 = scmp.ne.s32.totalorder %s2563_s12, %s2320_s23  ;;  %p2327_p2 = scmp.lt.u32.totalorder %s2325_s28, %s2320_s23 }
  0x34   : > { %p2329_p0 = scmp.lt.u32.totalorder %s2320_s23, %s2563_s12 }
  0x35   : > { %p2323_p5 = pnand %p2322_p13, %p2321_p12  ;;  %p2328_p1 = por %p2327_p2, %p2326_p10 }
  0x37   : > { %p2324_p7 = pneg %p2323_p5  ;;  %p2330_p3 = por %p2329_p0, %p2328_p1 }
  0x39   : > { %p2331_p6 = pnand %p2330_p3, %p2324_p7 }
  0x3b   : > { %2334 = shalt.err (!%p2331_p6)
}
  0x3c   : > { %s2335_s4 = scalar_lea.vmem %s2569_s18, 128  ;;  %s2423_s7 = smov [#allocation5]  }
  0x3d   : > { %p2336_p12 = scmp.ne.s32.totalorder %s2569_s18, %s2335_s4  ;;  %s2340_s8 = sshll.u32 %s2423_s7, 4  ;;  %s2341_s8 = int_to_ptr.vmem [resolvable:$false] %s2340_s8 }
  0x3e   : > { %s2342_s9 = scalar_lea.vmem %s2341_s8, 256  ;;  %p2343_p4 = scmp.lt.s32.totalorder %s2569_s18, %s2341_s8 }
  0x3f   : > { %p2338_p5 = pnand %p2336_p12, %p2322_p13  ;;  %p2344_p10 = scmp.lt.s32.totalorder %s2342_s9, %s2335_s4 }
  0x41   : > { %p2339_p9 = pneg %p2338_p5  ;;  %p2345_p2 = por %p2344_p10, %p2343_p4 }
  0x43   : > { %p2346_p1 = pnand %p2345_p2, %p2339_p9 }
  0x45   : > { %2349 = shalt.err (!%p2346_p1)
}
  0x46   : > { %2231 = dma.hbm_to_vmem [thread:$0]  (!%p2565_p11), %s2563_s12, 128, %s2569_s18, %s148_s22  }
  0x47   : > { %168 = sbr.rel (%p2510_p8) target bundleno = 828 (0x33c), region = 32  ;;  %s2599_s10 = sand.u32 (!%p2510_p8), 1, %s2412_s15  }
  0x48   : > { %s2090_s11 = sshll.u32 (!%p2510_p8), %s2599_s10, 3  ;;  %s171_s13 = scalar_lea.sflag (!%p2510_p8), [#allocation6], %s2599_s10 }
  0x49   : > { %s174_s23 = scalar_lea.vmem (!%p2510_p8), [#allocation5], %s2090_s11  ;;  %p3972_p4 = scmp.ne.s32.totalorder (!%p2510_p8), %s3959_s19, 0 }
  0x4e   : > { %2395 = dma.done.wait (%p3972_p4), %s171_s13, 128  }
  0x4f   : > { %2397 = vsyncadd (%p3972_p4), %s171_s13, 4294967168  ;;  %p3973_p6 = scmp.eq.s32.totalorder %s2488_s2, 0 }
  0x51   : > { %2399 = dma.done.wait (%p3973_p6), [#allocation8], 16   ;;  %p3974_p9 = pmov %p3973_p6 }
  0x53   : > { %2401 = vsyncadd (%p3974_p9), [#allocation8], 4294967280 }
  0x54   : > { %183 = sfence }
  0x55   : > { %v202_v0 = vld [vmem:[%s174_s23] ss:$4 sm:$0x3]  ;;  %v2093_v1 = vld [vmem:[%s174_s23 + $0x1] ss:$4 sm:$0x3]  ;;  %v216_v2 = vlaneseq }
  0x56   : > { %v205_v3 = vadd.f32 %v2093_v1, %v202_v0  ;;  %v206_v4 = vmax.f32 %v202_v0, %v2093_v1  ;;  %v2094_v5 = vld [vmem:[%s174_s23 + $0x2] ss:$4 sm:$0x3]  ;;  %v2095_v6 = vld [vmem:[%s174_s23 + $0x3] ss:$4 sm:$0x3] }
  0x57   : > { %vm223_vm0 = vcmask 174080   ;;  %v2424_v9 = vmov 0.0   ;;  %vm228_vm1 = vcmask 23552   ;;  %vm236_vm2 = vcmask 179352   ;;  %s2425_s19 = smov 115   ;;  %s3919_s24 = smov 3  }
  0x58   : > { %v209_v7 = vadd.f32 %v2094_v5, %v205_v3  ;;  %v210_v8 = vmax.f32 %v206_v4, %v2094_v5  ;;  %224 = vst.msk [vmem:[#allocation3] sm:$0x7] %vm223_vm0, %v2424_v9  ;;  %225 = vst.msk [vmem:[#allocation3 + $0x18] sm:$0x7] %vm223_vm0, %v2424_v9  ;;  %vm218_vm3 = vcmp.lt.s32.totalorder %v216_v2, 256  ;;  %v255_v13 = vshrl.u32 %v216_v2, 7 }
  0x59   : > { %226 = vst.msk [vmem:[#allocation3 + $0x13] sm:$0x7] %vm223_vm0, %v2424_v9  ;;  %227 = vst.msk [vmem:[#allocation3 + $0x2b] sm:$0x7] %vm223_vm0, %v2424_v9  ;;  %s2427_s12 = smov 99   ;;  %s2428_s18 = smov 83  }
  0x5a   : > { %229 = vst.msk [vmem:[#allocation3] sm:$0xff] %vm228_vm1, %v2424_v9  ;;  %230 = vst.msk [vmem:[#allocation3 + $0x8] sm:$0xff] %vm228_vm1, %v2424_v9  ;;  %v213_v10 = vadd.f32 %v2095_v6, %v209_v7  ;;  %v214_v11 = vmax.f32 %v210_v8, %v2095_v6  ;;  %v256_v14 = vsub.s32 0, %v255_v13  ;;  %s2429_s21 = smov 67   ;;  %s2430_s22 = smov 51   ;;  %vm231_vm4 = vcmask 21504  }
  0x5b   : > { %234 = vst.msk [vmem:[#allocation3 + $0x20] sm:$0xff] %vm228_vm1, %v2424_v9  ;;  %233 = vst.msk [vmem:[#allocation3 + $0x18] sm:$0xff] %vm228_vm1, %v2424_v9  ;;  %s2431_s26 = smov 35   ;;  %s2432_s27 = smov 19   ;;  %vm239_vm5 = vcmask 177304   ;;  %vm268_vm6 = vcmask 147480  }
  0x5c   : > { %237 = vst.msk [vmem:[#allocation3] sm:$0xff] %vm236_vm2, %v2424_v9  ;;  %238 = vst.msk [vmem:[#allocation3 + $0x8] sm:$0xff] %vm236_vm2, %v2424_v9  ;;  %v215_v12 = vmul.f32 0.25, %v213_v10  ;;  %s2657_s28 = sld [smem:[#allocation9 + $0x4]]  ;;  %s2661_s29 = sld [smem:[#allocation9 + $0x5]]  ;;  %vm1980_vm7 = vcmask 130048  }
  0x5d   : > { %242 = vst.msk [vmem:[#allocation3 + $0x20] sm:$0xff] %vm236_vm2, %v2424_v9  ;;  %241 = vst.msk [vmem:[#allocation3 + $0x18] sm:$0xff] %vm236_vm2, %v2424_v9  ;;  %s2666_s30 = sld [smem:[#allocation9 + $0x6]]  ;;  %s2676_s4 = sld [smem:[#allocation9 + $0x7]] }
  0x5e   : > { %222 = vst.msk [vmem:[#allocation2 + $0x1] ss:$2 sm:$0x3] %vm218_vm3, %v214_v11  ;;  %220 = vst.msk [vmem:[#allocation2] ss:$2 sm:$0x3] %vm218_vm3, %v215_v12 }
  0x5f   : > { %232 = vst.msk [vmem:[#allocation3 + $0x10] sm:$0x3f] %vm231_vm4, %v2424_v9  ;;  %235 = vst.msk [vmem:[#allocation3 + $0x28] sm:$0x3f] %vm231_vm4, %v2424_v9  ;;  %s3917_s7 = smov 124   ;;  %s2685_s8 = sld [smem:[#allocation9 + $0x8]] }
  0x60   : > { %240 = vst.msk [vmem:[#allocation3 + $0x10] sm:$0x3f] %vm239_vm5, %v2424_v9  ;;  %243 = vst.msk [vmem:[#allocation3 + $0x28] sm:$0x3f] %vm239_vm5, %v2424_v9  ;;  %s2694_s9 = sld [smem:[#allocation9 + $0x9]]  ;;  %s2702_s11 = sld [smem:[#allocation9 + $0xa]] }
  0x61   : > { %s2710_s13 = sld [smem:[#allocation9 + $0xb]]  ;;  %s3923_s23 = smov 127  }
  0x62   : > { %v689_v33 = vstv %s2657_s28  ;;  %v703_v38 = vstv %s2661_s29  ;;  %s3927_s28 = smov 2   ;;  %s2777_s29 = sld [smem:[#allocation9 + $0x12]] }
  0x63   : > { %v717_v42 = vstv %s2666_s30  ;;  %v733_v47 = vstv %s2676_s4  ;;  %s3921_s30 = smov 126   ;;  %s2804_s4 = sld [smem:[#allocation9 + $0x15]] }
  0x64   : > { %s3979_s0 = smov 127   ;;  %s3980_s1 = smov 1  }
  0x65   : > { %v2097_v15 = vld.sshfl [vmem:[#allocation2] sm:$0x11 pattern:$0x75316420]  ;;  %v747_v51 = vstv %s2685_s8  ;;  %s2813_s8 = sld [smem:[#allocation9 + $0x16]]  ;;  %s3982_s5 = smov 125  }
  0x66   : > { %v284_v16 = vrot.slane %v2097_v15, %v256_v14  ;;  %v280_v17 = vcombine.high %v2097_v15, %v2097_v15  ;;  %v2104_v19 = vld.sshfl [vmem:[#allocation2 + $0x2] sm:$0x11 pattern:$0x75316420]  ;;  %v761_v55 = vstv %s2694_s9  ;;  %v775_v59 = vstv %s2702_s11  ;;  %s2822_s9 = sld [smem:[#allocation9 + $0x17]]  ;;  %s3931_s11 = smov 122  }
  0x67   : > { %v462_v20 = vcombine.high %v2104_v19, %v2104_v19  ;;  %v466_v21 = vrot.slane %v2104_v19, %v256_v14  ;;  %v789_v63 = vstv %s2710_s13  ;;  %s2831_s13 = sld [smem:[#allocation9 + $0x18]]  ;;  %s3187_s15 = sld [smem:[#allocation9 + $0x1]] }
  0x68   : > { %289 = vrot.lane.b32.xlu1 %v284_v16, %s2425_s19  ;;  %262 = vrot.lane.b32.xlu0 %v284_v16, %s3919_s24  ;;  %v288_v18 = vrot.slane %v280_v17, %v256_v14  ;;  %s3170_s16 = sld [smem:[#allocation9]]  ;;  %s3205_s25 = sld [smem:[#allocation9 + $0x2]] }
  0x69   : > { %v470_v22 = vrot.slane %v462_v20, %v256_v14  ;;  %s3209_s17 = sld [smem:[#allocation9 + $0x3]]  ;;  %s3228_s20 = sld [smem:[#allocation9 + $0x1c]] }
  0x6a   : > { %s3295_s14 = sld [smem:[#allocation9 + $0x3e]]  ;;  %s3322_s3 = sld [smem:[#allocation9 + $0x41]] }
  0x6b   : > { %p3996_p11 = scmp.ne.s32.totalorder %s3969_s6, 0 }
  0x6c   : > { %291 = vrot.lane.b32.xlu1 %v288_v18, %s2425_s19  ;;  %315 = vrot.lane.b32.xlu0 %v284_v16, %s2427_s12 }
  0x70   : > { %317 = vrot.lane.b32.xlu1 %v288_v18, %s2427_s12  ;;  %341 = vrot.lane.b32.xlu0 %v284_v16, %s2428_s18 }
  0x74   : > { %343 = vrot.lane.b32.xlu1 %v288_v18, %s2428_s18  ;;  %367 = vrot.lane.b32.xlu0 %v284_v16, %s2429_s21 }
  0x78   : > { %369 = vrot.lane.b32.xlu1 %v288_v18, %s2429_s21  ;;  %393 = vrot.lane.b32.xlu0 %v284_v16, %s2430_s22 }
  0x7c   : > { %395 = vrot.lane.b32.xlu1 %v288_v18, %s2430_s22  ;;  %264 = vrot.lane.b32.xlu0 %v288_v18, %s3919_s24 }
  0x80   : > { %421 = vrot.lane.b32.xlu1 %v288_v18, %s2431_s26  ;;  %419 = vrot.lane.b32.xlu0 %v284_v16, %s2431_s26 }
  0x84   : > { %447 = vrot.lane.b32.xlu1 %v288_v18, %s2432_s27  ;;  %445 = vrot.lane.b32.xlu0 %v284_v16, %s2432_s27 }
  0x88   : > { %471 = vrot.lane.b32.xlu0 %v466_v21, %s3919_s24  ;;  %473 = vrot.lane.b32.xlu1 %v470_v22, %s3919_s24 }
  0x8c   : > { %497 = vrot.lane.b32.xlu0 %v466_v21, %s2425_s19  ;;  %499 = vrot.lane.b32.xlu1 %v470_v22, %s2425_s19  ;;  %s2718_s19 = sld [smem:[#allocation9 + $0xc]] }
  0x90   : > { %523 = vrot.lane.b32.xlu0 %v466_v21, %s2427_s12  ;;  %525 = vrot.lane.b32.xlu1 %v470_v22, %s2427_s12  ;;  %s2726_s12 = sld [smem:[#allocation9 + $0xd]] }
  0x92   : > { %v803_v3 = vstv %s2718_s19  ;;  %s2849_s19 = sld [smem:[#allocation9 + $0x1a]] }
  0x94   : > { %549 = vrot.lane.b32.xlu0 %v466_v21, %s2428_s18  ;;  %551 = vrot.lane.b32.xlu1 %v470_v22, %s2428_s18  ;;  %s2734_s18 = sld [smem:[#allocation9 + $0xe]] }
  0x96   : > { %v817_v7 = vstv %s2726_s12  ;;  %s2858_s12 = sld [smem:[#allocation9 + $0x1b]] }
  0x98   : > { %575 = vrot.lane.b32.xlu0 %v466_v21, %s2429_s21  ;;  %577 = vrot.lane.b32.xlu1 %v470_v22, %s2429_s21  ;;  %s2742_s21 = sld [smem:[#allocation9 + $0xf]] }
  0x9a   : > { %v833_v14 = vstv %s2734_s18  ;;  %s3929_s18 = smov 125  }
  0x9c   : > { %601 = vrot.lane.b32.xlu0 %v466_v21, %s2430_s22  ;;  %603 = vrot.lane.b32.xlu1 %v470_v22, %s2430_s22  ;;  %s3915_s22 = smov 123  }
  0x9e   : > { %v847_v19 = vstv %s2742_s21  ;;  %s3976_s21 = smov 126  }
  0xa0   : > { %627 = vrot.lane.b32.xlu0 %v466_v21, %s2431_s26  ;;  %629 = vrot.lane.b32.xlu1 %v470_v22, %s2431_s26  ;;  %s2755_s26 = sld [smem:[#allocation9 + $0x10]] }
  0xa4   : > { %653 = vrot.lane.b32.xlu0 %v466_v21, %s2432_s27  ;;  %655 = vrot.lane.b32.xlu1 %v470_v22, %s2432_s27  ;;  %s2767_s27 = sld [smem:[#allocation9 + $0x11]] }
  0xa6   : > { %v861_v22 = vstv %s2755_s26  ;;  %s2887_s26 = sld [smem:[#allocation9 + $0x27]] }
  0xda   : > { %v290_v23 = vpop.permute.xlu1 %289  ;;  %v263_v24 = vpop.permute.xlu0 %262 }
  0xdb   : > { %295 = vst.msk [vmem:[#allocation3 + $0x4] sm:$0x1] %vm268_vm6, %v290_v23  ;;  %269 = vst.msk [vmem:[#allocation3 + $0x3] sm:$0x1] %vm268_vm6, %v263_v24 }
  0xde   : > { %v292_v25 = vpop.permute.xlu1 %291  ;;  %v316_v26 = vpop.permute.xlu0 %315 }
  0xdf   : > { %296 = vst.msk [vmem:[#allocation3 + $0x1c] sm:$0x1] %vm268_vm6, %v292_v25  ;;  %321 = vst.msk [vmem:[#allocation3 + $0x5] sm:$0x1] %vm268_vm6, %v316_v26  ;;  %v875_v26 = vstv %s2767_s27  ;;  %s2899_s27 = sld [smem:[#allocation9 + $0x2b]] }
  0xe2   : > { %v318_v27 = vpop.permute.xlu1 %317  ;;  %v342_v28 = vpop.permute.xlu0 %341 }
  0xe3   : > { %322 = vst.msk [vmem:[#allocation3 + $0x1d] sm:$0x1] %vm268_vm6, %v318_v27  ;;  %347 = vst.msk [vmem:[#allocation3 + $0x6] sm:$0x1] %vm268_vm6, %v342_v28 }
  0xe6   : > { %v344_v29 = vpop.permute.xlu1 %343  ;;  %v368_v30 = vpop.permute.xlu0 %367 }
  0xe7   : > { %348 = vst.msk [vmem:[#allocation3 + $0x1e] sm:$0x1] %vm268_vm6, %v344_v29  ;;  %373 = vst.msk [vmem:[#allocation3 + $0x7] sm:$0x1] %vm268_vm6, %v368_v30  ;;  %v889_v29 = vstv %s2777_s29  ;;  %s3977_s29 = smov 124  }
  0xea   : > { %v370_v31 = vpop.permute.xlu1 %369  ;;  %v394_v32 = vpop.permute.xlu0 %393 }
  0xeb   : > { %374 = vst.msk [vmem:[#allocation3 + $0x1f] sm:$0x1] %vm268_vm6, %v370_v31  ;;  %399 = vst.msk [vmem:[#allocation3 + $0x8] sm:$0x1] %vm268_vm6, %v394_v32 }
  0xee   : > { %v396_v34 = vpop.permute.xlu1 %395  ;;  %v265_v35 = vpop.permute.xlu0 %264  ;;  %v2668_v36 = vld [vmem:[#allocation3] sm:$0xff] }
  0xef   : > { %400 = vst.msk [vmem:[#allocation3 + $0x20] sm:$0x1] %vm268_vm6, %v396_v34  ;;  %270 = vst.msk [vmem:[#allocation3 + $0x1b] sm:$0x1] %vm268_vm6, %v265_v35  ;;  %v690_v37 = vmul.f32 %v689_v33, %v2668_v36  ;;  %v704_v41 = vmul.f32 %v703_v38, %v2668_v36  ;;  %v718_v45 = vmul.f32 %v717_v42, %v2668_v36 }
  0xf1   : > { %694 = vrot.lane.b32.xlu0 %v690_v37, %s3917_s7 }
  0xf2   : > { %v422_v39 = vpop.permute.xlu1 %421  ;;  %v420_v40 = vpop.permute.xlu0 %419  ;;  %v730_v46 = vld [vmem:[#allocation3 + $0x1] sm:$0xff] }
  0xf3   : > { %426 = vst.msk [vmem:[#allocation3 + $0x21] sm:$0x1] %vm268_vm6, %v422_v39  ;;  %425 = vst.msk [vmem:[#allocation3 + $0x9] sm:$0x1] %vm268_vm6, %v420_v40  ;;  %v734_v50 = vmul.f32 %v733_v47, %v730_v46  ;;  %v748_v54 = vmul.f32 %v747_v51, %v730_v46  ;;  %v762_v58 = vmul.f32 %v761_v55, %v730_v46  ;;  %v933_v40 = vstv %s2804_s4  ;;  %s2931_s4 = sld [smem:[#allocation9 + $0x37]] }
  0xf4   : > { %v776_v62 = vmul.f32 %v775_v59, %v730_v46  ;;  %v790_v2 = vmul.f32 %v789_v63, %v730_v46  ;;  %v804_v6 = vmul.f32 %v803_v3, %v730_v46  ;;  %v818_v11 = vmul.f32 %v817_v7, %v730_v46 }
  0xf5   : > { %708 = vrot.lane.b32.xlu0 %v704_v41, %s3917_s7  ;;  %v961_v46 = vstv %s2822_s9  ;;  %s2955_s9 = sld [smem:[#allocation9 + $0x43]] }
  0xf6   : > { %v448_v43 = vpop.permute.xlu1 %447  ;;  %v446_v44 = vpop.permute.xlu0 %445 }
  0xf7   : > { %452 = vst.msk [vmem:[#allocation3 + $0x22] sm:$0x1] %vm268_vm6, %v448_v43  ;;  %451 = vst.msk [vmem:[#allocation3 + $0xa] sm:$0x1] %vm268_vm6, %v446_v44  ;;  %v947_v43 = vstv %s2813_s8  ;;  %s2943_s8 = sld [smem:[#allocation9 + $0x3f]] }
  0xf9   : > { %722 = vrot.lane.b32.xlu0 %v718_v45, %s3917_s7 }
  0xfa   : > { %v472_v48 = vpop.permute.xlu0 %471  ;;  %v474_v49 = vpop.permute.xlu1 %473  ;;  %v830_v13 = vld [vmem:[#allocation3 + $0x2] sm:$0xff] }
  0xfb   : > { %477 = vst.msk [vmem:[#allocation3 + $0xb] sm:$0x1] %vm268_vm6, %v472_v48  ;;  %478 = vst.msk [vmem:[#allocation3 + $0x23] sm:$0x1] %vm268_vm6, %v474_v49  ;;  %v834_v17 = vmul.f32 %v833_v14, %v830_v13  ;;  %v848_v20 = vmul.f32 %v847_v19, %v830_v13  ;;  %v862_v24 = vmul.f32 %v861_v22, %v830_v13 }
  0xfc   : > { %v876_v27 = vmul.f32 %v875_v26, %v830_v13  ;;  %v890_v30 = vmul.f32 %v889_v29, %v830_v13 }
  0xfd   : > { %738 = vrot.lane.b32.xlu0 %v734_v50, %s3919_s24  ;;  %v975_v50 = vstv %s2831_s13  ;;  %s2969_s13 = sld [smem:[#allocation9 + $0x47]] }
  0xfe   : > { %v498_v52 = vpop.permute.xlu0 %497  ;;  %v500_v53 = vpop.permute.xlu1 %499  ;;  %v930_v39 = vld [vmem:[#allocation3 + $0x3] sm:$0xff] }
  0xff   : > { %503 = vst.msk [vmem:[#allocation3 + $0xc] sm:$0x1] %vm268_vm6, %v498_v52  ;;  %504 = vst.msk [vmem:[#allocation3 + $0x24] sm:$0x1] %vm268_vm6, %v500_v53  ;;  %v934_v41 = vmul.f32 %v933_v40, %v930_v39  ;;  %v948_v44 = vmul.f32 %v947_v43, %v930_v39  ;;  %v962_v48 = vmul.f32 %v961_v46, %v930_v39 }
 0x101   : > { %752 = vrot.lane.b32.xlu0 %v748_v54, %s3923_s23 }
 0x102   : > { %v524_v56 = vpop.permute.xlu0 %523  ;;  %v526_v57 = vpop.permute.xlu1 %525 }
 0x103   : > { %529 = vst.msk [vmem:[#allocation3 + $0xd] sm:$0x1] %vm268_vm6, %v524_v56  ;;  %530 = vst.msk [vmem:[#allocation3 + $0x25] sm:$0x1] %vm268_vm6, %v526_v57  ;;  %v1003_v56 = vstv %s2849_s19  ;;  %s2997_s19 = sld [smem:[#allocation9 + $0x4f]] }
 0x104   : > { %v1004_v57 = vmul.f32 %v1003_v56, %v930_v39 }
 0x105   : > { %766 = vrot.lane.b32.xlu0 %v762_v58, %s3923_s23 }
 0x106   : > { %v550_v60 = vpop.permute.xlu0 %549  ;;  %v552_v61 = vpop.permute.xlu1 %551 }
 0x107   : > { %555 = vst.msk [vmem:[#allocation3 + $0xe] sm:$0x1] %vm268_vm6, %v550_v60  ;;  %556 = vst.msk [vmem:[#allocation3 + $0x26] sm:$0x1] %vm268_vm6, %v552_v61 }
 0x109   : > { %780 = vrot.lane.b32.xlu0 %v776_v62, %s3923_s23  ;;  %v2884_v62 = vld [vmem:[#allocation3 + $0x4] sm:$0xff] }
 0x10a   : > { %v576_v0 = vpop.permute.xlu0 %575  ;;  %v578_v1 = vpop.permute.xlu1 %577 }
 0x10b   : > { %581 = vst.msk [vmem:[#allocation3 + $0xf] sm:$0x1] %vm268_vm6, %v576_v0  ;;  %582 = vst.msk [vmem:[#allocation3 + $0x27] sm:$0x1] %vm268_vm6, %v578_v1 }
 0x10d   : > { %794 = vrot.lane.b32.xlu0 %v790_v2, %s3923_s23  ;;  %v2896_v2 = vld [vmem:[#allocation3 + $0x5] sm:$0xff] }
 0x10e   : > { %v602_v4 = vpop.permute.xlu0 %601  ;;  %v604_v5 = vpop.permute.xlu1 %603 }
 0x10f   : > { %607 = vst.msk [vmem:[#allocation3 + $0x10] sm:$0x1] %vm268_vm6, %v602_v4  ;;  %608 = vst.msk [vmem:[#allocation3 + $0x28] sm:$0x1] %vm268_vm6, %v604_v5 }
 0x111   : > { %808 = vrot.lane.b32.xlu0 %v804_v6, %s3915_s22  ;;  %v1157_v6 = vstv %s2887_s26  ;;  %s3057_s26 = sld [smem:[#allocation9 + $0x21]] }
 0x112   : > { %v628_v8 = vpop.permute.xlu0 %627  ;;  %v2745_v9 = vld [vmem:[#allocation3 + $0x8] sm:$0xff]  ;;  %v630_v10 = vpop.permute.xlu1 %629 }
 0x113   : > { %633 = vst.msk [vmem:[#allocation3 + $0x11] sm:$0x1] %vm268_vm6, %v628_v8  ;;  %v691_v12 = vmul.f32 %v689_v33, %v2745_v9  ;;  %634 = vst.msk [vmem:[#allocation3 + $0x29] sm:$0x1] %vm268_vm6, %v630_v10  ;;  %v705_v18 = vmul.f32 %v703_v38, %v2745_v9  ;;  %v719_v21 = vmul.f32 %v717_v42, %v2745_v9 }
 0x114   : > { %v1158_v8 = vmul.f32 %v1157_v6, %v2896_v2 }
 0x115   : > { %822 = vrot.lane.b32.xlu0 %v818_v11, %s3915_s22  ;;  %696 = vrot.lane.b32.xlu1 %v691_v12, %s3917_s7  ;;  %s2786_s22 = sld [smem:[#allocation9 + $0x13]]  ;;  %v2918_v11 = vld [vmem:[#allocation3 + $0x6] sm:$0xff]  ;;  %v1215_v12 = vstv %s2899_s27  ;;  %s3072_s27 = sld [smem:[#allocation9 + $0x22]] }
 0x116   : > { %v654_v15 = vpop.permute.xlu0 %653  ;;  %v656_v16 = vpop.permute.xlu1 %655  ;;  %v731_v23 = vld [vmem:[#allocation3 + $0x9] sm:$0xff] }
 0x117   : > { %659 = vst.msk [vmem:[#allocation3 + $0x12] sm:$0x1] %vm268_vm6, %v654_v15  ;;  %660 = vst.msk [vmem:[#allocation3 + $0x2a] sm:$0x1] %vm268_vm6, %v656_v16  ;;  %v735_v25 = vmul.f32 %v733_v47, %v731_v23  ;;  %v749_v28 = vmul.f32 %v747_v51, %v731_v23  ;;  %v763_v31 = vmul.f32 %v761_v55, %v731_v23 }
 0x118   : > { %v777_v34 = vmul.f32 %v775_v59, %v731_v23  ;;  %v791_v38 = vmul.f32 %v789_v63, %v731_v23  ;;  %v805_v42 = vmul.f32 %v803_v3, %v731_v23  ;;  %v819_v45 = vmul.f32 %v817_v7, %v731_v23 }
 0x119   : > { %838 = vrot.lane.b32.xlu0 %v834_v17, %s3927_s28  ;;  %710 = vrot.lane.b32.xlu1 %v705_v18, %s3917_s7  ;;  %v976_v51 = vmul.f32 %v975_v50, %v930_v39  ;;  %v1017_v59 = vstv %s2858_s12  ;;  %v2940_v18 = vld [vmem:[#allocation3 + $0x18] sm:$0xff]  ;;  %v1386_v23 = vstv %s2931_s4  ;;  %s3012_s12 = sld [smem:[#allocation9 + $0x53]]  ;;  %s3119_s4 = sld [smem:[#allocation9 + $0x29]] }
 0x11a   : > { %v831_v47 = vld [vmem:[#allocation3 + $0xa] sm:$0xff]  ;;  %v1018_v60 = vmul.f32 %v1017_v59, %v930_v39 }
 0x11b   : > { %v903_v32 = vstv %s2786_s22  ;;  %v835_v49 = vmul.f32 %v833_v14, %v831_v47  ;;  %v849_v52 = vmul.f32 %v847_v19, %v831_v47  ;;  %v863_v55 = vmul.f32 %v861_v22, %v831_v47  ;;  %s2909_s22 = sld [smem:[#allocation9 + $0x2f]] }
 0x11c   : > { %v904_v33 = vmul.f32 %v903_v32, %v830_v13  ;;  %v877_v58 = vmul.f32 %v875_v26, %v831_v47  ;;  %v891_v61 = vmul.f32 %v889_v29, %v831_v47  ;;  %v905_v1 = vmul.f32 %v903_v32, %v831_v47 }
 0x11d   : > { %852 = vrot.lane.b32.xlu0 %v848_v20, %s3927_s28  ;;  %724 = vrot.lane.b32.xlu1 %v719_v21, %s3917_s7  ;;  %s2795_s7 = sld [smem:[#allocation9 + $0x14]]  ;;  %v1526_v32 = vstv %s2955_s9  ;;  %s3151_s9 = sld [smem:[#allocation9 + $0x2d]] }
 0x11e   : > { %v931_v7 = vld [vmem:[#allocation3 + $0xb] sm:$0xff] }
 0x11f   : > { %v935_v10 = vmul.f32 %v933_v40, %v931_v7  ;;  %v949_v14 = vmul.f32 %v947_v43, %v931_v7  ;;  %v963_v17 = vmul.f32 %v961_v46, %v931_v7  ;;  %v977_v22 = vmul.f32 %v975_v50, %v931_v7 }
 0x121   : > { %866 = vrot.lane.b32.xlu0 %v862_v24, %s3921_s30  ;;  %740 = vrot.lane.b32.xlu1 %v735_v25, %s3919_s24  ;;  %s3925_s24 = smov 1   ;;  %v1271_v15 = vstv %s2909_s22  ;;  %v1387_v25 = vmul.f32 %v1386_v23, %v2940_v18  ;;  %s3087_s22 = sld [smem:[#allocation9 + $0x25]] }
 0x122   : > { %v1272_v16 = vmul.f32 %v1271_v15, %v2918_v11 }
 0x123   : > { %v917_v35 = vstv %s2795_s7  ;;  %s2921_s7 = sld [smem:[#allocation9 + $0x33]] }
 0x124   : > { %v918_v37 = vmul.f32 %v917_v35, %v830_v13  ;;  %v919_v5 = vmul.f32 %v917_v35, %v831_v47  ;;  %v1216_v13 = vmul.f32 %v1215_v12, %v2918_v11  ;;  %v1019_v35 = vmul.f32 %v1017_v59, %v931_v7 }
 0x125   : > { %880 = vrot.lane.b32.xlu0 %v876_v27, %s3921_s30  ;;  %754 = vrot.lane.b32.xlu1 %v749_v28, %s3923_s23  ;;  %v2966_v27 = vld [vmem:[#allocation3 + $0x1a] sm:$0xff]  ;;  %v1470_v28 = vstv %s2943_s8  ;;  %s3136_s8 = sld [smem:[#allocation9 + $0x2a]] }
 0x129   : > { %894 = vrot.lane.b32.xlu0 %v890_v30, %s3921_s30  ;;  %768 = vrot.lane.b32.xlu1 %v763_v31, %s3923_s23  ;;  %v1330_v19 = vstv %s2921_s7  ;;  %v1471_v30 = vmul.f32 %v1470_v28, %v2966_v27  ;;  %v1005_v31 = vmul.f32 %v1003_v56, %v931_v7  ;;  %s3104_s7 = sld [smem:[#allocation9 + $0x26]] }
 0x12a   : > { %v1331_v21 = vmul.f32 %v1330_v19, %v2940_v18 }
 0x12d   : > { %908 = vrot.lane.b32.xlu0 %v904_v33, %s3921_s30  ;;  %782 = vrot.lane.b32.xlu1 %v777_v34, %s3923_s23  ;;  %s3975_s30 = smov 123   ;;  %v1527_v34 = vmul.f32 %v1526_v32, %v2966_v27 }
 0x131   : > { %922 = vrot.lane.b32.xlu0 %v918_v37, %s3931_s11  ;;  %796 = vrot.lane.b32.xlu1 %v791_v38, %s3923_s23  ;;  %s2840_s23 = sld [smem:[#allocation9 + $0x19]]  ;;  %v2992_v37 = vld [vmem:[#allocation3 + $0x1b] sm:$0xff]  ;;  %v1584_v38 = vstv %s2969_s13  ;;  %s3168_s13 = sld [smem:[#allocation9 + $0x2e]] }
 0x135   : > { %938 = vrot.lane.b32.xlu0 %v934_v41, %s3925_s24  ;;  %810 = vrot.lane.b32.xlu1 %v805_v42, %s3975_s30  ;;  %v1585_v41 = vmul.f32 %v1584_v38, %v2992_v37 }
 0x137   : > { %v989_v53 = vstv %s2840_s23  ;;  %s2981_s23 = sld [smem:[#allocation9 + $0x4b]] }
 0x138   : > { %v990_v54 = vmul.f32 %v989_v53, %v930_v39  ;;  %v991_v26 = vmul.f32 %v989_v53, %v931_v7  ;;  %v2995_v39 = vld [vmem:[#allocation3 + $0xc] sm:$0xff]  ;;  %v1754_v53 = vstv %s3012_s12  ;;  %v1071_v7 = vstv %s3057_s26  ;;  %s3223_s12 = sld [smem:[#allocation9 + $0x35]]  ;;  %s3277_s26 = sld [smem:[#allocation9 + $0x1e]] }
 0x139   : > { %952 = vrot.lane.b32.xlu0 %v948_v44, %s3925_s24  ;;  %824 = vrot.lane.b32.xlu1 %v819_v45, %s3975_s30  ;;  %v3010_v44 = vld [vmem:[#allocation3 + $0xd] sm:$0xff] }
 0x13d   : > { %966 = vrot.lane.b32.xlu0 %v962_v48, %s3925_s24  ;;  %840 = vrot.lane.b32.xlu1 %v835_v49, %s3927_s28  ;;  %s2867_s24 = sld [smem:[#allocation9 + $0x20]]  ;;  %v1640_v43 = vstv %s2981_s23  ;;  %v3024_v48 = vld [vmem:[#allocation3 + $0x1c] sm:$0xff]  ;;  %v1698_v49 = vstv %s2997_s19  ;;  %s3185_s23 = sld [smem:[#allocation9 + $0x31]] }
 0x13e   : > { %v1641_v46 = vmul.f32 %v1640_v43, %v2992_v37  ;;  %v1755_v56 = vmul.f32 %v1754_v53, %v3024_v48  ;;  %s3202_s19 = sld [smem:[#allocation9 + $0x32]] }
 0x141   : > { %980 = vrot.lane.b32.xlu0 %v976_v51, %s3929_s18  ;;  %854 = vrot.lane.b32.xlu1 %v849_v52, %s3927_s28  ;;  %s2876_s28 = sld [smem:[#allocation9 + $0x23]]  ;;  %v1699_v51 = vmul.f32 %v1698_v49, %v3024_v48  ;;  %v1159_v52 = vmul.f32 %v1157_v6, %v3010_v44 }
 0x143   : > { %v1057_v63 = vstv %s2867_s24  ;;  %s3027_s24 = sld [smem:[#allocation9 + $0x5b]] }
 0x144   : > { %v1058_v0 = vmul.f32 %v1057_v63, %v2884_v62  ;;  %v1059_v42 = vmul.f32 %v1057_v63, %v2995_v39 }
 0x145   : > { %994 = vrot.lane.b32.xlu0 %v990_v54, %s3929_s18  ;;  %868 = vrot.lane.b32.xlu1 %v863_v55, %s3976_s21  ;;  %v3040_v54 = vld [vmem:[#allocation3 + $0xe] sm:$0xff] }
 0x146   : > { %v1273_v63 = vmul.f32 %v1271_v15, %v3040_v54  ;;  %v3102_v15 = vld [vmem:[#allocation3 + $0x22] sm:$0xff] }
 0x147   : > { %v1101_v3 = vstv %s2876_s28  ;;  %s3042_s28 = sld [smem:[#allocation9 + $0x5f]] }
 0x148   : > { %v1102_v4 = vmul.f32 %v1101_v3, %v2896_v2  ;;  %v1103_v47 = vmul.f32 %v1101_v3, %v3010_v44 }
 0x149   : > { %1008 = vrot.lane.b32.xlu0 %v1004_v57, %s3929_s18  ;;  %882 = vrot.lane.b32.xlu1 %v877_v58, %s3976_s21  ;;  %v1217_v57 = vmul.f32 %v1215_v12, %v3040_v54  ;;  %v3054_v58 = vld [vmem:[#allocation3 + $0x1e] sm:$0xff]  ;;  %v1838_v59 = vstv %s3027_s24  ;;  %v1072_v12 = vmul.f32 %v1071_v7, %v2884_v62  ;;  %s3241_s24 = sld [smem:[#allocation9 + $0x36]] }
 0x14d   : > { %1022 = vrot.lane.b32.xlu0 %v1018_v60, %s3929_s18  ;;  %896 = vrot.lane.b32.xlu1 %v891_v61, %s3976_s21  ;;  %s3978_s18 = smov 3   ;;  %v1839_v61 = vmul.f32 %v1838_v59, %v3054_v58 }
 0x151   : > { %1062 = vrot.lane.b32.xlu0 %v1058_v0, %s3977_s29  ;;  %910 = vrot.lane.b32.xlu1 %v905_v1, %s3976_s21  ;;  %v1894_v0 = vstv %s3042_s28  ;;  %v3070_v1 = vld [vmem:[#allocation3 + $0x20] sm:$0xff]  ;;  %s3266_s28 = sld [smem:[#allocation9 + $0x3d]] }
 0x152   : > { %v1332_v6 = vmul.f32 %v1330_v19, %v3070_v1 }
 0x155   : > { %1106 = vrot.lane.b32.xlu0 %v1102_v4, %s3978_s18  ;;  %924 = vrot.lane.b32.xlu1 %v919_v5, %s3931_s11  ;;  %s3981_s11 = smov 2   ;;  %v1895_v5 = vmul.f32 %v1894_v0, %v3054_v58 }
 0x159   : > { %1162 = vrot.lane.b32.xlu0 %v1158_v8, %s3979_s0  ;;  %940 = vrot.lane.b32.xlu1 %v935_v10, %s3980_s1 }
 0x15d   : > { %1220 = vrot.lane.b32.xlu0 %v1216_v13, %s3981_s11  ;;  %954 = vrot.lane.b32.xlu1 %v949_v14, %s3980_s1  ;;  %v1388_v13 = vmul.f32 %v1386_v23, %v3070_v1  ;;  %v1085_v14 = vstv %s3072_s27  ;;  %s3302_s27 = sld [smem:[#allocation9 + $0x1f]] }
 0x15e   : > { %v1086_v19 = vmul.f32 %v1085_v14, %v2884_v62 }
 0x161   : > { %1276 = vrot.lane.b32.xlu0 %v1272_v16, %s3976_s21  ;;  %968 = vrot.lane.b32.xlu1 %v963_v17, %s3980_s1 }
 0x163   : > { %v2947_v20 = vpop.permute.xlu0 %694 }
 0x165   : > { %1335 = vrot.lane.b32.xlu0 %v1331_v21, %s3980_s1  ;;  %982 = vrot.lane.b32.xlu1 %v977_v22, %s3982_s5  ;;  %v1472_v21 = vmul.f32 %v1470_v28, %v3102_v15  ;;  %v1129_v22 = vstv %s3087_s22  ;;  %v1528_v28 = vmul.f32 %v1526_v32, %v3102_v15  ;;  %s3344_s22 = sld [smem:[#allocation9 + $0x42]] }
 0x167   : > { %v2959_v24 = vpop.permute.xlu0 %708 }
 0x169   : > { %1391 = vrot.lane.b32.xlu0 %v1387_v25, %s3982_s5  ;;  %996 = vrot.lane.b32.xlu1 %v991_v26, %s3982_s5  ;;  %v1130_v26 = vmul.f32 %v1129_v22, %v2896_v2 }
 0x16b   : > { %v2973_v29 = vpop.permute.xlu0 %722 }
 0x16d   : > { %1475 = vrot.lane.b32.xlu0 %v1471_v30, %s3978_s18  ;;  %1010 = vrot.lane.b32.xlu1 %v1005_v31, %s3982_s5  ;;  %v1143_v30 = vstv %s3104_s7  ;;  %v3134_v31 = vld [vmem:[#allocation3 + $0x23] sm:$0xff]  ;;  %s3367_s7 = sld [smem:[#allocation9 + $0x45]] }
 0x16e   : > { %v1586_v32 = vmul.f32 %v1584_v38, %v3134_v31  ;;  %v1642_v38 = vmul.f32 %v1640_v43, %v3134_v31 }
 0x16f   : > { %v2985_v33 = vpop.permute.xlu0 %738 }
 0x171   : > { %1531 = vrot.lane.b32.xlu0 %v1527_v34, %s3979_s0  ;;  %1024 = vrot.lane.b32.xlu1 %v1019_v35, %s3982_s5 }
 0x173   : > { %v3001_v40 = vpop.permute.xlu0 %752 }
 0x175   : > { %1589 = vrot.lane.b32.xlu0 %v1585_v41, %s3981_s11  ;;  %1064 = vrot.lane.b32.xlu1 %v1059_v42, %s3977_s29  ;;  %v1144_v41 = vmul.f32 %v1143_v30, %v2896_v2  ;;  %v1185_v42 = vstv %s3119_s4  ;;  %s3384_s4 = sld [smem:[#allocation9 + $0x46]] }
 0x177   : > { %v3016_v45 = vpop.permute.xlu0 %766 }
 0x179   : > { %1645 = vrot.lane.b32.xlu0 %v1641_v46, %s3976_s21  ;;  %1108 = vrot.lane.b32.xlu1 %v1103_v47, %s3978_s18 }
 0x17b   : > { %v3031_v50 = vpop.permute.xlu0 %780 }
 0x17d   : > { %1703 = vrot.lane.b32.xlu0 %v1699_v51, %s3980_s1  ;;  %1164 = vrot.lane.b32.xlu1 %v1159_v52, %s3979_s0  ;;  %v1186_v51 = vmul.f32 %v1185_v42, %v2896_v2  ;;  %v1201_v52 = vstv %s3136_s8  ;;  %s3395_s8 = sld [smem:[#allocation9 + $0x49]] }
 0x17e   : > { %v1202_v43 = vmul.f32 %v1201_v52, %v2918_v11 }
 0x17f   : > { %v3046_v55 = vpop.permute.xlu0 %794 }
 0x181   : > { %1759 = vrot.lane.b32.xlu0 %v1755_v56, %s3982_s5  ;;  %1222 = vrot.lane.b32.xlu1 %v1217_v57, %s3981_s11  ;;  %v3166_v56 = vld [vmem:[#allocation3 + $0x24] sm:$0xff] }
 0x183   : > { %v3061_v60 = vpop.permute.xlu0 %808 }
 0x185   : > { %1843 = vrot.lane.b32.xlu0 %v1839_v61, %s3978_s18  ;;  %1278 = vrot.lane.b32.xlu1 %v1273_v63, %s3976_s21  ;;  %v1700_v63 = vmul.f32 %v1698_v49, %v3166_v56  ;;  %v1756_v49 = vmul.f32 %v1754_v53, %v3166_v56 }
 0x187   : > { %v3076_v3 = vpop.permute.xlu1 %696  ;;  %v3078_v4 = vpop.permute.xlu0 %822 }
 0x189   : > { %1899 = vrot.lane.b32.xlu0 %v1895_v5, %s3979_s0  ;;  %1337 = vrot.lane.b32.xlu1 %v1332_v6, %s3980_s1  ;;  %v3942_v5 = vstv %s3151_s9 }
 0x18b   : > { %v3091_v8 = vpop.permute.xlu1 %710  ;;  %v3093_v10 = vpop.permute.xlu0 %838 }
 0x18d   : > { %1076 = vrot.lane.b32.xlu0 %v1072_v12, %s3977_s29  ;;  %1393 = vrot.lane.b32.xlu1 %v1388_v13, %s3982_s5  ;;  %v1244_v13 = vmul.f32 %v3942_v5, %v2918_v11 }
 0x18f   : > { %v3108_v16 = vpop.permute.xlu1 %724  ;;  %v3110_v17 = vpop.permute.xlu0 %852 }
 0x191   : > { %1090 = vrot.lane.b32.xlu0 %v1086_v19, %s3977_s29  ;;  %1477 = vrot.lane.b32.xlu1 %v1472_v21, %s3978_s18  ;;  %v3941_v19 = vstv %s3168_s13  ;;  %v3200_v21 = vld [vmem:[#allocation3 + $0x26] sm:$0xff] }
 0x193   : > { %v3123_v23 = vpop.permute.xlu1 %740  ;;  %v3125_v25 = vpop.permute.xlu0 %866 }
 0x195   : > { %1134 = vrot.lane.b32.xlu0 %v1130_v26, %s3979_s0  ;;  %1533 = vrot.lane.b32.xlu1 %v1528_v28, %s3979_s0  ;;  %v3939_v26 = vstv %s3170_s16 }
 0x197   : > { %v3140_v34 = vpop.permute.xlu1 %754  ;;  %v3142_v35 = vpop.permute.xlu0 %880 }
 0x199   : > { %1148 = vrot.lane.b32.xlu0 %v1144_v41, %s3979_s0  ;;  %1591 = vrot.lane.b32.xlu1 %v1586_v32, %s3981_s11  ;;  %v1258_v41 = vmul.f32 %v3941_v19, %v2918_v11  ;;  %v1840_v32 = vmul.f32 %v1838_v59, %v3200_v21  ;;  %v683_v19 = vstv %s3209_s17  ;;  %s3473_s17 = sld [smem:[#allocation9 + $0x3b]] }
 0x19b   : > { %v3155_v46 = vpop.permute.xlu1 %768  ;;  %v3157_v47 = vpop.permute.xlu0 %894 }
 0x19d   : > { %1190 = vrot.lane.b32.xlu0 %v1186_v51, %s3975_s30  ;;  %1647 = vrot.lane.b32.xlu1 %v1642_v38, %s3976_s21  ;;  %v666_v51 = vmul.f32 %v3939_v26, %v2668_v36  ;;  %v3940_v38 = vstv %s3185_s23  ;;  %v1896_v26 = vmul.f32 %v1894_v0, %v3200_v21 }
 0x19f   : > { %v3174_v57 = vpop.permute.xlu1 %782  ;;  %v3176_v61 = vpop.permute.xlu0 %908 }
 0x1a1   : > { %1206 = vrot.lane.b32.xlu0 %v1202_v43, %s3981_s11  ;;  %1705 = vrot.lane.b32.xlu1 %v1700_v63, %s3980_s1  ;;  %v3943_v43 = vstv %s3187_s15  ;;  %v700_v63 = vadd.f32 %v2947_v20, %v666_v51  ;;  %v3944_v51 = vstv %s3205_s25 }
 0x1a3   : > { %v3191_v6 = vpop.permute.xlu1 %796  ;;  %v923_v12 = vpop.permute.xlu0 %922  ;;  %v758_v20 = vadd.f32 %v3001_v40, %v700_v63  ;;  %v1073_v40 = vmul.f32 %v1071_v7, %v2995_v39  ;;  %v1033_v7 = vstv %s3228_s20  ;;  %s3488_s20 = sld [smem:[#allocation9 + $0x52]] }
 0x1a5   : > { %1248 = vrot.lane.b32.xlu0 %v1244_v13, %s3976_s21  ;;  %1761 = vrot.lane.b32.xlu1 %v1756_v49, %s3982_s5  ;;  %v1303_v49 = vmul.f32 %v3940_v38, %v2940_v18  ;;  %v814_v38 = vadd.f32 %v3061_v60, %v758_v20 }
 0x1a7   : > { %v3211_v28 = vpop.permute.xlu1 %810  ;;  %v939_v53 = vpop.permute.xlu0 %938 }
 0x1a9   : > { %1262 = vrot.lane.b32.xlu0 %v1258_v41, %s3976_s21  ;;  %1845 = vrot.lane.b32.xlu1 %v1840_v32, %s3978_s18  ;;  %v672_v41 = vmul.f32 %v3943_v43, %v2668_v36  ;;  %v1316_v32 = vstv %s3202_s19  ;;  %s3251_s18 = sld [smem:[#allocation9 + $0x1d]]  ;;  %s3558_s19 = sld [smem:[#allocation9 + $0x5e]] }
 0x1aa   : > { %v1317_v63 = vmul.f32 %v1316_v32, %v2940_v18 }
 0x1ab   : > { %v3231_v13 = vpop.permute.xlu1 %824  ;;  %v3233_v59 = vpop.permute.xlu0 %952  ;;  %v714_v0 = vadd.f32 %v2959_v24, %v672_v41  ;;  %v678_v24 = vmul.f32 %v3944_v51, %v2668_v36 }
 0x1ad   : > { %1307 = vrot.lane.b32.xlu0 %v1303_v49, %s3980_s1  ;;  %1901 = vrot.lane.b32.xlu1 %v1896_v26, %s3979_s0  ;;  %v772_v60 = vadd.f32 %v3016_v45, %v714_v0  ;;  %v872_v26 = vadd.f32 %v3125_v25, %v814_v38  ;;  %v1358_v49 = vstv %s3223_s12  ;;  %v728_v41 = vadd.f32 %v2973_v29, %v678_v24  ;;  %s3569_s12 = sld [smem:[#allocation9 + $0x61]] }
 0x1ae   : > { %v684_v45 = vmul.f32 %v683_v19, %v2668_v36  ;;  %v1087_v38 = vmul.f32 %v1085_v14, %v2995_v39  ;;  %v1034_v36 = vmul.f32 %v1033_v7, %v2884_v62 }
 0x1af   : > { %v3256_v5 = vpop.permute.xlu1 %840  ;;  %v3258_v43 = vpop.permute.xlu0 %966  ;;  %v828_v20 = vadd.f32 %v3078_v4, %v772_v60  ;;  %v928_v51 = vadd.f32 %v923_v12, %v872_v26  ;;  %v786_v29 = vadd.f32 %v3031_v50, %v728_v41  ;;  %v1039_v14 = vstv %s3251_s18  ;;  %s3612_s18 = sld [smem:[#allocation9 + $0x2c]] }
 0x1b0   : > { %v744_v50 = vadd.f32 %v2985_v33, %v684_v45  ;;  %v1131_v41 = vmul.f32 %v1129_v22, %v3010_v44  ;;  %v1040_v22 = vmul.f32 %v1039_v14, %v2884_v62 }
 0x1b1   : > { %1078 = vrot.lane.b32.xlu1 %v1073_v40, %s3977_s29  ;;  %1321 = vrot.lane.b32.xlu0 %v1317_v63, %s3980_s1  ;;  %v1359_v40 = vmul.f32 %v1358_v49, %v2940_v18  ;;  %v1372_v63 = vstv %s3241_s24  ;;  %v886_v4 = vadd.f32 %v3142_v35, %v828_v20  ;;  %v844_v24 = vadd.f32 %v3093_v10, %v786_v29  ;;  %s3593_s24 = sld [smem:[#allocation9 + $0x24]] }
 0x1b2   : > { %v1373_v20 = vmul.f32 %v1372_v63, %v2940_v18  ;;  %v800_v33 = vadd.f32 %v3046_v55, %v744_v50 }
 0x1b3   : > { %v3284_v0 = vpop.permute.xlu1 %854  ;;  %v981_v25 = vpop.permute.xlu0 %980  ;;  %v944_v35 = vadd.f32 %v939_v53, %v886_v4  ;;  %v900_v10 = vadd.f32 %v3157_v47, %v844_v24  ;;  %v3320_v53 = vld [vmem:[#allocation3 + $0x19] sm:$0xff]  ;;  %v1454_v24 = vstv %s3295_s14  ;;  %s3545_s14 = sld [smem:[#allocation9 + $0x5d]] }
 0x1b4   : > { %v986_v12 = vadd.f32 %v981_v25, %v928_v51  ;;  %v1440_v25 = vstv %s3266_s28  ;;  %v858_v55 = vadd.f32 %v3110_v17, %v800_v33  ;;  %v1455_v33 = vmul.f32 %v1454_v24, %v3320_v53  ;;  %s3624_s28 = sld [smem:[#allocation9 + $0x30]] }
 0x1b5   : > { %1092 = vrot.lane.b32.xlu1 %v1087_v38, %s3977_s29  ;;  %1363 = vrot.lane.b32.xlu0 %v1359_v40, %s3982_s5  ;;  %v1045_v38 = vstv %s3277_s26  ;;  %v958_v47 = vadd.f32 %v3233_v59, %v900_v10  ;;  %s3635_s26 = sld [smem:[#allocation9 + $0x34]] }
 0x1b6   : > { %v3307_v51 = vadd.f32 %v1034_v36, %v986_v12  ;;  %v1145_v12 = vmul.f32 %v1143_v30, %v3010_v44  ;;  %v1441_v36 = vmul.f32 %v1440_v25, %v3320_v53  ;;  %v914_v50 = vadd.f32 %v3176_v61, %v858_v55 }
 0x1b7   : > { %v3309_v60 = vpop.permute.xlu1 %868  ;;  %v995_v26 = vpop.permute.xlu0 %994  ;;  %v1046_v59 = vmul.f32 %v1045_v38, %v2884_v62 }
 0x1b8   : > { %v1000_v45 = vadd.f32 %v995_v26, %v944_v35  ;;  %v1051_v35 = vstv %s3302_s27  ;;  %v972_v30 = vadd.f32 %v3258_v43, %v914_v50  ;;  %v3983_v50 = vstv %s3151_s9  ;;  %s3409_s9 = sld [smem:[#allocation9 + $0x4a]]  ;;  %s3662_s27 = sld [smem:[#allocation9 + $0x40]] }
 0x1b9   : > { %1136 = vrot.lane.b32.xlu1 %v1131_v41, %s3979_s0  ;;  %1377 = vrot.lane.b32.xlu0 %v1373_v20, %s3982_s5  ;;  %v1187_v20 = vmul.f32 %v1185_v42, %v3010_v44 }
 0x1ba   : > { %v3332_v40 = vadd.f32 %v1040_v22, %v1000_v45  ;;  %v3950_v45 = vstv %s3322_s3  ;;  %v1052_v22 = vmul.f32 %v1051_v35, %v2884_v62 }
 0x1bb   : > { %v3334_v29 = vpop.permute.xlu1 %882  ;;  %v1009_v4 = vpop.permute.xlu0 %1008  ;;  %v1499_v62 = vmul.f32 %v3950_v45, %v2966_v27  ;;  %v1318_v45 = vmul.f32 %v1316_v32, %v3070_v1 }
 0x1bc   : > { %v1014_v17 = vadd.f32 %v1009_v4, %v958_v47  ;;  %v1203_v47 = vmul.f32 %v1201_v52, %v3040_v54  ;;  %v3948_v4 = vstv %s3344_s22 }
 0x1bd   : > { %1150 = vrot.lane.b32.xlu1 %v1145_v12, %s3979_s0  ;;  %1445 = vrot.lane.b32.xlu0 %v1441_v36, %s3977_s29  ;;  %v1513_v52 = vmul.f32 %v3948_v4, %v2966_v27  ;;  %v3951_v4 = vstv %s3395_s8 }
 0x1be   : > { %v3353_v26 = vadd.f32 %v1046_v59, %v1014_v17  ;;  %v1245_v17 = vmul.f32 %v3983_v50, %v3040_v54  ;;  %v3947_v59 = vstv %s3367_s7 }
 0x1bf   : > { %v3355_v61 = vpop.permute.xlu1 %896  ;;  %v1023_v41 = vpop.permute.xlu0 %1022 }
 0x1c0   : > { %v1028_v10 = vadd.f32 %v1023_v41, %v972_v30 }
 0x1c1   : > { %1192 = vrot.lane.b32.xlu1 %v1187_v20, %s3975_s30  ;;  %1459 = vrot.lane.b32.xlu0 %v1455_v33, %s3977_s29  ;;  %v3984_v20 = vstv %s3168_s13  ;;  %s3506_s13 = sld [smem:[#allocation9 + $0x59]] }
 0x1c2   : > { %v3371_v43 = vadd.f32 %v1052_v22, %v1028_v10  ;;  %v1259_v33 = vmul.f32 %v3984_v20, %v3040_v54  ;;  %v1555_v10 = vmul.f32 %v3947_v59, %v2966_v27  ;;  %v3985_v22 = vstv %s3170_s16  ;;  %s3420_s16 = sld [smem:[#allocation9 + $0x4d]] }
 0x1c3   : > { %v3373_v42 = vpop.permute.xlu1 %910  ;;  %v3375_v55 = vpop.permute.xlu0 %1062  ;;  %v3986_v54 = vstv %s3185_s23  ;;  %v3987_v59 = vstv %s3187_s15  ;;  %s3439_s15 = sld [smem:[#allocation9 + $0x4e]]  ;;  %s3527_s23 = sld [smem:[#allocation9 + $0x5a]] }
 0x1c4   : > { %v1304_v20 = vmul.f32 %v3986_v54, %v3070_v1 }
 0x1c5   : > { %1208 = vrot.lane.b32.xlu1 %v1203_v47, %s3981_s11  ;;  %1503 = vrot.lane.b32.xlu0 %v1499_v62, %s3979_s0  ;;  %v667_v47 = vmul.f32 %v3985_v22, %v2745_v9  ;;  %v3949_v62 = vstv %s3384_s4 }
 0x1c6   : > { %v1571_v22 = vmul.f32 %v3949_v62, %v2992_v37 }
 0x1c7   : > { %v925_v12 = vpop.permute.xlu1 %924  ;;  %v1107_v36 = vpop.permute.xlu0 %1106  ;;  %v701_v50 = vadd.f32 %v3076_v3, %v667_v47 }
 0x1c9   : > { %1250 = vrot.lane.b32.xlu1 %v1245_v17, %s3976_s21  ;;  %1517 = vrot.lane.b32.xlu0 %v1513_v52, %s3979_s0 }
 0x1cb   : > { %v941_v30 = vpop.permute.xlu1 %940  ;;  %v1163_v41 = vpop.permute.xlu0 %1162 }
 0x1cd   : > { %1264 = vrot.lane.b32.xlu1 %v1259_v33, %s3976_s21  ;;  %1559 = vrot.lane.b32.xlu0 %v1555_v10, %s3975_s30  ;;  %v673_v33 = vmul.f32 %v3987_v59, %v2745_v9  ;;  %v759_v10 = vadd.f32 %v3140_v34, %v701_v50  ;;  %v1613_v34 = vmul.f32 %v3951_v4, %v2992_v37  ;;  %v3988_v59 = vstv %s3205_s25  ;;  %s3463_s25 = sld [smem:[#allocation9 + $0x51]] }
 0x1cf   : > { %v955_v17 = vpop.permute.xlu1 %954  ;;  %v1221_v52 = vpop.permute.xlu0 %1220  ;;  %v715_v3 = vadd.f32 %v3091_v8, %v673_v33  ;;  %v815_v47 = vadd.f32 %v3211_v28, %v759_v10  ;;  %v679_v8 = vmul.f32 %v3988_v59, %v2745_v9  ;;  %v685_v10 = vmul.f32 %v683_v19, %v2745_v9 }
 0x1d0   : > { %v1035_v9 = vmul.f32 %v1033_v7, %v2995_v39  ;;  %v1112_v19 = vadd.f32 %v1107_v36, %v3371_v43  ;;  %v1374_v7 = vmul.f32 %v1372_v63, %v3070_v1  ;;  %v1684_v36 = vstv %s3439_s15  ;;  %s3715_s15 = sld [smem:[#allocation9 + $0x3a]] }
 0x1d1   : > { %1309 = vrot.lane.b32.xlu1 %v1304_v20, %s3980_s1  ;;  %1575 = vrot.lane.b32.xlu0 %v1571_v22, %s3981_s11  ;;  %v773_v50 = vadd.f32 %v3155_v46, %v715_v3  ;;  %v873_v28 = vadd.f32 %v3309_v60, %v815_v47  ;;  %v1626_v20 = vstv %s3409_s9  ;;  %v729_v32 = vadd.f32 %v3108_v16, %v679_v8  ;;  %v3486_v8 = vld [vmem:[#allocation3 + $0x21] sm:$0xff]  ;;  %s3702_s9 = sld [smem:[#allocation9 + $0x39]] }
 0x1d2   : > { %v1360_v46 = vmul.f32 %v1358_v49, %v3070_v1  ;;  %v1627_v60 = vmul.f32 %v1626_v20, %v2992_v37  ;;  %v1670_v3 = vstv %s3420_s16  ;;  %v745_v49 = vadd.f32 %v3123_v23, %v685_v10  ;;  %s3710_s16 = sld [smem:[#allocation9 + $0x50]] }
 0x1d3   : > { %v3431_v54 = vpop.permute.xlu1 %968  ;;  %v1277_v62 = vpop.permute.xlu0 %1276  ;;  %v829_v22 = vadd.f32 %v3231_v13, %v773_v50  ;;  %v929_v33 = vadd.f32 %v925_v12, %v873_v28  ;;  %v1168_v12 = vadd.f32 %v1163_v41, %v1112_v19  ;;  %v1671_v43 = vmul.f32 %v1670_v3, %v3024_v48 }
 0x1d4   : > { %v801_v23 = vadd.f32 %v3191_v6, %v745_v49  ;;  %v1041_v41 = vmul.f32 %v1039_v14, %v2995_v39  ;;  %v1685_v14 = vmul.f32 %v1684_v36, %v3024_v48  ;;  %v1420_v10 = vstv %s3473_s17  ;;  %s3737_s17 = sld [smem:[#allocation9 + $0x5c]] }
 0x1d5   : > { %1323 = vrot.lane.b32.xlu1 %v1318_v45, %s3980_s1  ;;  %1617 = vrot.lane.b32.xlu0 %v1613_v34, %s3976_s21  ;;  %v787_v45 = vadd.f32 %v3174_v57, %v729_v32  ;;  %v887_v16 = vadd.f32 %v3334_v29, %v829_v22  ;;  %v1226_v1 = vadd.f32 %v1221_v52, %v1168_v12  ;;  %v3542_v12 = vld [vmem:[#allocation3 + $0x1d] sm:$0xff] }
 0x1d6   : > { %v859_v6 = vadd.f32 %v3284_v0, %v801_v23  ;;  %v1442_v22 = vmul.f32 %v1440_v25, %v3486_v8  ;;  %v1726_v0 = vstv %s3463_s25  ;;  %v3990_v23 = vstv %s3344_s22  ;;  %s3994_s22 = smov 122   ;;  %s3722_s25 = sld [smem:[#allocation9 + $0x58]] }
 0x1d7   : > { %v983_v4 = vpop.permute.xlu1 %982  ;;  %v1336_v59 = vpop.permute.xlu0 %1335  ;;  %v845_v57 = vadd.f32 %v3256_v5, %v787_v45  ;;  %v945_v29 = vadd.f32 %v941_v30, %v887_v16  ;;  %v1282_v50 = vadd.f32 %v1277_v62, %v1226_v1  ;;  %v1047_v62 = vmul.f32 %v1045_v38, %v2995_v39 }
 0x1d8   : > { %v987_v13 = vadd.f32 %v983_v4, %v929_v33  ;;  %v915_v52 = vadd.f32 %v3373_v42, %v859_v6  ;;  %v1456_v16 = vmul.f32 %v1454_v24, %v3486_v8  ;;  %v1727_v38 = vmul.f32 %v1726_v0, %v3024_v48 }
 0x1d9   : > { %1365 = vrot.lane.b32.xlu1 %v1360_v46, %s3982_s5  ;;  %1631 = vrot.lane.b32.xlu0 %v1627_v60, %s3976_s21  ;;  %v901_v5 = vadd.f32 %v3355_v61, %v845_v57 }
 0x1da   : > { %v3475_v4 = vadd.f32 %v1035_v9, %v987_v13  ;;  %v973_v25 = vadd.f32 %v3431_v54, %v915_v52  ;;  %v1740_v13 = vstv %s3488_s20  ;;  %v1053_v54 = vmul.f32 %v1051_v35, %v2995_v39  ;;  %s3753_s20 = sld [smem:[#allocation9 + $0x60]] }
 0x1db   : > { %v997_v47 = vpop.permute.xlu1 %996  ;;  %v1392_v34 = vpop.permute.xlu0 %1391  ;;  %v959_v63 = vadd.f32 %v955_v17, %v901_v5  ;;  %v1341_v17 = vadd.f32 %v1336_v59, %v1282_v50  ;;  %v1421_v9 = vmul.f32 %v1420_v10, %v3320_v53  ;;  %v1741_v35 = vmul.f32 %v1740_v13, %v3024_v48 }
 0x1dc   : > { %v1001_v30 = vadd.f32 %v997_v47, %v945_v29  ;;  %v3989_v29 = vstv %s3322_s3  ;;  %v1808_v47 = vstv %s3506_s13  ;;  %v1514_v5 = vmul.f32 %v3990_v23, %v3102_v15  ;;  %s3556_s3 = sld [smem:[#allocation9 + $0x57]]  ;;  %s3803_s13 = sld [smem:[#allocation9 + $0x55]] }
 0x1dd   : > { %1379 = vrot.lane.b32.xlu1 %v1374_v7, %s3982_s5  ;;  %1675 = vrot.lane.b32.xlu0 %v1671_v43, %s3980_s1  ;;  %v1397_v42 = vadd.f32 %v1392_v34, %v1341_v17  ;;  %v1500_v39 = vmul.f32 %v3989_v29, %v3102_v15  ;;  %v1628_v23 = vmul.f32 %v1626_v20, %v3134_v31 }
 0x1de   : > { %v3496_v61 = vadd.f32 %v1041_v41, %v1001_v30  ;;  %v1809_v30 = vmul.f32 %v1808_v47, %v3542_v12  ;;  %v1822_v41 = vstv %s3527_s23  ;;  %v1672_v20 = vmul.f32 %v1670_v3, %v3166_v56  ;;  %s3813_s23 = sld [smem:[#allocation9 + $0x56]] }
 0x1df   : > { %v1011_v28 = vpop.permute.xlu1 %1010  ;;  %v1476_v32 = vpop.permute.xlu0 %1475  ;;  %v1423_v19 = vadd.f32 %v1421_v9, %v1397_v42 }
 0x1e0   : > { %v1015_v33 = vadd.f32 %v1011_v28, %v959_v63  ;;  %v3991_v28 = vstv %s3367_s7  ;;  %s3673_s7 = sld [smem:[#allocation9 + $0x44]] }
 0x1e1   : > { %1447 = vrot.lane.b32.xlu1 %v1442_v22, %s3977_s29  ;;  %1689 = vrot.lane.b32.xlu0 %v1685_v14, %s3980_s1  ;;  %v1481_v34 = vadd.f32 %v1476_v32, %v1423_v19  ;;  %v1556_v32 = vmul.f32 %v3991_v28, %v3102_v15  ;;  %v1823_v22 = vmul.f32 %v1822_v41, %v3542_v12  ;;  %v1866_v14 = vstv %s3545_s14  ;;  %s2215_s14 = sshll.u32 %s2488_s2, 8  ;;  %s2441_s2 = smov [#allocation10]  }
 0x1e2   : > { %v3515_v46 = vadd.f32 %v1047_v62, %v1015_v33  ;;  %v3993_v19 = vstv %s3395_s8  ;;  %s3698_s8 = sld [smem:[#allocation9 + $0x4c]] }
 0x1e3   : > { %v1025_v60 = vpop.permute.xlu1 %1024  ;;  %v1532_v45 = vpop.permute.xlu0 %1531 }
 0x1e4   : > { %v1029_v59 = vadd.f32 %v1025_v60, %v973_v25  ;;  %v1537_v1 = vadd.f32 %v1532_v45, %v1481_v34  ;;  %v3992_v25 = vstv %s3384_s4  ;;  %v1867_v60 = vmul.f32 %v1866_v14, %v3054_v58  ;;  %s3684_s4 = sld [smem:[#allocation9 + $0x48]] }
 0x1e5   : > { %1461 = vrot.lane.b32.xlu1 %v1456_v16, %s3977_s29  ;;  %1731 = vrot.lane.b32.xlu0 %v1727_v38, %s3982_s5  ;;  %v1572_v42 = vmul.f32 %v3992_v25, %v3134_v31  ;;  %v1788_v45 = vstv %s3556_s3  ;;  %v1880_v16 = vstv %s3558_s19 }
 0x1e6   : > { %v1055_v24 = vadd.f32 %v1053_v54, %v1029_v59  ;;  %v1789_v54 = vmul.f32 %v1788_v45, %v3542_v12  ;;  %v1881_v29 = vmul.f32 %v1880_v16, %v3054_v58 }
 0x1e7   : > { %v3534_v49 = vpop.permute.xlu1 %1064  ;;  %v1590_v57 = vpop.permute.xlu0 %1589 }
 0x1e8   : > { %v1595_v6 = vadd.f32 %v1590_v57, %v1537_v1  ;;  %v1614_v57 = vmul.f32 %v3993_v19, %v3134_v31 }
 0x1e9   : > { %1505 = vrot.lane.b32.xlu1 %v1500_v39, %s3979_s0  ;;  %1745 = vrot.lane.b32.xlu0 %v1741_v35, %s3982_s5  ;;  %v1922_v39 = vstv %s3569_s12 }
 0x1eb   : > { %v1109_v7 = vpop.permute.xlu1 %1108  ;;  %v1646_v43 = vpop.permute.xlu0 %1645 }
 0x1ec   : > { %v1651_v52 = vadd.f32 %v1646_v43, %v1595_v6 }
 0x1ed   : > { %1519 = vrot.lane.b32.xlu1 %v1514_v5, %s3979_s0  ;;  %1813 = vrot.lane.b32.xlu0 %v1809_v30, %s3977_s29  ;;  %v1923_v5 = vmul.f32 %v1922_v39, %v3054_v58  ;;  %v1113_v30 = vadd.f32 %v1109_v7, %v1055_v24 }
 0x1ef   : > { %v1165_v63 = vpop.permute.xlu1 %1164  ;;  %v1704_v50 = vpop.permute.xlu0 %1703 }
 0x1f0   : > { %v1709_v33 = vadd.f32 %v1704_v50, %v1651_v52  ;;  %v1169_v6 = vadd.f32 %v1165_v63, %v1113_v30 }
 0x1f1   : > { %1561 = vrot.lane.b32.xlu1 %v1556_v32, %s3975_s30  ;;  %1827 = vrot.lane.b32.xlu0 %v1823_v22, %s3977_s29  ;;  %v1115_v22 = vstv %s3593_s24  ;;  %s3995_s24 = sld [smem:[#allocation23_spill]] }
 0x1f3   : > { %v1223_v62 = vpop.permute.xlu1 %1222  ;;  %v1760_v17 = vpop.permute.xlu0 %1759 }
 0x1f4   : > { %v1765_v38 = vadd.f32 %v1760_v17, %v1709_v33  ;;  %v1227_v24 = vadd.f32 %v1223_v62, %v1169_v6  ;;  %v1686_v33 = vmul.f32 %v1684_v36, %v3166_v56  ;;  %v1728_v36 = vmul.f32 %v1726_v0, %v3166_v56 }
 0x1f5   : > { %1577 = vrot.lane.b32.xlu1 %v1572_v42, %s3981_s11  ;;  %1871 = vrot.lane.b32.xlu0 %v1867_v60, %s3979_s0  ;;  %s3603_s11 = sld [smem:[#allocation9 + $0x28]] }
 0x1f6   : > { %v1791_v35 = vadd.f32 %v1789_v54, %v1765_v38  ;;  %v1422_v54 = vmul.f32 %v1420_v10, %v3486_v8  ;;  %v1285_v10 = vstv %s3624_s28 }
 0x1f7   : > { %v1279_v59 = vpop.permute.xlu1 %1278  ;;  %v1844_v9 = vpop.permute.xlu0 %1843 }
 0x1f8   : > { %v1849_v1 = vadd.f32 %v1844_v9, %v1791_v35  ;;  %v1283_v7 = vadd.f32 %v1279_v59, %v1227_v24  ;;  %v1229_v59 = vstv %s3612_s18  ;;  %v3648_v35 = vld [vmem:[#allocation3 + $0x25] sm:$0xff]  ;;  %s1984_s18 = scalar_lea.sflag [#allocation7], %s2599_s10 }
 0x1f9   : > { %1619 = vrot.lane.b32.xlu1 %v1614_v57, %s3976_s21  ;;  %1885 = vrot.lane.b32.xlu0 %v1881_v29, %s3979_s0  ;;  %v1230_v57 = vmul.f32 %v1229_v59, %v2918_v11 }
 0x1fb   : > { %v1338_v34 = vpop.permute.xlu1 %1337  ;;  %v1900_v43 = vpop.permute.xlu0 %1899  ;;  %v1171_v62 = vstv %s3603_s11  ;;  %s3861_s11 = scalar_lea.hbm %s3995_s24, %s2215_s14 }
 0x1fc   : > { %v1905_v50 = vadd.f32 %v1900_v43, %v1849_v1  ;;  %v1342_v17 = vadd.f32 %v1338_v34, %v1283_v7  ;;  %v1344_v1 = vstv %s3635_s26  ;;  %s2354_s26 = sshll.u32 %s2441_s2, 4  ;;  %s2355_s26 = int_to_ptr.vmem [resolvable:$false] %s2354_s26 }
 0x1fd   : > { %1633 = vrot.lane.b32.xlu1 %v1628_v23, %s3976_s21  ;;  %1927 = vrot.lane.b32.xlu0 %v1923_v5, %s3975_s30  ;;  %v1286_v5 = vmul.f32 %v1285_v10, %v2918_v11  ;;  %v1345_v11 = vmul.f32 %v1344_v1, %v2940_v18 }
 0x1ff   : > { %v1394_v28 = vpop.permute.xlu1 %1393  ;;  %v1077_v32 = vpop.permute.xlu0 %1076 }
 0x200   : > { %v1082_v58 = vadd.f32 %v1077_v32, %v3332_v40  ;;  %v1116_v40 = vmul.f32 %v1115_v22, %v2896_v2  ;;  %v1398_v25 = vadd.f32 %v1394_v28, %v1342_v17 }
 0x201   : > { %1677 = vrot.lane.b32.xlu1 %v1672_v20, %s3980_s1  ;;  %1947 = vrot.lane.b32.xlu0 %v1905_v50, %s3979_s0 }
 0x202   : > { %v1424_v9 = vadd.f32 %v1422_v54, %v1398_v25  ;;  %v1598_v54 = vstv %s3684_s4 }
 0x203   : > { %v1478_v63 = vpop.permute.xlu1 %1477  ;;  %v1091_v52 = vpop.permute.xlu0 %1090 }
 0x204   : > { %v1096_v3 = vadd.f32 %v1091_v52, %v3353_v26  ;;  %v1172_v26 = vmul.f32 %v1171_v62, %v2896_v2  ;;  %v1742_v2 = vmul.f32 %v1740_v13, %v3166_v56  ;;  %v1482_v34 = vadd.f32 %v1478_v63, %v1424_v9 }
 0x205   : > { %1691 = vrot.lane.b32.xlu1 %v1686_v33, %s3980_s1  ;;  %1120 = vrot.lane.b32.xlu0 %v1116_v40, %s3979_s0  ;;  %s3651_s1 = sld [smem:[#allocation9 + $0x3c]]  ;;  %v1810_v13 = vmul.f32 %v1808_v47, %v3648_v35  ;;  %v1824_v47 = vmul.f32 %v1822_v41, %v3648_v35  ;;  %v1868_v41 = vmul.f32 %v1866_v14, %v3200_v21  ;;  %v1484_v33 = vstv %s3662_s27 }
 0x206   : > { %v1882_v14 = vmul.f32 %v1880_v16, %v3200_v21  ;;  %v1924_v16 = vmul.f32 %v1922_v39, %v3200_v21 }
 0x207   : > { %v1534_v42 = vpop.permute.xlu1 %1533  ;;  %v1135_v60 = vpop.permute.xlu0 %1134 }
 0x208   : > { %v1140_v38 = vadd.f32 %v1135_v60, %v1082_v58  ;;  %v1538_v6 = vadd.f32 %v1534_v42, %v1482_v34  ;;  %v1485_v42 = vmul.f32 %v1484_v33, %v2966_v27  ;;  %v1540_v60 = vstv %s3673_s7 }
 0x209   : > { %1733 = vrot.lane.b32.xlu1 %v1728_v36, %s3982_s5  ;;  %1176 = vrot.lane.b32.xlu0 %v1172_v26, %s3975_s30  ;;  %v1408_v34 = vstv %s3702_s9 }
 0x20b   : > { %v1592_v19 = vpop.permute.xlu1 %1591  ;;  %v1149_v0 = vpop.permute.xlu0 %1148  ;;  %v1426_v58 = vstv %s3651_s1  ;;  %s2356_s1 = scalar_lea.vmem %s2355_s26, 512 }
 0x20c   : > { %v1154_v29 = vadd.f32 %v1149_v0, %v1096_v3  ;;  %v1596_v50 = vadd.f32 %v1592_v19, %v1538_v6  ;;  %v1427_v18 = vmul.f32 %v1426_v58, %v3320_v53  ;;  %v1790_v3 = vmul.f32 %v1788_v45, %v3648_v35 }
 0x20d   : > { %1747 = vrot.lane.b32.xlu1 %v1742_v2, %s3982_s5  ;;  %1234 = vrot.lane.b32.xlu0 %v1230_v57, %s3976_s21 }
 0x20f   : > { %v1648_v43 = vpop.permute.xlu1 %1647  ;;  %v1191_v23 = vpop.permute.xlu0 %1190 }
 0x210   : > { %v1196_v30 = vadd.f32 %v1191_v23, %v1140_v38  ;;  %v1652_v24 = vadd.f32 %v1648_v43, %v1596_v50  ;;  %v1541_v38 = vmul.f32 %v1540_v60, %v2966_v27  ;;  %v1599_v27 = vmul.f32 %v1598_v54, %v2992_v37  ;;  %v2300_v37 = vld [vmem:[#allocation3 + $0x1b] sm:$0xff] }
 0x211   : > { %1815 = vrot.lane.b32.xlu1 %v1810_v13, %s3977_s29  ;;  %1290 = vrot.lane.b32.xlu0 %v1286_v5, %s3994_s22  ;;  %v1117_v5 = vmul.f32 %v1115_v22, %v3010_v44  ;;  %v1414_v44 = vstv %s3715_s15 }
 0x213   : > { %v1706_v28 = vpop.permute.xlu1 %1705  ;;  %v1207_v32 = vpop.permute.xlu0 %1206 }
 0x214   : > { %v1212_v20 = vadd.f32 %v1207_v32, %v1154_v29  ;;  %v1710_v7 = vadd.f32 %v1706_v28, %v1652_v24  ;;  %v1654_v29 = vstv %s3698_s8  ;;  %v1409_v32 = vmul.f32 %v1408_v34, %v3320_v53 }
 0x215   : > { %1829 = vrot.lane.b32.xlu1 %v1824_v47, %s3977_s29  ;;  %1349 = vrot.lane.b32.xlu0 %v1345_v11, %s3982_s5 }
 0x217   : > { %v1762_v63 = vpop.permute.xlu1 %1761  ;;  %v1249_v52 = vpop.permute.xlu0 %1248 }
 0x218   : > { %v1766_v40 = vadd.f32 %v1762_v63, %v1710_v7  ;;  %v1254_v2 = vadd.f32 %v1249_v52, %v1196_v30  ;;  %v1712_v30 = vstv %s3710_s16 }
 0x219   : > { %1873 = vrot.lane.b32.xlu1 %v1868_v41, %s3979_s0  ;;  %1431 = vrot.lane.b32.xlu0 %v1427_v18, %s3977_s29  ;;  %v1713_v7 = vmul.f32 %v1712_v30, %v3024_v48  ;;  %v1794_v41 = vstv %s3722_s25  ;;  %v1415_v18 = vmul.f32 %v1414_v44, %v3320_v53  ;;  %v2302_v48 = vld [vmem:[#allocation3 + $0xe] sm:$0xff] }
 0x21a   : > { %v1792_v36 = vadd.f32 %v1790_v3, %v1766_v40 }
 0x21b   : > { %v1846_v17 = vpop.permute.xlu1 %1845  ;;  %v1263_v25 = vpop.permute.xlu0 %1262 }
 0x21c   : > { %v1850_v9 = vadd.f32 %v1846_v17, %v1792_v36  ;;  %v1268_v6 = vadd.f32 %v1263_v25, %v1212_v20  ;;  %v1231_v17 = vmul.f32 %v2302_v48, %v1229_v59  ;;  %v1795_v25 = vmul.f32 %v1794_v41, %v3542_v12 }
 0x21d   : > { %1887 = vrot.lane.b32.xlu1 %v1882_v14, %s3979_s0  ;;  %1489 = vrot.lane.b32.xlu0 %v1485_v42, %s3979_s0  ;;  %v1852_v42 = vstv %s3737_s17 }
 0x21f   : > { %v1902_v45 = vpop.permute.xlu1 %1901  ;;  %v1308_v26 = vpop.permute.xlu0 %1307 }
 0x220   : > { %v1906_v19 = vadd.f32 %v1902_v45, %v1850_v9  ;;  %v1313_v43 = vadd.f32 %v1308_v26, %v1254_v2  ;;  %v1287_v26 = vmul.f32 %v2302_v48, %v1285_v10  ;;  %v1908_v9 = vstv %s3753_s20 }
 0x221   : > { %1929 = vrot.lane.b32.xlu1 %v1924_v16, %s3975_s30  ;;  %1545 = vrot.lane.b32.xlu0 %v1541_v38, %s3975_s30  ;;  %v2303_v16 = vld [vmem:[#allocation3 + $0x1e] sm:$0xff] }
 0x222   : > { %v1853_v38 = vmul.f32 %v2303_v16, %v1852_v42  ;;  %v1909_v2 = vmul.f32 %v2303_v16, %v1908_v9 }
 0x223   : > { %v1079_v0 = vpop.permute.xlu1 %1078  ;;  %v1322_v39 = vpop.permute.xlu0 %1321 }
 0x224   : > { %v1083_v57 = vadd.f32 %v1079_v0, %v3496_v61  ;;  %v1655_v61 = vmul.f32 %v2300_v37, %v1654_v29  ;;  %v1327_v22 = vadd.f32 %v1322_v39, %v1268_v6  ;;  %v2304_v39 = vld [vmem:[#allocation3 + $0x20] sm:$0xff]  ;;  %v1542_v6 = vmul.f32 %v1540_v60, %v3102_v15 }
 0x225   : > { %1949 = vrot.lane.b32.xlu1 %v1906_v19, %s3979_s0  ;;  %1603 = vrot.lane.b32.xlu0 %v1599_v27, %s3976_s21  ;;  %v1346_v27 = vmul.f32 %v2304_v39, %v1344_v1  ;;  %v1486_v1 = vmul.f32 %v1484_v33, %v3102_v15  ;;  %v1410_v60 = vmul.f32 %v1408_v34, %v3486_v8 }
 0x226   : > { %v1416_v34 = vmul.f32 %v1414_v44, %v3486_v8  ;;  %v1776_v44 = vstv %s3803_s13 }
 0x227   : > { %v1093_v23 = vpop.permute.xlu1 %1092  ;;  %v1364_v13 = vpop.permute.xlu0 %1363 }
 0x228   : > { %v1097_v50 = vadd.f32 %v1093_v23, %v3515_v46  ;;  %v1369_v28 = vadd.f32 %v1364_v13, %v1313_v43  ;;  %v2301_v46 = vld [vmem:[#allocation3 + $0xd] sm:$0xff]  ;;  %v1428_v23 = vmul.f32 %v1426_v58, %v3486_v8 }
 0x229   : > { %1122 = vrot.lane.b32.xlu1 %v1117_v5, %s3979_s0  ;;  %1659 = vrot.lane.b32.xlu0 %v1655_v61, %s3994_s22  ;;  %v1173_v24 = vmul.f32 %v2301_v46, %v1171_v62 }
 0x22a   : > { %v3742_v47 = vadd.f32 %v1409_v32, %v1369_v28  ;;  %v1600_v28 = vmul.f32 %v1598_v54, %v3134_v31 }
 0x22b   : > { %v1137_v11 = vpop.permute.xlu1 %1136  ;;  %v1378_v20 = vpop.permute.xlu0 %1377 }
 0x22c   : > { %v1141_v63 = vadd.f32 %v1137_v11, %v1083_v57  ;;  %v1383_v52 = vadd.f32 %v1378_v20, %v1327_v22  ;;  %v1656_v20 = vmul.f32 %v1654_v29, %v3134_v31  ;;  %v1714_v31 = vmul.f32 %v1712_v30, %v3166_v56 }
 0x22d   : > { %1178 = vrot.lane.b32.xlu1 %v1173_v24, %s3975_s30  ;;  %1717 = vrot.lane.b32.xlu0 %v1713_v7, %s3982_s5  ;;  %v1796_v56 = vmul.f32 %v1794_v41, %v3648_v35  ;;  %v1782_v41 = vstv %s3813_s23 }
 0x22e   : > { %v3757_v40 = vadd.f32 %v1415_v18, %v1383_v52 }
 0x22f   : > { %v1151_v62 = vpop.permute.xlu1 %1150  ;;  %v1446_v3 = vpop.permute.xlu0 %1445 }
 0x230   : > { %v1155_v14 = vadd.f32 %v1151_v62, %v1097_v50  ;;  %v1451_v54 = vadd.f32 %v1446_v3, %v3742_v47 }
 0x231   : > { %1236 = vrot.lane.b32.xlu1 %v1231_v17, %s3976_s21  ;;  %1799 = vrot.lane.b32.xlu0 %v1795_v25, %s3977_s29 }
 0x233   : > { %v1193_v36 = vpop.permute.xlu1 %1192  ;;  %v1460_v45 = vpop.permute.xlu0 %1459 }
 0x234   : > { %v1197_v59 = vadd.f32 %v1193_v36, %v1141_v63  ;;  %v1465_v47 = vadd.f32 %v1460_v45, %v3757_v40  ;;  %v1854_v40 = vmul.f32 %v1852_v42, %v3200_v21 }
 0x235   : > { %1292 = vrot.lane.b32.xlu1 %v1287_v26, %s3994_s22  ;;  %1857 = vrot.lane.b32.xlu0 %v1853_v38, %s3979_s0 }
 0x237   : > { %v1209_v19 = vpop.permute.xlu1 %1208  ;;  %v1504_v0 = vpop.permute.xlu0 %1503 }
 0x238   : > { %v1213_v10 = vadd.f32 %v1209_v19, %v1155_v14  ;;  %v1509_v29 = vadd.f32 %v1504_v0, %v1451_v54 }
 0x239   : > { %1351 = vrot.lane.b32.xlu1 %v1346_v27, %s3982_s5  ;;  %1913 = vrot.lane.b32.xlu0 %v1909_v2, %s3975_s30  ;;  %v1910_v2 = vmul.f32 %v1908_v9, %v3200_v21 }
 0x23b   : > { %v1251_v57 = vpop.permute.xlu1 %1250  ;;  %v1518_v43 = vpop.permute.xlu0 %1517 }
 0x23c   : > { %v1255_v32 = vadd.f32 %v1251_v57, %v1197_v59  ;;  %v1523_v30 = vadd.f32 %v1518_v43, %v1465_v47  ;;  %v1777_v59 = vmul.f32 %v1776_v44, %v3542_v12  ;;  %v1783_v57 = vmul.f32 %v1782_v41, %v3542_v12 }
 0x23d   : > { %1433 = vrot.lane.b32.xlu1 %v1428_v23, %s3977_s29 }
 0x23f   : > { %v1265_v13 = vpop.permute.xlu1 %1264  ;;  %v1560_v5 = vpop.permute.xlu0 %1559 }
 0x240   : > { %v1269_v46 = vadd.f32 %v1265_v13, %v1213_v10  ;;  %v1565_v62 = vadd.f32 %v1560_v5, %v1509_v29 }
 0x241   : > { %1491 = vrot.lane.b32.xlu1 %v1486_v1, %s3979_s0 }
 0x243   : > { %v1310_v37 = vpop.permute.xlu1 %1309  ;;  %v1576_v61 = vpop.permute.xlu0 %1575 }
 0x244   : > { %v1314_v33 = vadd.f32 %v1310_v37, %v1255_v32  ;;  %v1581_v14 = vadd.f32 %v1576_v61, %v1523_v30 }
 0x245   : > { %1547 = vrot.lane.b32.xlu1 %v1542_v6, %s3975_s30 }
 0x247   : > { %v1324_v50 = vpop.permute.xlu1 %1323  ;;  %v1618_v58 = vpop.permute.xlu0 %1617 }
 0x248   : > { %v1328_v24 = vadd.f32 %v1324_v50, %v1269_v46  ;;  %v1623_v25 = vadd.f32 %v1618_v58, %v1565_v62 }
 0x249   : > { %1605 = vrot.lane.b32.xlu1 %v1600_v28, %s3976_s21 }
 0x24b   : > { %v1366_v22 = vpop.permute.xlu1 %1365  ;;  %v1632_v11 = vpop.permute.xlu0 %1631 }
 0x24c   : > { %v1370_v15 = vadd.f32 %v1366_v22, %v1314_v33  ;;  %v1637_v45 = vadd.f32 %v1632_v11, %v1581_v14 }
 0x24d   : > { %1661 = vrot.lane.b32.xlu1 %v1656_v20, %s3994_s22 }
 0x24e   : > { %v1412_v7 = vadd.f32 %v1410_v60, %v1370_v15 }
 0x24f   : > { %v1380_v63 = vpop.permute.xlu1 %1379  ;;  %v1676_v52 = vpop.permute.xlu0 %1675 }
 0x250   : > { %v1384_v18 = vadd.f32 %v1380_v63, %v1328_v24  ;;  %v1681_v36 = vadd.f32 %v1676_v52, %v1623_v25 }
 0x251   : > { %1719 = vrot.lane.b32.xlu1 %v1714_v31, %s3982_s5  ;;  %s3835_s5 = sld [smem:[#allocation9 + $0x38]] }
 0x252   : > { %v1418_v3 = vadd.f32 %v1416_v34, %v1384_v18 }
 0x253   : > { %v1448_v48 = vpop.permute.xlu1 %1447  ;;  %v1690_v17 = vpop.permute.xlu0 %1689 }
 0x254   : > { %v1695_v19 = vadd.f32 %v1690_v17, %v1637_v45  ;;  %v1452_v9 = vadd.f32 %v1448_v48, %v1412_v7  ;;  %v1778_v48 = vmul.f32 %v1776_v44, %v3648_v35 }
 0x255   : > { %1801 = vrot.lane.b32.xlu1 %v1796_v56, %s3977_s29 }
 0x257   : > { %v1462_v26 = vpop.permute.xlu1 %1461  ;;  %v1732_v16 = vpop.permute.xlu0 %1731  ;;  %v1402_v44 = vstv %s3835_s5 }
 0x258   : > { %v1737_v38 = vadd.f32 %v1732_v16, %v1681_v36  ;;  %v1466_v60 = vadd.f32 %v1462_v26, %v1418_v3  ;;  %v1068_v3 = vadd.f32 %v3375_v55, %v3307_v51  ;;  %v1784_v26 = vmul.f32 %v1782_v41, %v3648_v35 }
 0x259   : > { %1859 = vrot.lane.b32.xlu1 %v1854_v40, %s3979_s0  ;;  %v1403_v51 = vmul.f32 %v1402_v44, %v3320_v53 }
 0x25a   : > { %v1779_v0 = vadd.f32 %v1777_v59, %v1737_v38 }
 0x25b   : > { %v1506_v39 = vpop.permute.xlu1 %1505  ;;  %v1746_v27 = vpop.permute.xlu0 %1745 }
 0x25c   : > { %v1751_v10 = vadd.f32 %v1746_v27, %v1695_v19  ;;  %v1510_v46 = vadd.f32 %v1506_v39, %v1452_v9 }
 0x25d   : > { %1915 = vrot.lane.b32.xlu1 %v1910_v2, %s3975_s30  ;;  %s3842_s30 = sld [smem:[#allocation9 + $0x54]] }
 0x25e   : > { %v1785_v42 = vadd.f32 %v1783_v57, %v1751_v10 }
 0x25f   : > { %v1520_v43 = vpop.permute.xlu1 %1519  ;;  %v1814_v23 = vpop.permute.xlu0 %1813 }
 0x260   : > { %v1819_v50 = vadd.f32 %v1814_v23, %v1779_v0  ;;  %v1524_v52 = vadd.f32 %v1520_v43, %v1466_v60  ;;  %v1069_v60 = vadd.f32 %v3534_v49, %v3475_v4 }
 0x263   : > { %v1562_v13 = vpop.permute.xlu1 %1561  ;;  %v1828_v5 = vpop.permute.xlu0 %1827  ;;  %v1770_v9 = vstv %s3842_s30 }
 0x264   : > { %v1833_v33 = vadd.f32 %v1828_v5, %v1785_v42  ;;  %v1566_v54 = vadd.f32 %v1562_v13, %v1510_v46 }
 0x267   : > { %v1578_v1 = vpop.permute.xlu1 %1577  ;;  %v1872_v37 = vpop.permute.xlu0 %1871 }
 0x268   : > { %v1877_v58 = vadd.f32 %v1872_v37, %v1819_v50  ;;  %v1582_v29 = vadd.f32 %v1578_v1, %v1524_v52 }
 0x26b   : > { %v1620_v61 = vpop.permute.xlu1 %1619  ;;  %v1886_v6 = vpop.permute.xlu0 %1885 }
 0x26c   : > { %v1891_v22 = vadd.f32 %v1886_v6, %v1833_v33  ;;  %v1624_v31 = vadd.f32 %v1620_v61, %v1566_v54 }
 0x26f   : > { %v1634_v28 = vpop.permute.xlu1 %1633  ;;  %v1928_v32 = vpop.permute.xlu0 %1927 }
 0x270   : > { %v1933_v21 = vadd.f32 %v1928_v32, %v1877_v58  ;;  %v1638_v7 = vadd.f32 %v1634_v28, %v1582_v29 }
 0x272   : > { %1937 = vrot.lane.b32.xlu0 %v1933_v21, %s3979_s0 }
 0x273   : > { %v1678_v11 = vpop.permute.xlu1 %1677  ;;  %v1948_v20 = vpop.permute.xlu0 %1947 }
 0x274   : > { %v1953_v15 = vadd.f32 %v1948_v20, %v1891_v22  ;;  %v1682_v18 = vadd.f32 %v1678_v11, %v1624_v31 }
 0x276   : > { %1957 = vrot.lane.b32.xlu0 %v1953_v15, %s3976_s21  ;;  %v1771_v15 = vmul.f32 %v1770_v9, %v3542_v12 }
 0x277   : > { %v1692_v24 = vpop.permute.xlu1 %1691  ;;  %v1121_v63 = vpop.permute.xlu0 %1120 }
 0x278   : > { %v1696_v17 = vadd.f32 %v1692_v24, %v1638_v7  ;;  %v1126_v14 = vadd.f32 %v1121_v63, %v1068_v3  ;;  %v1404_v7 = vmul.f32 %v1402_v44, %v3486_v8 }
 0x27b   : > { %v1734_v34 = vpop.permute.xlu1 %1733  ;;  %v1177_v47 = vpop.permute.xlu0 %1176 }
 0x27c   : > { %v1738_v62 = vadd.f32 %v1734_v34, %v1682_v18  ;;  %v1182_v16 = vadd.f32 %v1177_v47, %v1126_v14 }
 0x27e   : > { %v1780_v56 = vadd.f32 %v1778_v48, %v1738_v62 }
 0x27f   : > { %v1748_v30 = vpop.permute.xlu1 %1747  ;;  %v1235_v25 = vpop.permute.xlu0 %1234 }
 0x280   : > { %v1752_v36 = vadd.f32 %v1748_v30, %v1696_v17  ;;  %v1240_v59 = vadd.f32 %v1235_v25, %v1182_v16  ;;  %v1772_v16 = vmul.f32 %v1770_v9, %v3648_v35 }
 0x282   : > { %v1786_v40 = vadd.f32 %v1784_v26, %v1752_v36 }
 0x283   : > { %v1816_v45 = vpop.permute.xlu1 %1815  ;;  %v1291_v38 = vpop.permute.xlu0 %1290 }
 0x284   : > { %v1296_v19 = vadd.f32 %v1291_v38, %v1240_v59  ;;  %v1820_v43 = vadd.f32 %v1816_v45, %v1780_v56 }
 0x287   : > { %v1830_v0 = vpop.permute.xlu1 %1829  ;;  %v1350_v39 = vpop.permute.xlu0 %1349 }
 0x288   : > { %v1355_v27 = vadd.f32 %v1350_v39, %v1296_v19  ;;  %v1834_v5 = vadd.f32 %v1830_v0, %v1786_v40 }
 0x28a   : > { %v1405_v55 = vadd.f32 %v1403_v51, %v1355_v27 }
 0x28b   : > { %v1874_v2 = vpop.permute.xlu1 %1873  ;;  %v1432_v10 = vpop.permute.xlu0 %1431 }
 0x28c   : > { %v1878_v23 = vadd.f32 %v1874_v2, %v1820_v43  ;;  %v1437_v37 = vadd.f32 %v1432_v10, %v1405_v55 }
 0x28f   : > { %v1888_v57 = vpop.permute.xlu1 %1887  ;;  %v1490_v42 = vpop.permute.xlu0 %1489 }
 0x290   : > { %v1892_v61 = vadd.f32 %v1888_v57, %v1834_v5  ;;  %v1495_v50 = vadd.f32 %v1490_v42, %v1437_v37 }
 0x293   : > { %v1930_v41 = vpop.permute.xlu1 %1929  ;;  %v1546_v13 = vpop.permute.xlu0 %1545 }
 0x294   : > { %v1934_v1 = vadd.f32 %v1930_v41, %v1878_v23  ;;  %v1551_v28 = vadd.f32 %v1546_v13, %v1495_v50 }
 0x296   : > { %1939 = vrot.lane.b32.xlu1 %v1934_v1, %s3979_s0  ;;  %s3852_s0 = sld [smem:[#allocation4]] }
 0x297   : > { %v1950_v6 = vpop.permute.xlu1 %1949  ;;  %v1604_v53 = vpop.permute.xlu0 %1603 }
 0x298   : > { %v1954_v58 = vadd.f32 %v1950_v6, %v1892_v61  ;;  %v1609_v21 = vadd.f32 %v1604_v53, %v1551_v28 }
 0x29a   : > { %1959 = vrot.lane.b32.xlu1 %v1954_v58, %s3976_s21  ;;  %s2092_s21 = sshll.u32 %s2599_s10, 4 }
 0x29b   : > { %v1123_v32 = vpop.permute.xlu1 %1122  ;;  %v1660_v33 = vpop.permute.xlu0 %1659  ;;  %s201_s29 = scalar_lea.vmem [#allocation10], %s2092_s21 }
 0x29c   : > { %v1665_v22 = vadd.f32 %v1660_v33, %v1609_v21  ;;  %v1127_v63 = vadd.f32 %v1123_v32, %v1069_v60  ;;  %v1965_v27 = vstv %s3852_s0  ;;  %s1997_s3 = sshll.u32 %s201_s29, 4  ;;  %s3863_s3 = int_to_ptr.vmem [resolvable:$true] %s1997_s3 }
 0x29d   : > { %s2350_s28 = scalar_lea.vmem %s3863_s3, 256  ;;  %p2357_p0 = scmp.lt.s32.totalorder %s3863_s3, %s2355_s26 }
 0x29e   : > { %p2351_p8 = scmp.ne.s32.totalorder %s3863_s3, %s2350_s28  ;;  %p2358_p3 = scmp.lt.s32.totalorder %s2356_s1, %s2350_s28 }
 0x29f   : > { %v1179_v11 = vpop.permute.xlu1 %1178  ;;  %v1718_v20 = vpop.permute.xlu0 %1717 }
 0x2a0   : > { %v1723_v46 = vadd.f32 %v1718_v20, %v1665_v22  ;;  %v1183_v52 = vadd.f32 %v1179_v11, %v1127_v63  ;;  %p2352_p13 = pnand %p2351_p8, %p3996_p11  ;;  %p2359_p12 = por %p2358_p3, %p2357_p0 }
 0x2a2   : > { %v1773_v54 = vadd.f32 %v1771_v15, %v1723_v46  ;;  %p2353_p7 = pneg %p2352_p13 }
 0x2a3   : > { %v1237_v24 = vpop.permute.xlu1 %1236  ;;  %v1800_v45 = vpop.permute.xlu0 %1799 }
 0x2a4   : > { %v1241_v29 = vadd.f32 %v1237_v24, %v1183_v52  ;;  %v1805_v8 = vadd.f32 %v1800_v45, %v1773_v54  ;;  %p2360_p5 = pnand %p2359_p12, %p2353_p7 }
 0x2a7   : > { %v1293_v31 = vpop.permute.xlu1 %1292  ;;  %v1858_v38 = vpop.permute.xlu0 %1857 }
 0x2a8   : > { %v1297_v18 = vadd.f32 %v1293_v31, %v1241_v29  ;;  %v1863_v44 = vadd.f32 %v1858_v38, %v1805_v8 }
 0x2ab   : > { %v1352_v34 = vpop.permute.xlu1 %1351  ;;  %v1914_v59 = vpop.permute.xlu0 %1913 }
 0x2ac   : > { %v1356_v47 = vadd.f32 %v1352_v34, %v1297_v18  ;;  %v1919_v0 = vadd.f32 %v1914_v59, %v1863_v44 }
 0x2ae   : > { %v1406_v62 = vadd.f32 %v1404_v7, %v1356_v47 }
 0x2af   : > { %v1434_v48 = vpop.permute.xlu1 %1433 }
 0x2b0   : > { %v1438_v56 = vadd.f32 %v1434_v48, %v1406_v62 }
 0x2b3   : > { %v1492_v3 = vpop.permute.xlu1 %1491 }
 0x2b4   : > { %v1496_v30 = vadd.f32 %v1492_v3, %v1438_v56 }
 0x2b7   : > { %v1548_v17 = vpop.permute.xlu1 %1547 }
 0x2b8   : > { %v1552_v25 = vadd.f32 %v1548_v17, %v1496_v30 }
 0x2bb   : > { %v1606_v12 = vpop.permute.xlu1 %1605 }
 0x2bc   : > { %v1610_v49 = vadd.f32 %v1606_v12, %v1552_v25 }
 0x2bf   : > { %v1662_v4 = vpop.permute.xlu1 %1661 }
 0x2c0   : > { %v1666_v14 = vadd.f32 %v1662_v4, %v1610_v49 }
 0x2c3   : > { %v1720_v36 = vpop.permute.xlu1 %1719 }
 0x2c4   : > { %v1724_v26 = vadd.f32 %v1720_v36, %v1666_v14 }
 0x2c6   : > { %v1774_v40 = vadd.f32 %v1772_v16, %v1724_v26 }
 0x2c7   : > { %v1802_v35 = vpop.permute.xlu1 %1801 }
 0x2c8   : > { %v1806_v13 = vadd.f32 %v1802_v35, %v1774_v40 }
 0x2cb   : > { %v1860_v23 = vpop.permute.xlu1 %1859 }
 0x2cc   : > { %v1864_v5 = vadd.f32 %v1860_v23, %v1806_v13 }
 0x2cf   : > { %v1916_v41 = vpop.permute.xlu1 %1915 }
 0x2d0   : > { %v1920_v61 = vadd.f32 %v1916_v41, %v1864_v5 }
 0x2e4   : > { %v1938_v19 = vpop.permute.xlu0 %1937 }
 0x2e5   : > { %v1943_v39 = vadd.f32 %v1938_v19, %v1919_v0 }
 0x2e8   : > { %v1958_v51 = vpop.permute.xlu0 %1957 }
 0x2e9   : > { %v1963_v55 = vadd.f32 %v1958_v51, %v1943_v39 }
 0x2eb   : > { %v1966_v2 = vadd.f32 %v1965_v27, %v1963_v55 }
 0x2ed   : > { %v1968_v10 = vsub.f32 0.0, %v1966_v2 }
 0x2ef   : > { %v1970_v57 = vmul.f32 1.442695, %v1968_v10 }
 0x2f1   : > { %2292 = vpow2.f32 %v1970_v57 }
 0x2fb   : > { %v2293_v42 = vpop.eup %2292 }
 0x2fc   : > { %v1974_v43 = vadd.f32 1.0, %v2293_v42 }
 0x2fe   : > { %2294 = vrcp.f32 %v1974_v43 }
 0x308   : > { %v2295_v1 = vpop.eup %2294  ;;  %v1940_v37 = vpop.permute.xlu1 %1939 }
 0x309   : > { %1981 = vst.msk [vmem:[%s201_s29] sm:$0xff] %vm1980_vm7, %v2295_v1  ;;  %v1944_v6 = vadd.f32 %v1940_v37, %v1920_v61 }
 0x30c   : > { %v1960_v53 = vpop.permute.xlu1 %1959 }
 0x30d   : > { %v1964_v50 = vadd.f32 %v1960_v53, %v1944_v6 }
 0x30f   : > { %v1967_v58 = vadd.f32 %v1965_v27, %v1964_v50 }
 0x311   : > { %v1969_v28 = vsub.f32 0.0, %v1967_v58 }
 0x313   : > { %v1972_v32 = vmul.f32 1.442695, %v1969_v28 }
 0x315   : > { %2296 = vpow2.f32 %v1972_v32 }
 0x31f   : > { %v2297_v33 = vpop.eup %2296 }
 0x320   : > { %v1975_v21 = vadd.f32 1.0, %v2297_v33 }
 0x322   : > { %2298 = vrcp.f32 %v1975_v21 }
 0x32c   : > { %v2299_v9 = vpop.eup %2298 }
 0x32d   : > { %1982 = vst.msk [vmem:[%s201_s29 + $0x8] sm:$0xff] %vm1980_vm7, %v2299_v9 }
 0x32e   : > { %2363 = shalt.err (!%p2360_p5)
}
 0x32f   : > { %s2364_s27 = scalar_lea.hbm %s3861_s11, 256  ;;  %s2368_s4 = scalar_lea.hbm %s3995_s24, 512 }
 0x330   : > { %p2365_p10 = scmp.ne.s32.totalorder %s3861_s11, %s2364_s27  ;;  %p2369_p4 = scmp.lt.u32.totalorder %s3861_s11, %s3995_s24 }
 0x331   : > { %p2370_p6 = scmp.lt.u32.totalorder %s2368_s4, %s2364_s27  ;;  %p2372_p8 = scmp.lt.u32.totalorder %s2364_s27, %s3861_s11 }
 0x332   : > { %p2366_p2 = pnand %p2365_p10, %p3996_p11 }
 0x333   : > { %p2371_p9 = por %p2370_p6, %p2369_p4 }
 0x334   : > { %p2367_p1 = pneg %p2366_p2 }
 0x335   : > { %p2373_p13 = por %p2372_p8, %p2371_p9 }
 0x337   : > { %p2374_p7 = pnand %p2373_p13, %p2367_p1 }
 0x339   : > { %2377 = shalt.err (!%p2374_p7)
}
 0x33a   : > { %s2442_s16 = smov 128   ;;  %s2443_s15 = smov 8  }
 0x33b   : > { %2222 = dma.vmem_to_hbm [thread:$0]  (%p3996_p11), %s3863_s3, 256, %s3861_s11, %s1984_s18, %s2442_s16, %s2442_s16, %s2443_s15  }
 0x33c PF: > { %s3997_s25 = sld [smem:[#allocation14_spill]]  ;;  %s3998_s17 = sld [smem:[#allocation18_spill]] }
 0x33d   : > { %s3999_s20 = sld [smem:[#allocation17_spill]] }
 0x342   : > { %s2012_s13 = sand.u32 1, %s3997_s25   ;;  %p4000_p0 = scmp.ne.s32.totalorder %s3998_s17, 0 }
 0x343   : > { %p4001_p3 = scmp.ge.s32.totalorder %s3999_s20, 2  ;;  %s2013_s23 = scalar_lea.sflag [#allocation7], %s2012_s13 }
 0x345   : > { %p2233_p12 = pnand %p4001_p3, %p4000_p0 }
 0x347   : > { %2403 = dma.done.wait (!%p2233_p12), %s2013_s23, 256  }
 0x348   : > { %2405 = vsyncadd (!%p2233_p12), %s2013_s23, 4294967040  ;;  %s4002_s17 = sld [smem:[#allocation19_spill]]  ;;  %s4003_s14 = sld [smem:[#allocation15_spill]] }
 0x349   : > { %s4004_s15 = sld [smem:[#allocation16_spill]]  ;;  %s4005_s16 = sld [smem:[#allocation20_spill]] }
 0x34e   : > { %p18_p5 = scmp.ge.s32.totalorder %s4002_s17, 4  }
 0x350   :  { %20 = sbr.rel (!%p18_p5) target bundleno = 11 (0xb), region = 87 }
 0x357   :  { %2018 = vsyncpa [#allocation6], 1 }
 0x358   :  { %2020 = vsyncpa [#allocation6 + $0x1], 1 }
 0x359   :  { %2021 = vsyncpa [#allocation7], 1 }
 0x35a   :  { %2023 = vsyncpa [#allocation7 + $0x1], 1 }
 0x35b   :  { %2024 = vsyncpa [#allocation8], 1 }
 0x35c   :  { %2026 = vsyncpa [#allocation8 + $0x1], 1 }

</bundles_post_ra>
